<compile_context>
chip_gen: v6e
topology: v6e:2x2x1
jax: 0.10.0
libtpu: 0.0.40
codegen_flags: <defaults>
</compile_context>

<pallas_src>
import numpy as np

import jax
import jax.numpy as jnp
from jax import lax
from jax.experimental import pallas as pl
from jax.experimental.pallas import tpu as pltpu


_MSSSIM_WEIGHTS = (0.0448, 0.2856, 0.3001, 0.2363, 0.1333)
_SIGMA = 1.5


# ---------------------------------------------------------------------------
# Host-side (numpy) construction of the per-level conv / pool operators.
# ---------------------------------------------------------------------------

def _gauss1d(n, sigma=_SIGMA):
    xs = np.arange(n, dtype=np.float64)
    g = np.exp(-((xs - n // 2) ** 2) / (2.0 * sigma ** 2))
    return g / g.sum()


def _band(out_n, in_n, taps, stride, vals):
    """B[o, i] = vals[i - stride*o] for 0 <= i - stride*o < taps, else 0."""
    m = np.zeros((out_n, in_n), dtype=np.float64)
    for o in range(out_n):
        for t in range(taps):
            i = stride * o + t
            if i < in_n:
                m[o, i] = vals[t]
    return m


def _build_plan(H, W, window_size, levels):
    """Static per-level plan + the small operator matrices shipped to the kernel.

    Non-degenerate levels ("conv"): Gaussian conv as two folded matmuls using a
    right band matrix Gw (w, ow_padded_to_8) and Gh^T (h, oh); pooling uses
    Pw (w, w//2) and Ph^T (h, h//2).
    Degenerate levels ("deep", oh == ow == 1): a single (hd, wd) Gaussian weight
    mask, placed on a dilated grid so the planes never need compaction.
    """
    mats, steps, counts = [], [], []
    h, w = H, W
    deep, dil = False, 1
    hd = wd = None
    for lvl in range(levels):
        ws = min(window_size, h, w)
        oh, ow = h - ws + 1, w - ws + 1
        counts.append(oh * ow)
        last = lvl == levels - 1
        if not deep and oh == 1 and ow == 1:
            deep, dil = True, 1
            hd, wd = h, w
        if deep:
            gh = _gauss1d(h)
            gw1 = _gauss1d(w)
            w2d = np.zeros((hd, wd), dtype=np.float64)
            for i in range(h):
                for j in range(w):
                    w2d[i * dil, j * dil] = gh[i] * gw1[j]
            mats.append(w2d.astype(np.float32))
            steps.append(dict(kind="deep", mask_idx=len(mats) - 1, dil=dil))
            if not last:
                h, w = h // 2, w // 2
                dil *= 2
        else:
            g = _gauss1d(ws)
            owp = -(-ow // 8) * 8            # pad ow to a sublane multiple
            gw = np.zeros((w, owp), dtype=np.float64)
            gw[:, :ow] = _band(ow, w, ws, 1, g).T
            ght = _band(oh, h, ws, 1, g).T   # (h, oh)
            mats.append(gw.astype(np.float32))
            gw_idx = len(mats) - 1
            mats.append(ght.astype(np.float32))
            ght_idx = len(mats) - 1
            step = dict(kind="conv", ow=ow, owp=owp, oh=oh,
                        gw_idx=gw_idx, ght_idx=ght_idx, pool=None)
            if not last:
                h2, w2 = h // 2, w // 2
                half = np.array([0.5, 0.5], dtype=np.float64)
                pw = _band(w2, w, 2, 2, half).T    # (w, w2)
                pht = _band(h2, h, 2, 2, half).T   # (h, h2)
                mats.append(pw.astype(np.float32))
                pw_idx = len(mats) - 1
                mats.append(pht.astype(np.float32))
                pht_idx = len(mats) - 1
                step["pool"] = dict(pw_idx=pw_idx, pht_idx=pht_idx)
                h, w = h2, w2
            steps.append(step)
    return mats, steps, counts


# ---------------------------------------------------------------------------
# Generation-aware tiling policy.
# ---------------------------------------------------------------------------

def _vmem_capacity_bytes():
    try:
        info = pltpu.get_tpu_info()
        for name in ("vmem_capacity_bytes", "vmem_size_bytes", "vmem_bytes"):
            v = getattr(info, name, None)
            if v:
                return int(v)
    except Exception:
        pass
    return 64 << 20  # conservative default (v7x per-TensorCore size)


def _choose_planes(nc, H, W, vmem_cap):
    """Planes per grid step + explicit VMEM limit.

    Single-TC chips (v5e/v6e, 128 MiB VMEM): one fat grid step.
    64 MiB/TC chips (v7x-class, 2 TCs): prefer an even grid count so the
    "parallel" grid axis balances across both TensorCores.
    """
    vmem_limit = max(32 << 20, min(int(vmem_cap * 3 // 4), 100 << 20))
    lane_pad = -(-W // 128) * 128
    # live set per plane at the finest level: double-buffered inputs + the
    # 5-quantity stack (W lanes) + conv intermediates (lane padded).
    per_plane = (10 * H * W + 12 * H * lane_pad) * 4
    budget = max(per_plane, vmem_limit // 2)
    p = max(1, min(nc, budget // per_plane))
    while nc % p:
        p -= 1
    g = nc // p
    two_core_chip = vmem_cap <= (64 << 20)
    if two_core_chip and g % 2 == 1 and nc % 2 == 0:
        q = p
        while q >= 1:
            if nc % q == 0 and (nc // q) % 2 == 0:
                p = q
                break
            q -= 1
    return p, vmem_limit


# ---------------------------------------------------------------------------
# The fused kernel.
# ---------------------------------------------------------------------------

def _make_msssim_kernel(P, levels, steps, n_mats):

    def _mm(x, m):
        """x: (B, R, C) @ m: (C, K) -> (B, R, K); fast path folds B*R into M."""
        B, R, C = x.shape
        K = m.shape[1]
        if R % 8 == 0:
            y = jnp.dot(x.reshape(B * R, C), m,
                        preferred_element_type=jnp.float32)
            return y.reshape(B, R, K)
        # Rare fallback (odd-sized pyramid levels only): batched matmul with the
        # small operator broadcast along the plane axis.
        return lax.dot_general(
            x, jnp.broadcast_to(m, (B,) + m.shape),
            dimension_numbers=(((2,), (1,)), ((0,), (0,))),
            preferred_element_type=jnp.float32)

    def _sep(x, right, left_t):
        """Per plane b: left_t.T @ x[b] @ right, returned TRANSPOSED as
        (B, right_cols, left_t_cols).  Downstream math is elementwise + sums,
        so the transposed orientation is free to keep."""
        r = _mm(x, right)            # (B, h, owp)   lane-contraction matmul
        rt = jnp.swapaxes(r, 1, 2)   # (B, owp, h)   one XLU minor-dims transpose
        return _mm(rt, left_t)       # (B, owp, oh)  sublane conv as folded matmul

    def kernel(*refs):
        cvals_ref = refs[0]
        mats = refs[1:1 + n_mats]
        x1_ref, x2_ref = refs[1 + n_mats], refs[2 + n_mats]
        ssim_out_ref, cs_out_ref = refs[3 + n_mats], refs[4 + n_mats]

        x1 = x1_ref[...]          # (P, H, W) f32, resident for all levels
        x2 = x2_ref[...]
        ssim_parts, cs_parts = [], []

        for lvl, st in enumerate(steps):
            c1 = cvals_ref[2 * lvl]
            c2 = cvals_ref[2 * lvl + 1]

            if st["kind"] == "conv":
                gw = mats[st["gw_idx"]][...]      # (w, owp)
                ght = mats[st["ght_idx"]][...]    # (h, oh)
                # 5 SSIM quantities batched into the conv-matmul M dimension.
                q = jnp.concatenate([x1, x2, x1 * x1, x2 * x2, x1 * x2], axis=0)
                conv = _sep(q, gw, ght)           # (5P, owp, oh), transposed maps
                mu1, mu2 = conv[0:P], conv[P:2 * P]
                e11 = conv[2 * P:3 * P]
                e22 = conv[3 * P:4 * P]
                e12 = conv[4 * P:5 * P]
            else:
                # Degenerate 1x1-output level: the Gaussian window covers the
                # whole (dilated) plane -> pure VPU weighted sums, no MXU.
                w2d = mats[st["mask_idx"]][...]   # (hd, wd) dilated weight mask

                def _wsum(a, w2d=w2d):
                    s = jnp.sum(a * w2d[None, :, :], axis=2, keepdims=True)
                    return jnp.sum(s, axis=1, keepdims=True)

                mu1, mu2 = _wsum(x1), _wsum(x2)
                e11, e22, e12 = _wsum(x1 * x1), _wsum(x2 * x2), _wsum(x1 * x2)

            mu1_sq = mu1 * mu1
            mu2_sq = mu2 * mu2
            mu1_mu2 = mu1 * mu2
            sigma1_sq = e11 - mu1_sq
            sigma2_sq = e22 - mu2_sq
            sigma12 = e12 - mu1_mu2

            v1 = 2.0 * sigma12 + c2
            v2 = sigma1_sq + sigma2_sq + c2
            cs_map = v1 * pl.reciprocal(v2, approx=True)
            if st["kind"] == "conv" and st["owp"] != st["ow"]:
                # Rows produced by the zero-padded Gw columns would contribute
                # ~1.0 each to the means; zeroing cs_map also zeroes ssim_map.
                row = lax.broadcasted_iota(jnp.int32, (st["owp"], st["oh"]), 0)
                cs_map = jnp.where((row < st["ow"])[None, :, :], cs_map, 0.0)
            ssim_map = (2.0 * mu1_mu2 + c1) * cs_map * \
                pl.reciprocal(mu1_sq + mu2_sq + c1, approx=True)

            ssim_parts.append(jnp.sum(ssim_map))
            cs_parts.append(jnp.sum(cs_map))

            if lvl < levels - 1:
                if st["kind"] == "conv":
                    pool = st["pool"]
                    pw = mats[pool["pw_idx"]][...]    # (w, w2)
                    pht = mats[pool["pht_idx"]][...]  # (h, h2)
                    xp = jnp.concatenate([x1, x2], axis=0)
                    pooled = jnp.swapaxes(_sep(xp, pw, pht), 1, 2)  # (2P,h2,w2)
                    x1, x2 = pooled[0:P], pooled[P:2 * P]
                else:
                    # Dilated 2x2 avg-pool: planes keep their (hd, wd) extent,
                    # valid samples sit on a stride-2*dil grid; the next level's
                    # weight mask is zero elsewhere, so roll wrap-around junk
                    # never reaches the means.
                    s = st["dil"]

                    def _dpool(a, s=s):
                        a = a + jnp.roll(a, -s, axis=2)
                        a = a + jnp.roll(a, -s, axis=1)
                        return 0.25 * a

                    x1, x2 = _dpool(x1), _dpool(x2)

        # Lane-dense per-group partial sums: sublane `lvl` of the (8,128) tile
        # holds that level's partial sum (replicated across lanes).
        rows = lax.broadcasted_iota(jnp.int32, (8, 128), 0)
        stile = jnp.zeros((8, 128), jnp.float32)
        ctile = jnp.zeros((8, 128), jnp.float32)
        for lvl in range(levels):
            stile = jnp.where(rows == lvl, ssim_parts[lvl], stile)
            ctile = jnp.where(rows == lvl, cs_parts[lvl], ctile)
        ssim_out_ref[...] = stile[None, :, :]
        cs_out_ref[...] = ctile[None, :, :]

    return kernel


# ---------------------------------------------------------------------------
# Wrapper.
# ---------------------------------------------------------------------------

def _avg_pool2_planes(x):
    """F.avg_pool2d(x, (2,2)) on (B, H, W) planes (stride 2, no pad, floor)."""
    B, H, W = x.shape
    H2, W2 = H // 2, W // 2
    x = x[:, :H2 * 2, :W2 * 2].reshape(B, H2, 2, W2, 2)
    return x.mean(axis=(2, 4))


def msssim_pallas(img1, img2, window_size=11):
    """MS-SSIM(img1, img2); img1 drives dynamic-range detection (reference
    behavior).  img1/img2: (N, C, H, W)."""
    levels = len(_MSSSIM_WEIGHTS)
    weights = jnp.array(_MSSSIM_WEIGHTS, dtype=jnp.float32)

    N, C, H, W = img1.shape
    NC = N * C
    x1 = img1.reshape(NC, H, W).astype(jnp.float32)
    x2 = img2.reshape(NC, H, W).astype(jnp.float32)

    mats_np, steps, per_plane_counts = _build_plan(H, W, window_size, levels)
    counts = jnp.array([NC * c for c in per_plane_counts], dtype=jnp.float32)

    # Per-level dynamic-range constants C1/C2 (global min/max of img1 at each
    # pyramid level, exactly as the reference), passed to the kernel via SMEM.
    cvals = []
    t = x1
    for lvl in range(levels):
        max_val = jnp.where(jnp.max(t) > 128, 255.0, 1.0)
        min_val = jnp.where(jnp.min(t) < -0.5, -1.0, 0.0)
        L = max_val - min_val
        cvals.append((0.01 * L) ** 2)
        cvals.append((0.03 * L) ** 2)
        if lvl < levels - 1:
            t = _avg_pool2_planes(t)
    cvals = jnp.stack(cvals).astype(jnp.float32)          # (2*levels,)

    vmem_cap = _vmem_capacity_bytes()
    P, vmem_limit = _choose_planes(NC, H, W, vmem_cap)
    G = NC // P

    kernel = _make_msssim_kernel(P, levels, steps, len(mats_np))
    mat_args = [jnp.asarray(m) for m in mats_np]

    in_specs = (
        [pl.BlockSpec(memory_space=pltpu.MemorySpace.SMEM)]          # C1/C2
        + [pl.BlockSpec(m.shape, lambda g: (0, 0)) for m in mats_np]  # operators
        + [pl.BlockSpec((P, H, W), lambda g: (g, 0, 0)),              # x1
           pl.BlockSpec((P, H, W), lambda g: (g, 0, 0))]              # x2
    )

    ssim_out, cs_out = pl.pallas_call(
        kernel,
        out_shape=(
            jax.ShapeDtypeStruct((G, 8, 128), jnp.float32),
            jax.ShapeDtypeStruct((G, 8, 128), jnp.float32),
        ),
        grid=(G,),
        in_specs=in_specs,
        out_specs=(
            pl.BlockSpec((1, 8, 128), lambda g: (g, 0, 0)),
            pl.BlockSpec((1, 8, 128), lambda g: (g, 0, 0)),
        ),
        compiler_params=pltpu.CompilerParams(
            dimension_semantics=("parallel",),
            vmem_limit_bytes=int(vmem_limit),
        ),
    )(cvals, *mat_args, x1, x2)

    mssim = jnp.sum(ssim_out[:, :levels, 0], axis=0) / counts
    mcs = jnp.sum(cs_out[:, :levels, 0], axis=0) / counts

    pow1 = mcs ** weights
    pow2 = mssim ** weights
    # Same (broadcasting) final formula as the reference repo.
    return jnp.prod(pow1[:-1] * pow2[-1])


def msssim_loss(pred, target, loss_weight=1.0):
    """MSSSIMLoss.forward: loss_weight * (1 - MSSSIM()(target, pred))."""
    return loss_weight * (1.0 - msssim_pallas(target, pred))


if __name__ == "__main__":
    key = jax.random.PRNGKey(0)
    k1, k2 = jax.random.split(key)
    N, C, H, W = 2, 3, 32, 32
    target = jax.random.uniform(k1, (N, C, H, W), dtype=jnp.float32)
    noise = 0.05 * jax.random.normal(k2, (N, C, H, W), dtype=jnp.float32)
    pred = jnp.clip(target + noise, 0.0, 1.0)

    loss_fn = jax.jit(msssim_loss)
    loss = loss_fn(pred, target)
    jax.block_until_ready(loss)
    assert np.isfinite(float(loss))
    print("KERNEL_OK")
</pallas_src>

<mosaic_0001>
module attributes {stable_mosaic.version = 11 : i64} {
  func.func @kernel(%arg0: i32, %arg1: memref<10xf32, #tpu.memory_space<smem>>, %arg2: memref<32x24xf32, #tpu.memory_space<vmem>>, %arg3: memref<32x22xf32, #tpu.memory_space<vmem>>, %arg4: memref<32x16xf32, #tpu.memory_space<vmem>>, %arg5: memref<32x16xf32, #tpu.memory_space<vmem>>, %arg6: memref<16x8xf32, #tpu.memory_space<vmem>>, %arg7: memref<16x6xf32, #tpu.memory_space<vmem>>, %arg8: memref<16x8xf32, #tpu.memory_space<vmem>>, %arg9: memref<16x8xf32, #tpu.memory_space<vmem>>, %arg10: memref<8x8xf32, #tpu.memory_space<vmem>>, %arg11: memref<8x8xf32, #tpu.memory_space<vmem>>, %arg12: memref<8x8xf32, #tpu.memory_space<vmem>>, %arg13: memref<3x32x32xf32, #tpu.memory_space<vmem>>, %arg14: memref<3x32x32xf32, #tpu.memory_space<vmem>>, %arg15: memref<1x8x128xf32, #tpu.memory_space<vmem>>, %arg16: memref<1x8x128xf32, #tpu.memory_space<vmem>>) attributes {dimension_semantics = [#tpu.dimension_semantics<parallel>], iteration_bounds = array<i64: 2>, scalar_prefetch = 0 : i64, scratch_operands = 0 : i64, tpu.core_type = #tpu.core_type<tc>, window_params = [{transform_indices = @transform_0, window_bounds = array<i64: 10>}, {pipeline_mode = #tpu.pipeline_mode<synchronous>, transform_indices = @transform_1, window_bounds = array<i64: 32, 24>}, {pipeline_mode = #tpu.pipeline_mode<synchronous>, transform_indices = @transform_2, window_bounds = array<i64: 32, 22>}, {pipeline_mode = #tpu.pipeline_mode<synchronous>, transform_indices = @transform_3, window_bounds = array<i64: 32, 16>}, {pipeline_mode = #tpu.pipeline_mode<synchronous>, transform_indices = @transform_4, window_bounds = array<i64: 32, 16>}, {pipeline_mode = #tpu.pipeline_mode<synchronous>, transform_indices = @transform_5, window_bounds = array<i64: 16, 8>}, {pipeline_mode = #tpu.pipeline_mode<synchronous>, transform_indices = @transform_6, window_bounds = array<i64: 16, 6>}, {pipeline_mode = #tpu.pipeline_mode<synchronous>, transform_indices = @transform_7, window_bounds = array<i64: 16, 8>}, {pipeline_mode = #tpu.pipeline_mode<synchronous>, transform_indices = @transform_8, window_bounds = array<i64: 16, 8>}, {pipeline_mode = #tpu.pipeline_mode<synchronous>, transform_indices = @transform_9, window_bounds = array<i64: 8, 8>}, {pipeline_mode = #tpu.pipeline_mode<synchronous>, transform_indices = @transform_10, window_bounds = array<i64: 8, 8>}, {pipeline_mode = #tpu.pipeline_mode<synchronous>, transform_indices = @transform_11, window_bounds = array<i64: 8, 8>}, {transform_indices = @transform_12, window_bounds = array<i64: 3, 32, 32>}, {transform_indices = @transform_13, window_bounds = array<i64: 3, 32, 32>}, {transform_indices = @transform_14, window_bounds = array<i64: 1, 8, 128>}, {transform_indices = @transform_15, window_bounds = array<i64: 1, 8, 128>}]} {
    %c0 = arith.constant 0 : index
    %c0_0 = arith.constant 0 : index
    %c0_1 = arith.constant 0 : index
    %0 = vector.load %arg13[%c0, %c0_0, %c0_1] : memref<3x32x32xf32, #tpu.memory_space<vmem>>, vector<3x32x32xf32>
    %c0_2 = arith.constant 0 : index
    %c0_3 = arith.constant 0 : index
    %c0_4 = arith.constant 0 : index
    %1 = vector.load %arg14[%c0_2, %c0_3, %c0_4] : memref<3x32x32xf32, #tpu.memory_space<vmem>>, vector<3x32x32xf32>
    %c0_5 = arith.constant 0 : index
    %2 = memref.load %arg1[%c0_5] : memref<10xf32, #tpu.memory_space<smem>>
    %c1 = arith.constant 1 : index
    %3 = memref.load %arg1[%c1] : memref<10xf32, #tpu.memory_space<smem>>
    %c0_6 = arith.constant 0 : index
    %c0_7 = arith.constant 0 : index
    %4 = vector.load %arg2[%c0_6, %c0_7] : memref<32x24xf32, #tpu.memory_space<vmem>>, vector<32x24xf32>
    %c0_8 = arith.constant 0 : index
    %c0_9 = arith.constant 0 : index
    %5 = vector.load %arg3[%c0_8, %c0_9] : memref<32x22xf32, #tpu.memory_space<vmem>>, vector<32x22xf32>
    %6 = arith.mulf %0, %0 : vector<3x32x32xf32>
    %7 = arith.mulf %1, %1 : vector<3x32x32xf32>
    %8 = arith.mulf %0, %1 : vector<3x32x32xf32>
    %9 = tpu.concatenate %0, %1, %6, %7, %8 in 0 : vector<3x32x32xf32>, vector<3x32x32xf32>, vector<3x32x32xf32>, vector<3x32x32xf32>, vector<3x32x32xf32> -> vector<15x32x32xf32>
    %10 = vector.shape_cast %9 : vector<15x32x32xf32> to vector<480x32xf32>
    %cst = arith.constant dense<0.000000e+00> : vector<480x24xf32>
    %11 = tpu.matmul %10, %4, %cst {dimension_numbers = #tpu.dot_dimension_numbers<[1], [0], [0], [1], [0, 0, 1, 1], [], []>} : vector<480x32xf32>, vector<32x24xf32>, vector<480x24xf32> -> vector<480x24xf32>
    %12 = vector.shape_cast %11 : vector<480x24xf32> to vector<15x32x24xf32>
    %13 = tpu.transpose %12, [0, 2, 1] : vector<15x32x24xf32> -> vector<15x24x32xf32>
    %14 = vector.shape_cast %13 : vector<15x24x32xf32> to vector<360x32xf32>
    %cst_10 = arith.constant dense<0.000000e+00> : vector<360x22xf32>
    %15 = tpu.matmul %14, %5, %cst_10 {dimension_numbers = #tpu.dot_dimension_numbers<[1], [0], [0], [1], [0, 0, 1, 1], [], []>} : vector<360x32xf32>, vector<32x22xf32>, vector<360x22xf32> -> vector<360x22xf32>
    %16 = vector.shape_cast %15 : vector<360x22xf32> to vector<15x24x22xf32>
    %17 = vector.extract_strided_slice %16 {offsets = [0, 0, 0], sizes = [3, 24, 22], strides = [1, 1, 1]} : vector<15x24x22xf32> to vector<3x24x22xf32>
    %18 = vector.extract_strided_slice %16 {offsets = [3, 0, 0], sizes = [3, 24, 22], strides = [1, 1, 1]} : vector<15x24x22xf32> to vector<3x24x22xf32>
    %19 = vector.extract_strided_slice %16 {offsets = [6, 0, 0], sizes = [3, 24, 22], strides = [1, 1, 1]} : vector<15x24x22xf32> to vector<3x24x22xf32>
    %20 = vector.extract_strided_slice %16 {offsets = [9, 0, 0], sizes = [3, 24, 22], strides = [1, 1, 1]} : vector<15x24x22xf32> to vector<3x24x22xf32>
    %21 = vector.extract_strided_slice %16 {offsets = [12, 0, 0], sizes = [3, 24, 22], strides = [1, 1, 1]} : vector<15x24x22xf32> to vector<3x24x22xf32>
    %22 = arith.mulf %17, %17 : vector<3x24x22xf32>
    %23 = arith.mulf %18, %18 : vector<3x24x22xf32>
    %24 = arith.mulf %17, %18 : vector<3x24x22xf32>
    %25 = arith.subf %19, %22 : vector<3x24x22xf32>
    %26 = arith.subf %20, %23 : vector<3x24x22xf32>
    %27 = arith.subf %21, %24 : vector<3x24x22xf32>
    %cst_11 = arith.constant 2.000000e+00 : f32
    %28 = vector.broadcast %cst_11 : f32 to vector<3x24x22xf32>
    %29 = arith.mulf %28, %27 : vector<3x24x22xf32>
    %30 = vector.broadcast %3 : f32 to vector<3x24x22xf32>
    %31 = arith.addf %29, %30 : vector<3x24x22xf32>
    %32 = arith.addf %25, %26 : vector<3x24x22xf32>
    %33 = vector.broadcast %3 : f32 to vector<3x24x22xf32>
    %34 = arith.addf %32, %33 : vector<3x24x22xf32>
    %35 = tpu.reciprocal %34 {approx = true} : vector<3x24x22xf32> -> vector<3x24x22xf32>
    %36 = arith.mulf %31, %35 : vector<3x24x22xf32>
    %37 = tpu.iota {dimensions = array<i32: 0>} : vector<24x22xi32>
    %c22_i32 = arith.constant 22 : i32
    %38 = vector.broadcast %c22_i32 : i32 to vector<24x22xi32>
    %39 = arith.cmpi slt, %37, %38 : vector<24x22xi32>
    %40 = vector.shape_cast %39 : vector<24x22xi1> to vector<1x24x22xi1>
    %cst_12 = arith.constant 0.000000e+00 : f32
    %41 = vector.shape_cast %40 : vector<1x24x22xi1> to vector<1x24x22xi1>
    %42 = vector.broadcast %41 : vector<1x24x22xi1> to vector<3x24x22xi1>
    %43 = vector.broadcast %cst_12 : f32 to vector<3x24x22xf32>
    %44 = arith.select %42, %36, %43 : vector<3x24x22xi1>, vector<3x24x22xf32>
    %cst_13 = arith.constant 2.000000e+00 : f32
    %45 = vector.broadcast %cst_13 : f32 to vector<3x24x22xf32>
    %46 = arith.mulf %45, %24 : vector<3x24x22xf32>
    %47 = vector.broadcast %2 : f32 to vector<3x24x22xf32>
    %48 = arith.addf %46, %47 : vector<3x24x22xf32>
    %49 = arith.mulf %48, %44 : vector<3x24x22xf32>
    %50 = arith.addf %22, %23 : vector<3x24x22xf32>
    %51 = vector.broadcast %2 : f32 to vector<3x24x22xf32>
    %52 = arith.addf %50, %51 : vector<3x24x22xf32>
    %53 = tpu.reciprocal %52 {approx = true} : vector<3x24x22xf32> -> vector<3x24x22xf32>
    %54 = arith.mulf %49, %53 : vector<3x24x22xf32>
    %55 = vector.shape_cast %54 : vector<3x24x22xf32> to vector<1x3x24x22xf32>
    %cst_14 = arith.constant dense<0.000000e+00> : vector<1xf32>
    %56 = vector.multi_reduction <add>, %55, %cst_14 [1, 2, 3] : vector<1x3x24x22xf32> to vector<1xf32>
    %57 = vector.shape_cast %56 : vector<1xf32> to vector<1x1x1x1xf32>
    %58 = vector.extract %57[0, 0, 0, 0] : f32 from vector<1x1x1x1xf32>
    %59 = vector.shape_cast %44 : vector<3x24x22xf32> to vector<1x3x24x22xf32>
    %cst_15 = arith.constant dense<0.000000e+00> : vector<1xf32>
    %60 = vector.multi_reduction <add>, %59, %cst_15 [1, 2, 3] : vector<1x3x24x22xf32> to vector<1xf32>
    %61 = vector.shape_cast %60 : vector<1xf32> to vector<1x1x1x1xf32>
    %62 = vector.extract %61[0, 0, 0, 0] : f32 from vector<1x1x1x1xf32>
    %c0_16 = arith.constant 0 : index
    %c0_17 = arith.constant 0 : index
    %63 = vector.load %arg4[%c0_16, %c0_17] : memref<32x16xf32, #tpu.memory_space<vmem>>, vector<32x16xf32>
    %c0_18 = arith.constant 0 : index
    %c0_19 = arith.constant 0 : index
    %64 = vector.load %arg5[%c0_18, %c0_19] : memref<32x16xf32, #tpu.memory_space<vmem>>, vector<32x16xf32>
    %65 = tpu.concatenate %0, %1 in 0 : vector<3x32x32xf32>, vector<3x32x32xf32> -> vector<6x32x32xf32>
    %66 = vector.shape_cast %65 : vector<6x32x32xf32> to vector<192x32xf32>
    %cst_20 = arith.constant dense<0.000000e+00> : vector<192x16xf32>
    %67 = tpu.matmul %66, %63, %cst_20 {dimension_numbers = #tpu.dot_dimension_numbers<[1], [0], [0], [1], [0, 0, 1, 1], [], []>} : vector<192x32xf32>, vector<32x16xf32>, vector<192x16xf32> -> vector<192x16xf32>
    %68 = vector.shape_cast %67 : vector<192x16xf32> to vector<6x32x16xf32>
    %69 = tpu.transpose %68, [0, 2, 1] : vector<6x32x16xf32> -> vector<6x16x32xf32>
    %70 = vector.shape_cast %69 : vector<6x16x32xf32> to vector<96x32xf32>
    %cst_21 = arith.constant dense<0.000000e+00> : vector<96x16xf32>
    %71 = tpu.matmul %70, %64, %cst_21 {dimension_numbers = #tpu.dot_dimension_numbers<[1], [0], [0], [1], [0, 0, 1, 1], [], []>} : vector<96x32xf32>, vector<32x16xf32>, vector<96x16xf32> -> vector<96x16xf32>
    %72 = vector.shape_cast %71 : vector<96x16xf32> to vector<6x16x16xf32>
    %73 = tpu.transpose %72, [0, 2, 1] : vector<6x16x16xf32> -> vector<6x16x16xf32>
    %74 = vector.extract_strided_slice %73 {offsets = [0, 0, 0], sizes = [3, 16, 16], strides = [1, 1, 1]} : vector<6x16x16xf32> to vector<3x16x16xf32>
    %75 = vector.extract_strided_slice %73 {offsets = [3, 0, 0], sizes = [3, 16, 16], strides = [1, 1, 1]} : vector<6x16x16xf32> to vector<3x16x16xf32>
    %c2 = arith.constant 2 : index
    %76 = memref.load %arg1[%c2] : memref<10xf32, #tpu.memory_space<smem>>
    %c3 = arith.constant 3 : index
    %77 = memref.load %arg1[%c3] : memref<10xf32, #tpu.memory_space<smem>>
    %c0_22 = arith.constant 0 : index
    %c0_23 = arith.constant 0 : index
    %78 = vector.load %arg6[%c0_22, %c0_23] : memref<16x8xf32, #tpu.memory_space<vmem>>, vector<16x8xf32>
    %c0_24 = arith.constant 0 : index
    %c0_25 = arith.constant 0 : index
    %79 = vector.load %arg7[%c0_24, %c0_25] : memref<16x6xf32, #tpu.memory_space<vmem>>, vector<16x6xf32>
    %80 = arith.mulf %74, %74 : vector<3x16x16xf32>
    %81 = arith.mulf %75, %75 : vector<3x16x16xf32>
    %82 = arith.mulf %74, %75 : vector<3x16x16xf32>
    %83 = tpu.concatenate %74, %75, %80, %81, %82 in 0 : vector<3x16x16xf32>, vector<3x16x16xf32>, vector<3x16x16xf32>, vector<3x16x16xf32>, vector<3x16x16xf32> -> vector<15x16x16xf32>
    %84 = vector.shape_cast %83 : vector<15x16x16xf32> to vector<240x16xf32>
    %cst_26 = arith.constant dense<0.000000e+00> : vector<240x8xf32>
    %85 = tpu.matmul %84, %78, %cst_26 {dimension_numbers = #tpu.dot_dimension_numbers<[1], [0], [0], [1], [0, 0, 1, 1], [], []>} : vector<240x16xf32>, vector<16x8xf32>, vector<240x8xf32> -> vector<240x8xf32>
    %86 = vector.shape_cast %85 : vector<240x8xf32> to vector<15x16x8xf32>
    %87 = tpu.transpose %86, [0, 2, 1] : vector<15x16x8xf32> -> vector<15x8x16xf32>
    %88 = vector.shape_cast %87 : vector<15x8x16xf32> to vector<120x16xf32>
    %cst_27 = arith.constant dense<0.000000e+00> : vector<120x6xf32>
    %89 = tpu.matmul %88, %79, %cst_27 {dimension_numbers = #tpu.dot_dimension_numbers<[1], [0], [0], [1], [0, 0, 1, 1], [], []>} : vector<120x16xf32>, vector<16x6xf32>, vector<120x6xf32> -> vector<120x6xf32>
    %90 = vector.shape_cast %89 : vector<120x6xf32> to vector<15x8x6xf32>
    %91 = vector.extract_strided_slice %90 {offsets = [0, 0, 0], sizes = [3, 8, 6], strides = [1, 1, 1]} : vector<15x8x6xf32> to vector<3x8x6xf32>
    %92 = vector.extract_strided_slice %90 {offsets = [3, 0, 0], sizes = [3, 8, 6], strides = [1, 1, 1]} : vector<15x8x6xf32> to vector<3x8x6xf32>
    %93 = vector.extract_strided_slice %90 {offsets = [6, 0, 0], sizes = [3, 8, 6], strides = [1, 1, 1]} : vector<15x8x6xf32> to vector<3x8x6xf32>
    %94 = vector.extract_strided_slice %90 {offsets = [9, 0, 0], sizes = [3, 8, 6], strides = [1, 1, 1]} : vector<15x8x6xf32> to vector<3x8x6xf32>
    %95 = vector.extract_strided_slice %90 {offsets = [12, 0, 0], sizes = [3, 8, 6], strides = [1, 1, 1]} : vector<15x8x6xf32> to vector<3x8x6xf32>
    %96 = arith.mulf %91, %91 : vector<3x8x6xf32>
    %97 = arith.mulf %92, %92 : vector<3x8x6xf32>
    %98 = arith.mulf %91, %92 : vector<3x8x6xf32>
    %99 = arith.subf %93, %96 : vector<3x8x6xf32>
    %100 = arith.subf %94, %97 : vector<3x8x6xf32>
    %101 = arith.subf %95, %98 : vector<3x8x6xf32>
    %cst_28 = arith.constant 2.000000e+00 : f32
    %102 = vector.broadcast %cst_28 : f32 to vector<3x8x6xf32>
    %103 = arith.mulf %102, %101 : vector<3x8x6xf32>
    %104 = vector.broadcast %77 : f32 to vector<3x8x6xf32>
    %105 = arith.addf %103, %104 : vector<3x8x6xf32>
    %106 = arith.addf %99, %100 : vector<3x8x6xf32>
    %107 = vector.broadcast %77 : f32 to vector<3x8x6xf32>
    %108 = arith.addf %106, %107 : vector<3x8x6xf32>
    %109 = tpu.reciprocal %108 {approx = true} : vector<3x8x6xf32> -> vector<3x8x6xf32>
    %110 = arith.mulf %105, %109 : vector<3x8x6xf32>
    %111 = tpu.iota {dimensions = array<i32: 0>} : vector<8x6xi32>
    %c6_i32 = arith.constant 6 : i32
    %112 = vector.broadcast %c6_i32 : i32 to vector<8x6xi32>
    %113 = arith.cmpi slt, %111, %112 : vector<8x6xi32>
    %114 = vector.shape_cast %113 : vector<8x6xi1> to vector<1x8x6xi1>
    %cst_29 = arith.constant 0.000000e+00 : f32
    %115 = vector.shape_cast %114 : vector<1x8x6xi1> to vector<1x8x6xi1>
    %116 = vector.broadcast %115 : vector<1x8x6xi1> to vector<3x8x6xi1>
    %117 = vector.broadcast %cst_29 : f32 to vector<3x8x6xf32>
    %118 = arith.select %116, %110, %117 : vector<3x8x6xi1>, vector<3x8x6xf32>
    %cst_30 = arith.constant 2.000000e+00 : f32
    %119 = vector.broadcast %cst_30 : f32 to vector<3x8x6xf32>
    %120 = arith.mulf %119, %98 : vector<3x8x6xf32>
    %121 = vector.broadcast %76 : f32 to vector<3x8x6xf32>
    %122 = arith.addf %120, %121 : vector<3x8x6xf32>
    %123 = arith.mulf %122, %118 : vector<3x8x6xf32>
    %124 = arith.addf %96, %97 : vector<3x8x6xf32>
    %125 = vector.broadcast %76 : f32 to vector<3x8x6xf32>
    %126 = arith.addf %124, %125 : vector<3x8x6xf32>
    %127 = tpu.reciprocal %126 {approx = true} : vector<3x8x6xf32> -> vector<3x8x6xf32>
    %128 = arith.mulf %123, %127 : vector<3x8x6xf32>
    %129 = vector.shape_cast %128 : vector<3x8x6xf32> to vector<1x3x8x6xf32>
    %cst_31 = arith.constant dense<0.000000e+00> : vector<1xf32>
    %130 = vector.multi_reduction <add>, %129, %cst_31 [1, 2, 3] : vector<1x3x8x6xf32> to vector<1xf32>
    %131 = vector.shape_cast %130 : vector<1xf32> to vector<1x1x1x1xf32>
    %132 = vector.extract %131[0, 0, 0, 0] : f32 from vector<1x1x1x1xf32>
    %133 = vector.shape_cast %118 : vector<3x8x6xf32> to vector<1x3x8x6xf32>
    %cst_32 = arith.constant dense<0.000000e+00> : vector<1xf32>
    %134 = vector.multi_reduction <add>, %133, %cst_32 [1, 2, 3] : vector<1x3x8x6xf32> to vector<1xf32>
    %135 = vector.shape_cast %134 : vector<1xf32> to vector<1x1x1x1xf32>
    %136 = vector.extract %135[0, 0, 0, 0] : f32 from vector<1x1x1x1xf32>
    %c0_33 = arith.constant 0 : index
    %c0_34 = arith.constant 0 : index
    %137 = vector.load %arg8[%c0_33, %c0_34] : memref<16x8xf32, #tpu.memory_space<vmem>>, vector<16x8xf32>
    %c0_35 = arith.constant 0 : index
    %c0_36 = arith.constant 0 : index
    %138 = vector.load %arg9[%c0_35, %c0_36] : memref<16x8xf32, #tpu.memory_space<vmem>>, vector<16x8xf32>
    %139 = tpu.concatenate %74, %75 in 0 : vector<3x16x16xf32>, vector<3x16x16xf32> -> vector<6x16x16xf32>
    %140 = vector.shape_cast %139 : vector<6x16x16xf32> to vector<96x16xf32>
    %cst_37 = arith.constant dense<0.000000e+00> : vector<96x8xf32>
    %141 = tpu.matmul %140, %137, %cst_37 {dimension_numbers = #tpu.dot_dimension_numbers<[1], [0], [0], [1], [0, 0, 1, 1], [], []>} : vector<96x16xf32>, vector<16x8xf32>, vector<96x8xf32> -> vector<96x8xf32>
    %142 = vector.shape_cast %141 : vector<96x8xf32> to vector<6x16x8xf32>
    %143 = tpu.transpose %142, [0, 2, 1] : vector<6x16x8xf32> -> vector<6x8x16xf32>
    %144 = vector.shape_cast %143 : vector<6x8x16xf32> to vector<48x16xf32>
    %cst_38 = arith.constant dense<0.000000e+00> : vector<48x8xf32>
    %145 = tpu.matmul %144, %138, %cst_38 {dimension_numbers = #tpu.dot_dimension_numbers<[1], [0], [0], [1], [0, 0, 1, 1], [], []>} : vector<48x16xf32>, vector<16x8xf32>, vector<48x8xf32> -> vector<48x8xf32>
    %146 = vector.shape_cast %145 : vector<48x8xf32> to vector<6x8x8xf32>
    %147 = tpu.transpose %146, [0, 2, 1] : vector<6x8x8xf32> -> vector<6x8x8xf32>
    %148 = vector.extract_strided_slice %147 {offsets = [0, 0, 0], sizes = [3, 8, 8], strides = [1, 1, 1]} : vector<6x8x8xf32> to vector<3x8x8xf32>
    %149 = vector.extract_strided_slice %147 {offsets = [3, 0, 0], sizes = [3, 8, 8], strides = [1, 1, 1]} : vector<6x8x8xf32> to vector<3x8x8xf32>
    %c4 = arith.constant 4 : index
    %150 = memref.load %arg1[%c4] : memref<10xf32, #tpu.memory_space<smem>>
    %c5 = arith.constant 5 : index
    %151 = memref.load %arg1[%c5] : memref<10xf32, #tpu.memory_space<smem>>
    %c0_39 = arith.constant 0 : index
    %c0_40 = arith.constant 0 : index
    %152 = vector.load %arg10[%c0_39, %c0_40] : memref<8x8xf32, #tpu.memory_space<vmem>>, vector<8x8xf32>
    %153 = vector.shape_cast %152 : vector<8x8xf32> to vector<1x8x8xf32>
    %154 = vector.broadcast %153 : vector<1x8x8xf32> to vector<3x8x8xf32>
    %155 = arith.mulf %148, %154 : vector<3x8x8xf32>
    %cst_41 = arith.constant dense<0.000000e+00> : vector<3x8xf32>
    %156 = vector.multi_reduction <add>, %155, %cst_41 [2] : vector<3x8x8xf32> to vector<3x8xf32>
    %157 = vector.shape_cast %156 : vector<3x8xf32> to vector<3x8x1xf32>
    %cst_42 = arith.constant dense<0.000000e+00> : vector<3x1xf32>
    %158 = vector.multi_reduction <add>, %157, %cst_42 [1] : vector<3x8x1xf32> to vector<3x1xf32>
    %159 = vector.shape_cast %158 : vector<3x1xf32> to vector<3x1x1xf32>
    %160 = vector.shape_cast %152 : vector<8x8xf32> to vector<1x8x8xf32>
    %161 = vector.broadcast %160 : vector<1x8x8xf32> to vector<3x8x8xf32>
    %162 = arith.mulf %149, %161 : vector<3x8x8xf32>
    %cst_43 = arith.constant dense<0.000000e+00> : vector<3x8xf32>
    %163 = vector.multi_reduction <add>, %162, %cst_43 [2] : vector<3x8x8xf32> to vector<3x8xf32>
    %164 = vector.shape_cast %163 : vector<3x8xf32> to vector<3x8x1xf32>
    %cst_44 = arith.constant dense<0.000000e+00> : vector<3x1xf32>
    %165 = vector.multi_reduction <add>, %164, %cst_44 [1] : vector<3x8x1xf32> to vector<3x1xf32>
    %166 = vector.shape_cast %165 : vector<3x1xf32> to vector<3x1x1xf32>
    %167 = arith.mulf %148, %148 : vector<3x8x8xf32>
    %168 = vector.shape_cast %152 : vector<8x8xf32> to vector<1x8x8xf32>
    %169 = vector.broadcast %168 : vector<1x8x8xf32> to vector<3x8x8xf32>
    %170 = arith.mulf %167, %169 : vector<3x8x8xf32>
    %cst_45 = arith.constant dense<0.000000e+00> : vector<3x8xf32>
    %171 = vector.multi_reduction <add>, %170, %cst_45 [2] : vector<3x8x8xf32> to vector<3x8xf32>
    %172 = vector.shape_cast %171 : vector<3x8xf32> to vector<3x8x1xf32>
    %cst_46 = arith.constant dense<0.000000e+00> : vector<3x1xf32>
    %173 = vector.multi_reduction <add>, %172, %cst_46 [1] : vector<3x8x1xf32> to vector<3x1xf32>
    %174 = vector.shape_cast %173 : vector<3x1xf32> to vector<3x1x1xf32>
    %175 = arith.mulf %149, %149 : vector<3x8x8xf32>
    %176 = vector.shape_cast %152 : vector<8x8xf32> to vector<1x8x8xf32>
    %177 = vector.broadcast %176 : vector<1x8x8xf32> to vector<3x8x8xf32>
    %178 = arith.mulf %175, %177 : vector<3x8x8xf32>
    %cst_47 = arith.constant dense<0.000000e+00> : vector<3x8xf32>
    %179 = vector.multi_reduction <add>, %178, %cst_47 [2] : vector<3x8x8xf32> to vector<3x8xf32>
    %180 = vector.shape_cast %179 : vector<3x8xf32> to vector<3x8x1xf32>
    %cst_48 = arith.constant dense<0.000000e+00> : vector<3x1xf32>
    %181 = vector.multi_reduction <add>, %180, %cst_48 [1] : vector<3x8x1xf32> to vector<3x1xf32>
    %182 = vector.shape_cast %181 : vector<3x1xf32> to vector<3x1x1xf32>
    %183 = arith.mulf %148, %149 : vector<3x8x8xf32>
    %184 = vector.shape_cast %152 : vector<8x8xf32> to vector<1x8x8xf32>
    %185 = vector.broadcast %184 : vector<1x8x8xf32> to vector<3x8x8xf32>
    %186 = arith.mulf %183, %185 : vector<3x8x8xf32>
    %cst_49 = arith.constant dense<0.000000e+00> : vector<3x8xf32>
    %187 = vector.multi_reduction <add>, %186, %cst_49 [2] : vector<3x8x8xf32> to vector<3x8xf32>
    %188 = vector.shape_cast %187 : vector<3x8xf32> to vector<3x8x1xf32>
    %cst_50 = arith.constant dense<0.000000e+00> : vector<3x1xf32>
    %189 = vector.multi_reduction <add>, %188, %cst_50 [1] : vector<3x8x1xf32> to vector<3x1xf32>
    %190 = vector.shape_cast %189 : vector<3x1xf32> to vector<3x1x1xf32>
    %191 = arith.mulf %159, %159 : vector<3x1x1xf32>
    %192 = arith.mulf %166, %166 : vector<3x1x1xf32>
    %193 = arith.mulf %159, %166 : vector<3x1x1xf32>
    %194 = arith.subf %174, %191 : vector<3x1x1xf32>
    %195 = arith.subf %182, %192 : vector<3x1x1xf32>
    %196 = arith.subf %190, %193 : vector<3x1x1xf32>
    %cst_51 = arith.constant 2.000000e+00 : f32
    %197 = vector.broadcast %cst_51 : f32 to vector<3x1x1xf32>
    %198 = arith.mulf %197, %196 : vector<3x1x1xf32>
    %199 = vector.broadcast %151 : f32 to vector<3x1x1xf32>
    %200 = arith.addf %198, %199 : vector<3x1x1xf32>
    %201 = arith.addf %194, %195 : vector<3x1x1xf32>
    %202 = vector.broadcast %151 : f32 to vector<3x1x1xf32>
    %203 = arith.addf %201, %202 : vector<3x1x1xf32>
    %204 = tpu.reciprocal %203 {approx = true} : vector<3x1x1xf32> -> vector<3x1x1xf32>
    %205 = arith.mulf %200, %204 : vector<3x1x1xf32>
    %cst_52 = arith.constant 2.000000e+00 : f32
    %206 = vector.broadcast %cst_52 : f32 to vector<3x1x1xf32>
    %207 = arith.mulf %206, %193 : vector<3x1x1xf32>
    %208 = vector.broadcast %150 : f32 to vector<3x1x1xf32>
    %209 = arith.addf %207, %208 : vector<3x1x1xf32>
    %210 = arith.mulf %209, %205 : vector<3x1x1xf32>
    %211 = arith.addf %191, %192 : vector<3x1x1xf32>
    %212 = vector.broadcast %150 : f32 to vector<3x1x1xf32>
    %213 = arith.addf %211, %212 : vector<3x1x1xf32>
    %214 = tpu.reciprocal %213 {approx = true} : vector<3x1x1xf32> -> vector<3x1x1xf32>
    %215 = arith.mulf %210, %214 : vector<3x1x1xf32>
    %216 = vector.shape_cast %215 : vector<3x1x1xf32> to vector<1x3x1x1xf32>
    %cst_53 = arith.constant dense<0.000000e+00> : vector<1xf32>
    %217 = vector.multi_reduction <add>, %216, %cst_53 [1, 2, 3] : vector<1x3x1x1xf32> to vector<1xf32>
    %218 = vector.shape_cast %217 : vector<1xf32> to vector<1x1x1x1xf32>
    %219 = vector.extract %218[0, 0, 0, 0] : f32 from vector<1x1x1x1xf32>
    %220 = vector.shape_cast %205 : vector<3x1x1xf32> to vector<1x3x1x1xf32>
    %cst_54 = arith.constant dense<0.000000e+00> : vector<1xf32>
    %221 = vector.multi_reduction <add>, %220, %cst_54 [1, 2, 3] : vector<1x3x1x1xf32> to vector<1xf32>
    %222 = vector.shape_cast %221 : vector<1xf32> to vector<1x1x1x1xf32>
    %223 = vector.extract %222[0, 0, 0, 0] : f32 from vector<1x1x1x1xf32>
    %224 = vector.extract_strided_slice %148 {offsets = [0, 0, 1], sizes = [3, 8, 7], strides = [1, 1, 1]} : vector<3x8x8xf32> to vector<3x8x7xf32>
    %225 = vector.extract_strided_slice %148 {offsets = [0, 0, 0], sizes = [3, 8, 1], strides = [1, 1, 1]} : vector<3x8x8xf32> to vector<3x8x1xf32>
    %226 = tpu.concatenate %224, %225 in 2 : vector<3x8x7xf32>, vector<3x8x1xf32> -> vector<3x8x8xf32>
    %227 = arith.addf %148, %226 : vector<3x8x8xf32>
    %228 = vector.extract_strided_slice %227 {offsets = [0, 1, 0], sizes = [3, 7, 8], strides = [1, 1, 1]} : vector<3x8x8xf32> to vector<3x7x8xf32>
    %229 = vector.extract_strided_slice %227 {offsets = [0, 0, 0], sizes = [3, 1, 8], strides = [1, 1, 1]} : vector<3x8x8xf32> to vector<3x1x8xf32>
    %230 = tpu.concatenate %228, %229 in 1 : vector<3x7x8xf32>, vector<3x1x8xf32> -> vector<3x8x8xf32>
    %231 = arith.addf %227, %230 : vector<3x8x8xf32>
    %cst_55 = arith.constant 2.500000e-01 : f32
    %232 = vector.broadcast %cst_55 : f32 to vector<3x8x8xf32>
    %233 = arith.mulf %232, %231 : vector<3x8x8xf32>
    %234 = vector.extract_strided_slice %149 {offsets = [0, 0, 1], sizes = [3, 8, 7], strides = [1, 1, 1]} : vector<3x8x8xf32> to vector<3x8x7xf32>
    %235 = vector.extract_strided_slice %149 {offsets = [0, 0, 0], sizes = [3, 8, 1], strides = [1, 1, 1]} : vector<3x8x8xf32> to vector<3x8x1xf32>
    %236 = tpu.concatenate %234, %235 in 2 : vector<3x8x7xf32>, vector<3x8x1xf32> -> vector<3x8x8xf32>
    %237 = arith.addf %149, %236 : vector<3x8x8xf32>
    %238 = vector.extract_strided_slice %237 {offsets = [0, 1, 0], sizes = [3, 7, 8], strides = [1, 1, 1]} : vector<3x8x8xf32> to vector<3x7x8xf32>
    %239 = vector.extract_strided_slice %237 {offsets = [0, 0, 0], sizes = [3, 1, 8], strides = [1, 1, 1]} : vector<3x8x8xf32> to vector<3x1x8xf32>
    %240 = tpu.concatenate %238, %239 in 1 : vector<3x7x8xf32>, vector<3x1x8xf32> -> vector<3x8x8xf32>
    %241 = arith.addf %237, %240 : vector<3x8x8xf32>
    %cst_56 = arith.constant 2.500000e-01 : f32
    %242 = vector.broadcast %cst_56 : f32 to vector<3x8x8xf32>
    %243 = arith.mulf %242, %241 : vector<3x8x8xf32>
    %c6 = arith.constant 6 : index
    %244 = memref.load %arg1[%c6] : memref<10xf32, #tpu.memory_space<smem>>
    %c7 = arith.constant 7 : index
    %245 = memref.load %arg1[%c7] : memref<10xf32, #tpu.memory_space<smem>>
    %c0_57 = arith.constant 0 : index
    %c0_58 = arith.constant 0 : index
    %246 = vector.load %arg11[%c0_57, %c0_58] : memref<8x8xf32, #tpu.memory_space<vmem>>, vector<8x8xf32>
    %247 = vector.shape_cast %246 : vector<8x8xf32> to vector<1x8x8xf32>
    %248 = vector.broadcast %247 : vector<1x8x8xf32> to vector<3x8x8xf32>
    %249 = arith.mulf %233, %248 : vector<3x8x8xf32>
    %cst_59 = arith.constant dense<0.000000e+00> : vector<3x8xf32>
    %250 = vector.multi_reduction <add>, %249, %cst_59 [2] : vector<3x8x8xf32> to vector<3x8xf32>
    %251 = vector.shape_cast %250 : vector<3x8xf32> to vector<3x8x1xf32>
    %cst_60 = arith.constant dense<0.000000e+00> : vector<3x1xf32>
    %252 = vector.multi_reduction <add>, %251, %cst_60 [1] : vector<3x8x1xf32> to vector<3x1xf32>
    %253 = vector.shape_cast %252 : vector<3x1xf32> to vector<3x1x1xf32>
    %254 = vector.shape_cast %246 : vector<8x8xf32> to vector<1x8x8xf32>
    %255 = vector.broadcast %254 : vector<1x8x8xf32> to vector<3x8x8xf32>
    %256 = arith.mulf %243, %255 : vector<3x8x8xf32>
    %cst_61 = arith.constant dense<0.000000e+00> : vector<3x8xf32>
    %257 = vector.multi_reduction <add>, %256, %cst_61 [2] : vector<3x8x8xf32> to vector<3x8xf32>
    %258 = vector.shape_cast %257 : vector<3x8xf32> to vector<3x8x1xf32>
    %cst_62 = arith.constant dense<0.000000e+00> : vector<3x1xf32>
    %259 = vector.multi_reduction <add>, %258, %cst_62 [1] : vector<3x8x1xf32> to vector<3x1xf32>
    %260 = vector.shape_cast %259 : vector<3x1xf32> to vector<3x1x1xf32>
    %261 = arith.mulf %233, %233 : vector<3x8x8xf32>
    %262 = vector.shape_cast %246 : vector<8x8xf32> to vector<1x8x8xf32>
    %263 = vector.broadcast %262 : vector<1x8x8xf32> to vector<3x8x8xf32>
    %264 = arith.mulf %261, %263 : vector<3x8x8xf32>
    %cst_63 = arith.constant dense<0.000000e+00> : vector<3x8xf32>
    %265 = vector.multi_reduction <add>, %264, %cst_63 [2] : vector<3x8x8xf32> to vector<3x8xf32>
    %266 = vector.shape_cast %265 : vector<3x8xf32> to vector<3x8x1xf32>
    %cst_64 = arith.constant dense<0.000000e+00> : vector<3x1xf32>
    %267 = vector.multi_reduction <add>, %266, %cst_64 [1] : vector<3x8x1xf32> to vector<3x1xf32>
    %268 = vector.shape_cast %267 : vector<3x1xf32> to vector<3x1x1xf32>
    %269 = arith.mulf %243, %243 : vector<3x8x8xf32>
    %270 = vector.shape_cast %246 : vector<8x8xf32> to vector<1x8x8xf32>
    %271 = vector.broadcast %270 : vector<1x8x8xf32> to vector<3x8x8xf32>
    %272 = arith.mulf %269, %271 : vector<3x8x8xf32>
    %cst_65 = arith.constant dense<0.000000e+00> : vector<3x8xf32>
    %273 = vector.multi_reduction <add>, %272, %cst_65 [2] : vector<3x8x8xf32> to vector<3x8xf32>
    %274 = vector.shape_cast %273 : vector<3x8xf32> to vector<3x8x1xf32>
    %cst_66 = arith.constant dense<0.000000e+00> : vector<3x1xf32>
    %275 = vector.multi_reduction <add>, %274, %cst_66 [1] : vector<3x8x1xf32> to vector<3x1xf32>
    %276 = vector.shape_cast %275 : vector<3x1xf32> to vector<3x1x1xf32>
    %277 = arith.mulf %233, %243 : vector<3x8x8xf32>
    %278 = vector.shape_cast %246 : vector<8x8xf32> to vector<1x8x8xf32>
    %279 = vector.broadcast %278 : vector<1x8x8xf32> to vector<3x8x8xf32>
    %280 = arith.mulf %277, %279 : vector<3x8x8xf32>
    %cst_67 = arith.constant dense<0.000000e+00> : vector<3x8xf32>
    %281 = vector.multi_reduction <add>, %280, %cst_67 [2] : vector<3x8x8xf32> to vector<3x8xf32>
    %282 = vector.shape_cast %281 : vector<3x8xf32> to vector<3x8x1xf32>
    %cst_68 = arith.constant dense<0.000000e+00> : vector<3x1xf32>
    %283 = vector.multi_reduction <add>, %282, %cst_68 [1] : vector<3x8x1xf32> to vector<3x1xf32>
    %284 = vector.shape_cast %283 : vector<3x1xf32> to vector<3x1x1xf32>
    %285 = arith.mulf %253, %253 : vector<3x1x1xf32>
    %286 = arith.mulf %260, %260 : vector<3x1x1xf32>
    %287 = arith.mulf %253, %260 : vector<3x1x1xf32>
    %288 = arith.subf %268, %285 : vector<3x1x1xf32>
    %289 = arith.subf %276, %286 : vector<3x1x1xf32>
    %290 = arith.subf %284, %287 : vector<3x1x1xf32>
    %cst_69 = arith.constant 2.000000e+00 : f32
    %291 = vector.broadcast %cst_69 : f32 to vector<3x1x1xf32>
    %292 = arith.mulf %291, %290 : vector<3x1x1xf32>
    %293 = vector.broadcast %245 : f32 to vector<3x1x1xf32>
    %294 = arith.addf %292, %293 : vector<3x1x1xf32>
    %295 = arith.addf %288, %289 : vector<3x1x1xf32>
    %296 = vector.broadcast %245 : f32 to vector<3x1x1xf32>
    %297 = arith.addf %295, %296 : vector<3x1x1xf32>
    %298 = tpu.reciprocal %297 {approx = true} : vector<3x1x1xf32> -> vector<3x1x1xf32>
    %299 = arith.mulf %294, %298 : vector<3x1x1xf32>
    %cst_70 = arith.constant 2.000000e+00 : f32
    %300 = vector.broadcast %cst_70 : f32 to vector<3x1x1xf32>
    %301 = arith.mulf %300, %287 : vector<3x1x1xf32>
    %302 = vector.broadcast %244 : f32 to vector<3x1x1xf32>
    %303 = arith.addf %301, %302 : vector<3x1x1xf32>
    %304 = arith.mulf %303, %299 : vector<3x1x1xf32>
    %305 = arith.addf %285, %286 : vector<3x1x1xf32>
    %306 = vector.broadcast %244 : f32 to vector<3x1x1xf32>
    %307 = arith.addf %305, %306 : vector<3x1x1xf32>
    %308 = tpu.reciprocal %307 {approx = true} : vector<3x1x1xf32> -> vector<3x1x1xf32>
    %309 = arith.mulf %304, %308 : vector<3x1x1xf32>
    %310 = vector.shape_cast %309 : vector<3x1x1xf32> to vector<1x3x1x1xf32>
    %cst_71 = arith.constant dense<0.000000e+00> : vector<1xf32>
    %311 = vector.multi_reduction <add>, %310, %cst_71 [1, 2, 3] : vector<1x3x1x1xf32> to vector<1xf32>
    %312 = vector.shape_cast %311 : vector<1xf32> to vector<1x1x1x1xf32>
    %313 = vector.extract %312[0, 0, 0, 0] : f32 from vector<1x1x1x1xf32>
    %314 = vector.shape_cast %299 : vector<3x1x1xf32> to vector<1x3x1x1xf32>
    %cst_72 = arith.constant dense<0.000000e+00> : vector<1xf32>
    %315 = vector.multi_reduction <add>, %314, %cst_72 [1, 2, 3] : vector<1x3x1x1xf32> to vector<1xf32>
    %316 = vector.shape_cast %315 : vector<1xf32> to vector<1x1x1x1xf32>
    %317 = vector.extract %316[0, 0, 0, 0] : f32 from vector<1x1x1x1xf32>
    %318 = vector.extract_strided_slice %233 {offsets = [0, 0, 2], sizes = [3, 8, 6], strides = [1, 1, 1]} : vector<3x8x8xf32> to vector<3x8x6xf32>
    %319 = vector.extract_strided_slice %233 {offsets = [0, 0, 0], sizes = [3, 8, 2], strides = [1, 1, 1]} : vector<3x8x8xf32> to vector<3x8x2xf32>
    %320 = tpu.concatenate %318, %319 in 2 : vector<3x8x6xf32>, vector<3x8x2xf32> -> vector<3x8x8xf32>
    %321 = arith.addf %233, %320 : vector<3x8x8xf32>
    %322 = vector.extract_strided_slice %321 {offsets = [0, 2, 0], sizes = [3, 6, 8], strides = [1, 1, 1]} : vector<3x8x8xf32> to vector<3x6x8xf32>
    %323 = vector.extract_strided_slice %321 {offsets = [0, 0, 0], sizes = [3, 2, 8], strides = [1, 1, 1]} : vector<3x8x8xf32> to vector<3x2x8xf32>
    %324 = tpu.concatenate %322, %323 in 1 : vector<3x6x8xf32>, vector<3x2x8xf32> -> vector<3x8x8xf32>
    %325 = arith.addf %321, %324 : vector<3x8x8xf32>
    %cst_73 = arith.constant 2.500000e-01 : f32
    %326 = vector.broadcast %cst_73 : f32 to vector<3x8x8xf32>
    %327 = arith.mulf %326, %325 : vector<3x8x8xf32>
    %328 = vector.extract_strided_slice %243 {offsets = [0, 0, 2], sizes = [3, 8, 6], strides = [1, 1, 1]} : vector<3x8x8xf32> to vector<3x8x6xf32>
    %329 = vector.extract_strided_slice %243 {offsets = [0, 0, 0], sizes = [3, 8, 2], strides = [1, 1, 1]} : vector<3x8x8xf32> to vector<3x8x2xf32>
    %330 = tpu.concatenate %328, %329 in 2 : vector<3x8x6xf32>, vector<3x8x2xf32> -> vector<3x8x8xf32>
    %331 = arith.addf %243, %330 : vector<3x8x8xf32>
    %332 = vector.extract_strided_slice %331 {offsets = [0, 2, 0], sizes = [3, 6, 8], strides = [1, 1, 1]} : vector<3x8x8xf32> to vector<3x6x8xf32>
    %333 = vector.extract_strided_slice %331 {offsets = [0, 0, 0], sizes = [3, 2, 8], strides = [1, 1, 1]} : vector<3x8x8xf32> to vector<3x2x8xf32>
    %334 = tpu.concatenate %332, %333 in 1 : vector<3x6x8xf32>, vector<3x2x8xf32> -> vector<3x8x8xf32>
    %335 = arith.addf %331, %334 : vector<3x8x8xf32>
    %cst_74 = arith.constant 2.500000e-01 : f32
    %336 = vector.broadcast %cst_74 : f32 to vector<3x8x8xf32>
    %337 = arith.mulf %336, %335 : vector<3x8x8xf32>
    %c8 = arith.constant 8 : index
    %338 = memref.load %arg1[%c8] : memref<10xf32, #tpu.memory_space<smem>>
    %c9 = arith.constant 9 : index
    %339 = memref.load %arg1[%c9] : memref<10xf32, #tpu.memory_space<smem>>
    %c0_75 = arith.constant 0 : index
    %c0_76 = arith.constant 0 : index
    %340 = vector.load %arg12[%c0_75, %c0_76] : memref<8x8xf32, #tpu.memory_space<vmem>>, vector<8x8xf32>
    %341 = vector.shape_cast %340 : vector<8x8xf32> to vector<1x8x8xf32>
    %342 = vector.broadcast %341 : vector<1x8x8xf32> to vector<3x8x8xf32>
    %343 = arith.mulf %327, %342 : vector<3x8x8xf32>
    %cst_77 = arith.constant dense<0.000000e+00> : vector<3x8xf32>
    %344 = vector.multi_reduction <add>, %343, %cst_77 [2] : vector<3x8x8xf32> to vector<3x8xf32>
    %345 = vector.shape_cast %344 : vector<3x8xf32> to vector<3x8x1xf32>
    %cst_78 = arith.constant dense<0.000000e+00> : vector<3x1xf32>
    %346 = vector.multi_reduction <add>, %345, %cst_78 [1] : vector<3x8x1xf32> to vector<3x1xf32>
    %347 = vector.shape_cast %346 : vector<3x1xf32> to vector<3x1x1xf32>
    %348 = vector.shape_cast %340 : vector<8x8xf32> to vector<1x8x8xf32>
    %349 = vector.broadcast %348 : vector<1x8x8xf32> to vector<3x8x8xf32>
    %350 = arith.mulf %337, %349 : vector<3x8x8xf32>
    %cst_79 = arith.constant dense<0.000000e+00> : vector<3x8xf32>
    %351 = vector.multi_reduction <add>, %350, %cst_79 [2] : vector<3x8x8xf32> to vector<3x8xf32>
    %352 = vector.shape_cast %351 : vector<3x8xf32> to vector<3x8x1xf32>
    %cst_80 = arith.constant dense<0.000000e+00> : vector<3x1xf32>
    %353 = vector.multi_reduction <add>, %352, %cst_80 [1] : vector<3x8x1xf32> to vector<3x1xf32>
    %354 = vector.shape_cast %353 : vector<3x1xf32> to vector<3x1x1xf32>
    %355 = arith.mulf %327, %327 : vector<3x8x8xf32>
    %356 = vector.shape_cast %340 : vector<8x8xf32> to vector<1x8x8xf32>
    %357 = vector.broadcast %356 : vector<1x8x8xf32> to vector<3x8x8xf32>
    %358 = arith.mulf %355, %357 : vector<3x8x8xf32>
    %cst_81 = arith.constant dense<0.000000e+00> : vector<3x8xf32>
    %359 = vector.multi_reduction <add>, %358, %cst_81 [2] : vector<3x8x8xf32> to vector<3x8xf32>
    %360 = vector.shape_cast %359 : vector<3x8xf32> to vector<3x8x1xf32>
    %cst_82 = arith.constant dense<0.000000e+00> : vector<3x1xf32>
    %361 = vector.multi_reduction <add>, %360, %cst_82 [1] : vector<3x8x1xf32> to vector<3x1xf32>
    %362 = vector.shape_cast %361 : vector<3x1xf32> to vector<3x1x1xf32>
    %363 = arith.mulf %337, %337 : vector<3x8x8xf32>
    %364 = vector.shape_cast %340 : vector<8x8xf32> to vector<1x8x8xf32>
    %365 = vector.broadcast %364 : vector<1x8x8xf32> to vector<3x8x8xf32>
    %366 = arith.mulf %363, %365 : vector<3x8x8xf32>
    %cst_83 = arith.constant dense<0.000000e+00> : vector<3x8xf32>
    %367 = vector.multi_reduction <add>, %366, %cst_83 [2] : vector<3x8x8xf32> to vector<3x8xf32>
    %368 = vector.shape_cast %367 : vector<3x8xf32> to vector<3x8x1xf32>
    %cst_84 = arith.constant dense<0.000000e+00> : vector<3x1xf32>
    %369 = vector.multi_reduction <add>, %368, %cst_84 [1] : vector<3x8x1xf32> to vector<3x1xf32>
    %370 = vector.shape_cast %369 : vector<3x1xf32> to vector<3x1x1xf32>
    %371 = arith.mulf %327, %337 : vector<3x8x8xf32>
    %372 = vector.shape_cast %340 : vector<8x8xf32> to vector<1x8x8xf32>
    %373 = vector.broadcast %372 : vector<1x8x8xf32> to vector<3x8x8xf32>
    %374 = arith.mulf %371, %373 : vector<3x8x8xf32>
    %cst_85 = arith.constant dense<0.000000e+00> : vector<3x8xf32>
    %375 = vector.multi_reduction <add>, %374, %cst_85 [2] : vector<3x8x8xf32> to vector<3x8xf32>
    %376 = vector.shape_cast %375 : vector<3x8xf32> to vector<3x8x1xf32>
    %cst_86 = arith.constant dense<0.000000e+00> : vector<3x1xf32>
    %377 = vector.multi_reduction <add>, %376, %cst_86 [1] : vector<3x8x1xf32> to vector<3x1xf32>
    %378 = vector.shape_cast %377 : vector<3x1xf32> to vector<3x1x1xf32>
    %379 = arith.mulf %347, %347 : vector<3x1x1xf32>
    %380 = arith.mulf %354, %354 : vector<3x1x1xf32>
    %381 = arith.mulf %347, %354 : vector<3x1x1xf32>
    %382 = arith.subf %362, %379 : vector<3x1x1xf32>
    %383 = arith.subf %370, %380 : vector<3x1x1xf32>
    %384 = arith.subf %378, %381 : vector<3x1x1xf32>
    %cst_87 = arith.constant 2.000000e+00 : f32
    %385 = vector.broadcast %cst_87 : f32 to vector<3x1x1xf32>
    %386 = arith.mulf %385, %384 : vector<3x1x1xf32>
    %387 = vector.broadcast %339 : f32 to vector<3x1x1xf32>
    %388 = arith.addf %386, %387 : vector<3x1x1xf32>
    %389 = arith.addf %382, %383 : vector<3x1x1xf32>
    %390 = vector.broadcast %339 : f32 to vector<3x1x1xf32>
    %391 = arith.addf %389, %390 : vector<3x1x1xf32>
    %392 = tpu.reciprocal %391 {approx = true} : vector<3x1x1xf32> -> vector<3x1x1xf32>
    %393 = arith.mulf %388, %392 : vector<3x1x1xf32>
    %cst_88 = arith.constant 2.000000e+00 : f32
    %394 = vector.broadcast %cst_88 : f32 to vector<3x1x1xf32>
    %395 = arith.mulf %394, %381 : vector<3x1x1xf32>
    %396 = vector.broadcast %338 : f32 to vector<3x1x1xf32>
    %397 = arith.addf %395, %396 : vector<3x1x1xf32>
    %398 = arith.mulf %397, %393 : vector<3x1x1xf32>
    %399 = arith.addf %379, %380 : vector<3x1x1xf32>
    %400 = vector.broadcast %338 : f32 to vector<3x1x1xf32>
    %401 = arith.addf %399, %400 : vector<3x1x1xf32>
    %402 = tpu.reciprocal %401 {approx = true} : vector<3x1x1xf32> -> vector<3x1x1xf32>
    %403 = arith.mulf %398, %402 : vector<3x1x1xf32>
    %404 = vector.shape_cast %403 : vector<3x1x1xf32> to vector<1x3x1x1xf32>
    %cst_89 = arith.constant dense<0.000000e+00> : vector<1xf32>
    %405 = vector.multi_reduction <add>, %404, %cst_89 [1, 2, 3] : vector<1x3x1x1xf32> to vector<1xf32>
    %406 = vector.shape_cast %405 : vector<1xf32> to vector<1x1x1x1xf32>
    %407 = vector.extract %406[0, 0, 0, 0] : f32 from vector<1x1x1x1xf32>
    %408 = vector.shape_cast %393 : vector<3x1x1xf32> to vector<1x3x1x1xf32>
    %cst_90 = arith.constant dense<0.000000e+00> : vector<1xf32>
    %409 = vector.multi_reduction <add>, %408, %cst_90 [1, 2, 3] : vector<1x3x1x1xf32> to vector<1xf32>
    %410 = vector.shape_cast %409 : vector<1xf32> to vector<1x1x1x1xf32>
    %411 = vector.extract %410[0, 0, 0, 0] : f32 from vector<1x1x1x1xf32>
    %412 = tpu.iota {dimensions = array<i32: 0>} : vector<8x128xi32>
    %cst_91 = arith.constant 0.000000e+00 : f32
    %413 = vector.broadcast %cst_91 : f32 to vector<8x128xf32>
    %cst_92 = arith.constant 0.000000e+00 : f32
    %414 = vector.broadcast %cst_92 : f32 to vector<8x128xf32>
    %c0_i32 = arith.constant 0 : i32
    %415 = vector.broadcast %c0_i32 : i32 to vector<8x128xi32>
    %416 = arith.cmpi eq, %412, %415 : vector<8x128xi32>
    %417 = vector.broadcast %58 : f32 to vector<8x128xf32>
    %418 = arith.select %416, %417, %413 : vector<8x128xi1>, vector<8x128xf32>
    %c0_i32_93 = arith.constant 0 : i32
    %419 = vector.broadcast %c0_i32_93 : i32 to vector<8x128xi32>
    %420 = arith.cmpi eq, %412, %419 : vector<8x128xi32>
    %421 = vector.broadcast %62 : f32 to vector<8x128xf32>
    %422 = arith.select %420, %421, %414 : vector<8x128xi1>, vector<8x128xf32>
    %c1_i32 = arith.constant 1 : i32
    %423 = vector.broadcast %c1_i32 : i32 to vector<8x128xi32>
    %424 = arith.cmpi eq, %412, %423 : vector<8x128xi32>
    %425 = vector.broadcast %132 : f32 to vector<8x128xf32>
    %426 = arith.select %424, %425, %418 : vector<8x128xi1>, vector<8x128xf32>
    %c1_i32_94 = arith.constant 1 : i32
    %427 = vector.broadcast %c1_i32_94 : i32 to vector<8x128xi32>
    %428 = arith.cmpi eq, %412, %427 : vector<8x128xi32>
    %429 = vector.broadcast %136 : f32 to vector<8x128xf32>
    %430 = arith.select %428, %429, %422 : vector<8x128xi1>, vector<8x128xf32>
    %c2_i32 = arith.constant 2 : i32
    %431 = vector.broadcast %c2_i32 : i32 to vector<8x128xi32>
    %432 = arith.cmpi eq, %412, %431 : vector<8x128xi32>
    %433 = vector.broadcast %219 : f32 to vector<8x128xf32>
    %434 = arith.select %432, %433, %426 : vector<8x128xi1>, vector<8x128xf32>
    %c2_i32_95 = arith.constant 2 : i32
    %435 = vector.broadcast %c2_i32_95 : i32 to vector<8x128xi32>
    %436 = arith.cmpi eq, %412, %435 : vector<8x128xi32>
    %437 = vector.broadcast %223 : f32 to vector<8x128xf32>
    %438 = arith.select %436, %437, %430 : vector<8x128xi1>, vector<8x128xf32>
    %c3_i32 = arith.constant 3 : i32
    %439 = vector.broadcast %c3_i32 : i32 to vector<8x128xi32>
    %440 = arith.cmpi eq, %412, %439 : vector<8x128xi32>
    %441 = vector.broadcast %313 : f32 to vector<8x128xf32>
    %442 = arith.select %440, %441, %434 : vector<8x128xi1>, vector<8x128xf32>
    %c3_i32_96 = arith.constant 3 : i32
    %443 = vector.broadcast %c3_i32_96 : i32 to vector<8x128xi32>
    %444 = arith.cmpi eq, %412, %443 : vector<8x128xi32>
    %445 = vector.broadcast %317 : f32 to vector<8x128xf32>
    %446 = arith.select %444, %445, %438 : vector<8x128xi1>, vector<8x128xf32>
    %c4_i32 = arith.constant 4 : i32
    %447 = vector.broadcast %c4_i32 : i32 to vector<8x128xi32>
    %448 = arith.cmpi eq, %412, %447 : vector<8x128xi32>
    %449 = vector.broadcast %407 : f32 to vector<8x128xf32>
    %450 = arith.select %448, %449, %442 : vector<8x128xi1>, vector<8x128xf32>
    %c4_i32_97 = arith.constant 4 : i32
    %451 = vector.broadcast %c4_i32_97 : i32 to vector<8x128xi32>
    %452 = arith.cmpi eq, %412, %451 : vector<8x128xi32>
    %453 = vector.broadcast %411 : f32 to vector<8x128xf32>
    %454 = arith.select %452, %453, %446 : vector<8x128xi1>, vector<8x128xf32>
    %455 = vector.shape_cast %450 : vector<8x128xf32> to vector<1x8x128xf32>
    %c0_98 = arith.constant 0 : index
    %c0_99 = arith.constant 0 : index
    %c0_100 = arith.constant 0 : index
    %456 = vector.load %arg15[%c0_98, %c0_99, %c0_100] : memref<1x8x128xf32, #tpu.memory_space<vmem>>, vector<1x8x128xf32>
    tpu.vector_store %arg15[%c0_98, %c0_99, %c0_100], %455 {strides = array<i32>} : memref<1x8x128xf32, #tpu.memory_space<vmem>>, vector<1x8x128xf32>,
    %457 = vector.shape_cast %454 : vector<8x128xf32> to vector<1x8x128xf32>
    %c0_101 = arith.constant 0 : index
    %c0_102 = arith.constant 0 : index
    %c0_103 = arith.constant 0 : index
    %458 = vector.load %arg16[%c0_101, %c0_102, %c0_103] : memref<1x8x128xf32, #tpu.memory_space<vmem>>, vector<1x8x128xf32>
    tpu.vector_store %arg16[%c0_101, %c0_102, %c0_103], %457 {strides = array<i32>} : memref<1x8x128xf32, #tpu.memory_space<vmem>>, vector<1x8x128xf32>,
    return
  }
  func.func @transform_0(%arg0: i32) -> i32 {
    %c0_i32 = arith.constant 0 : i32
    %c0_i32_0 = arith.constant 0 : i32
    return %c0_i32 : i32
  }
  func.func @transform_1(%arg0: i32) -> (i32, i32) {
    %c0_i32 = arith.constant 0 : i32
    %c0_i32_0 = arith.constant 0 : i32
    %c0_i32_1 = arith.constant 0 : i32
    return %c0_i32, %c0_i32_0 : i32, i32
  }
  func.func @transform_2(%arg0: i32) -> (i32, i32) {
    %c0_i32 = arith.constant 0 : i32
    %c0_i32_0 = arith.constant 0 : i32
    %c0_i32_1 = arith.constant 0 : i32
    return %c0_i32, %c0_i32_0 : i32, i32
  }
  func.func @transform_3(%arg0: i32) -> (i32, i32) {
    %c0_i32 = arith.constant 0 : i32
    %c0_i32_0 = arith.constant 0 : i32
    %c0_i32_1 = arith.constant 0 : i32
    return %c0_i32, %c0_i32_0 : i32, i32
  }
  func.func @transform_4(%arg0: i32) -> (i32, i32) {
    %c0_i32 = arith.constant 0 : i32
    %c0_i32_0 = arith.constant 0 : i32
    %c0_i32_1 = arith.constant 0 : i32
    return %c0_i32, %c0_i32_0 : i32, i32
  }
  func.func @transform_5(%arg0: i32) -> (i32, i32) {
    %c0_i32 = arith.constant 0 : i32
    %c0_i32_0 = arith.constant 0 : i32
    %c0_i32_1 = arith.constant 0 : i32
    return %c0_i32, %c0_i32_0 : i32, i32
  }
  func.func @transform_6(%arg0: i32) -> (i32, i32) {
    %c0_i32 = arith.constant 0 : i32
    %c0_i32_0 = arith.constant 0 : i32
    %c0_i32_1 = arith.constant 0 : i32
    return %c0_i32, %c0_i32_0 : i32, i32
  }
  func.func @transform_7(%arg0: i32) -> (i32, i32) {
    %c0_i32 = arith.constant 0 : i32
    %c0_i32_0 = arith.constant 0 : i32
    %c0_i32_1 = arith.constant 0 : i32
    return %c0_i32, %c0_i32_0 : i32, i32
  }
  func.func @transform_8(%arg0: i32) -> (i32, i32) {
    %c0_i32 = arith.constant 0 : i32
    %c0_i32_0 = arith.constant 0 : i32
    %c0_i32_1 = arith.constant 0 : i32
    return %c0_i32, %c0_i32_0 : i32, i32
  }
  func.func @transform_9(%arg0: i32) -> (i32, i32) {
    %c0_i32 = arith.constant 0 : i32
    %c0_i32_0 = arith.constant 0 : i32
    %c0_i32_1 = arith.constant 0 : i32
    return %c0_i32, %c0_i32_0 : i32, i32
  }
  func.func @transform_10(%arg0: i32) -> (i32, i32) {
    %c0_i32 = arith.constant 0 : i32
    %c0_i32_0 = arith.constant 0 : i32
    %c0_i32_1 = arith.constant 0 : i32
    return %c0_i32, %c0_i32_0 : i32, i32
  }
  func.func @transform_11(%arg0: i32) -> (i32, i32) {
    %c0_i32 = arith.constant 0 : i32
    %c0_i32_0 = arith.constant 0 : i32
    %c0_i32_1 = arith.constant 0 : i32
    return %c0_i32, %c0_i32_0 : i32, i32
  }
  func.func @transform_12(%arg0: i32) -> (i32, i32, i32) {
    %c0_i32 = arith.constant 0 : i32
    %c0_i32_0 = arith.constant 0 : i32
    %c0_i32_1 = arith.constant 0 : i32
    return %arg0, %c0_i32, %c0_i32_0 : i32, i32, i32
  }
  func.func @transform_13(%arg0: i32) -> (i32, i32, i32) {
    %c0_i32 = arith.constant 0 : i32
    %c0_i32_0 = arith.constant 0 : i32
    %c0_i32_1 = arith.constant 0 : i32
    return %arg0, %c0_i32, %c0_i32_0 : i32, i32, i32
  }
  func.func @transform_14(%arg0: i32) -> (i32, i32, i32) {
    %c0_i32 = arith.constant 0 : i32
    %c0_i32_0 = arith.constant 0 : i32
    %c0_i32_1 = arith.constant 0 : i32
    return %arg0, %c0_i32, %c0_i32_0 : i32, i32, i32
  }
  func.func @transform_15(%arg0: i32) -> (i32, i32, i32) {
    %c0_i32 = arith.constant 0 : i32
    %c0_i32_0 = arith.constant 0 : i32
    %c0_i32_1 = arith.constant 0 : i32
    return %arg0, %c0_i32, %c0_i32_0 : i32, i32, i32
  }
}

</mosaic_0001>

<bundles_post_ra>
// kernel: msssim_loss.1
= control target key start
LH: loop header
LB: loop body
LE: loop exit
PB: predicated region body
PF: predicated region fallthrough
CT: control target
= control target key end

     0   :  { %21 = vsyncpa [#allocation3], 0  ;;  %s6982_s18 = smov 0   ;;  %s8727_s0 = inlined_call_operand.vmem [shape: f32[10], index: 0, kind: input, shape index: {}]   ;;  %s8728_s1 = inlined_call_operand.vmem [shape: f32[32,24], index: 1, kind: input, shape index: {}]   ;;  %s8729_s2 = inlined_call_operand.vmem [shape: f32[32,22], index: 2, kind: input, shape index: {}]   ;;  %s8730_s3 = inlined_call_operand.vmem [shape: f32[32,16], index: 3, kind: input, shape index: {}, may-alias: {3,4}]   ;;  %s8731_s4 = inlined_call_operand.vmem [shape: f32[32,16], index: 4, kind: input, shape index: {}, may-alias: {3,4}]   ;;  %s8732_s5 = inlined_call_operand.vmem [shape: f32[16,8], index: 5, kind: input, shape index: {}]   ;;  %s8733_s6 = inlined_call_operand.vmem [shape: f32[16,6], index: 6, kind: input, shape index: {}]   ;;  %s8734_s7 = inlined_call_operand.vmem [shape: f32[16,8], index: 7, kind: input, shape index: {}, may-alias: {7,8}]   ;;  %s8735_s8 = inlined_call_operand.vmem [shape: f32[16,8], index: 8, kind: input, shape index: {}, may-alias: {7,8}]   ;;  %s8736_s9 = inlined_call_operand.vmem [shape: f32[8,8], index: 9, kind: input, shape index: {}]   ;;  %s8737_s10 = inlined_call_operand.vmem [shape: f32[8,8], index: 10, kind: input, shape index: {}]   ;;  %s8738_s11 = inlined_call_operand.vmem [shape: f32[8,8], index: 11, kind: input, shape index: {}]   ;;  %s8739_s12 = inlined_call_operand.vmem [shape: f32[6,32,32], index: 12, kind: input, shape index: {}]   ;;  %s8740_s13 = inlined_call_operand.vmem [shape: f32[6,32,32], index: 13, kind: input, shape index: {}]   ;;  %s8741_s14 = inlined_call_operand.vmem [shape: f32[2,8,128], index: 14, kind: output, shape index: {0}]   ;;  %s8742_s15 = inlined_call_operand.vmem [shape: f32[2,8,128], index: 15, kind: output, shape index: {1}]  }
   0x1 LB: > { %s6988_s19 = sadd.s32 4294967295, %s6893_s18   ;;  %p5839_p0 = scmp.ge.s32.totalorder %s6893_s18, 1  ;;  %s6893_s18 = sphi %s6982_s18, %s27_s18  }
   0x2   : > { %p388_p1 = scmp.lt.s32.totalorder %s6893_s18, 3  ;;  %s401_s22 = sshll.u32 %s8727_s0, 4  ;;  %s402_s22 = int_to_ptr.vmem [resolvable:$true] %s401_s22 }
   0x3   : > { %p6767_p3 = scmp.eq.s32.totalorder %s6988_s19, 0  ;;  %s6868_s24 = scalar_lea.vmem %s402_s22, 16 }
   0x4   : > { %p6995_p2 = pnand %p5839_p0, %p388_p1  ;;  %p6869_p6 = scmp.ne.s32.totalorder %s402_s22, %s6868_s24 }
   0x5   : > { %p6876_p10 = scmp.lt.s32.totalorder %s402_s22, %s402_s22  ;;  %p6877_p11 = scmp.lt.s32.totalorder %s6868_s24, %s6868_s24 }
   0x6   : > { %p6763_p4 = pneg %p6995_p2 }
   0x7   : > { %p6878_p12 = por %p6877_p11, %p6876_p10 }
   0x8   : > { %p6764_p5 = pnand %p6767_p3, %p6763_p4 }
   0xa   : > { %p6870_p7 = pneg %p6764_p5 }
   0xc   : > { %p6871_p8 = pnand %p6870_p7, %p6869_p6 }
   0xe   : > { %p6872_p9 = pneg %p6871_p8 }
  0x10   : > { %p6879_p13 = pnand %p6878_p12, %p6872_p9 }
  0x12   : > { %6882 = shalt.err (!%p6879_p13)
}
  0x13   : > { %s6895_s25 = smov [#allocation2]   ;;  %467 = sbr.rel (%p6995_p2) target bundleno = 2319 (0x90f), region = 76 }
  0x14   : > { %6766 = dma.vmem_to_smem (!%p6764_p5), %s402_s22, 16, %s6895_s25, [#allocation3]  }
  0x18   : > { %6888 = dma.done.wait (%p6767_p3), [#allocation3], 16  }
  0x19   : > { %6890 = vsyncadd (%p6767_p3), [#allocation3], 4294967280 }
  0x1a   : > { %473 = sfence }
  0x1b   : > { %v577_v0 = vld [vmem:[%s8728_s1 + $0x18] sm:$0xff]  ;;  %v576_v1 = vld [vmem:[%s8728_s1 + $0x10] sm:$0xff]  ;;  %s526_s30 = smul.u32 3, %s6988_s19  ;;  %v575_v2 = vld [vmem:[%s8728_s1 + $0x8] sm:$0xff]  ;;  %vm618_vm0 = vcmask 261120   ;;  %vm6897_vm1 = vmmov 0  }
  0x1c   : > { %6295 = vmatprep.subr.mxu0 %v577_v0  ;;  %v574_v3 = vld [vmem:[%s8728_s1] sm:$0xff]  ;;  %v2320_v4 = vld [vmem:[%s8730_s3 + $0x18] sm:$0xff]  ;;  %v2319_v8 = vld [vmem:[%s8730_s3 + $0x10] sm:$0xff]  ;;  %vm3079_vm2 = vcmask 130048   ;;  %s5850_s24 = sld [smem:[#allocation2 + $0x1]]  ;;  %vm2264_vm3 = vcmask 179200  }
  0x1d   : > { %6296 = vmatpush3.msra.mxu0 %v577_v0  ;;  %p527_p0 = scmp.lt.s32.totalorder %s526_s30, 5  ;;  %v2318_v10 = vld [vmem:[%s8730_s3 + $0x8] sm:$0xff]  ;;  %v2317_v12 = vld [vmem:[%s8730_s3] sm:$0xff]  ;;  %s5993_s20 = sld [smem:[#allocation2 + $0x3]]  ;;  %vm4115_vm6 = vcmask 48128   ;;  %vm4776_vm7 = vcmask 64512  }
  0x1e   : > { %6297 = vmatprep.subr.mxu0 %v576_v1  ;;  %s5992_s21 = sld [smem:[#allocation2 + $0x2]]  ;;  %s6898_s23 = smov 127   ;;  %vm5042_vm8 = vcmask 56320   ;;  %vm4992_vm9 = vcmask 0  }
  0x1f   : > { %6298 = vmatpush3.msra.mxu0 %v576_v1  ;;  %s8765_s30 = smov (!%p527_p0, %s526_s30), 5  ;;  %s6901_s26 = smov 6  }
  0x20   : > { %6299 = vmatprep.subr.mxu0 %v575_v2  ;;  %s6065_s22 = sshll.u32 %s8765_s30, 5  ;;  %s6058_s17 = sld [smem:[#allocation2 + $0x5]] }
  0x21   : > { %6300 = vmatpush3.msra.mxu0 %v575_v2  ;;  %s7034_s27 = scalar_lea.vmem %s8739_s12, %s6065_s22  ;;  %s538_s25 = scalar_lea.vmem %s8740_s13, %s6065_s22 }
  0x22   : > { %6301 = vmatprep.subr.mxu0 %v574_v3  ;;  %v7037_v5 = vld [vmem:[%s7034_s27] sm:$0xff]  ;;  %v7040_v6 = vld [vmem:[%s7034_s27 + $0x8] sm:$0xff]  ;;  %v7043_v7 = vld [vmem:[%s7034_s27 + $0x10] sm:$0xff]  ;;  %s6900_s22 = smov 126   ;;  %p540_p1 = scmp.lt.s32.totalorder %s6988_s19, 1 }
  0x23   : > { %6302 = vmatpush3.msra.mxu0 %v574_v3  ;;  %6303 = vmatprep.mubr.msk.f32.mxu0 %vm618_vm0, %v7037_v5  ;;  %v7055_v9 = vld [vmem:[%s7034_s27 + $0x18] sm:$0xff]  ;;  %v7061_v11 = vld [vmem:[%s7034_s27 + $0x20] sm:$0xff]  ;;  %v7071_v13 = vld [vmem:[%s7034_s27 + $0x28] sm:$0xff]  ;;  %v582_v32 = vmul.f32 %v7037_v5, %v7037_v5  ;;  %v583_v33 = vmul.f32 %v7040_v6, %v7040_v6  ;;  %v584_v34 = vmul.f32 %v7043_v7, %v7043_v7 }
  0x24   : > { %6536 = vmatprep.subr.mxu0 %v2320_v4  ;;  %6304 = vmatmul.mubr.msk.f32.vlgmr.msra.gmra.mxu0 %vm618_vm0, %v7040_v6  ;;  %v7074_v14 = vld [vmem:[%s7034_s27 + $0x30] sm:$0xff]  ;;  %v7081_v15 = vld [vmem:[%s7034_s27 + $0x38] sm:$0xff]  ;;  %v7084_v16 = vld [vmem:[%s7034_s27 + $0x40] sm:$0xff]  ;;  %v585_v35 = vmul.f32 %v7055_v9, %v7055_v9  ;;  %v586_v36 = vmul.f32 %v7061_v11, %v7061_v11  ;;  %v587_v37 = vmul.f32 %v7071_v13, %v7071_v13  ;;  %s8767_s19 = smov (!%p540_p1, %s6988_s19), 1 }
  0x25   : > { %6537 = vmatpush3.msra.mxu0 %v2320_v4  ;;  %6306 = vmatprep.mubr.msk.f32.mxu0 %vm618_vm0, %v7043_v7  ;;  %v7091_v17 = vld [vmem:[%s7034_s27 + $0x48] sm:$0xff]  ;;  %v7094_v18 = vld [vmem:[%s7034_s27 + $0x50] sm:$0xff]  ;;  %v7106_v19 = vld [vmem:[%s7034_s27 + $0x58] sm:$0xff]  ;;  %v588_v38 = vmul.f32 %v7074_v14, %v7074_v14  ;;  %v589_v39 = vmul.f32 %v7081_v15, %v7081_v15  ;;  %v590_v40 = vmul.f32 %v7084_v16, %v7084_v16 }
  0x26   : > { %6538 = vmatprep.subr.mxu0 %v2319_v8  ;;  %v7108_v20 = vld [vmem:[%s538_s25] sm:$0xff]  ;;  %v7114_v21 = vld [vmem:[%s538_s25 + $0x8] sm:$0xff]  ;;  %v7116_v22 = vld [vmem:[%s538_s25 + $0x10] sm:$0xff]  ;;  %v591_v41 = vmul.f32 %v7091_v17, %v7091_v17  ;;  %v592_v42 = vmul.f32 %v7094_v18, %v7094_v18  ;;  %v593_v43 = vmul.f32 %v7106_v19, %v7106_v19 }
  0x27   : > { %6539 = vmatpush3.msra.mxu0 %v2319_v8  ;;  %v7122_v23 = vld [vmem:[%s538_s25 + $0x18] sm:$0xff]  ;;  %v7124_v24 = vld [vmem:[%s538_s25 + $0x20] sm:$0xff]  ;;  %v7130_v25 = vld [vmem:[%s538_s25 + $0x28] sm:$0xff]  ;;  %v594_v44 = vmul.f32 %v7108_v20, %v7108_v20  ;;  %v595_v45 = vmul.f32 %v7114_v21, %v7114_v21  ;;  %v596_v46 = vmul.f32 %v7116_v22, %v7116_v22  ;;  %v606_v56 = vmul.f32 %v7108_v20, %v7037_v5 }
  0x28   : > { %6307 = vmatmul.mubr.msk.f32.gmra.mxu0 %vm618_vm0, %v7055_v9  ;;  %6540 = vmatprep.subr.mxu0 %v2318_v10  ;;  %v7132_v26 = vld [vmem:[%s538_s25 + $0x30] sm:$0xff]  ;;  %v7138_v27 = vld [vmem:[%s538_s25 + $0x38] sm:$0xff]  ;;  %v7140_v28 = vld [vmem:[%s538_s25 + $0x40] sm:$0xff]  ;;  %v597_v47 = vmul.f32 %v7122_v23, %v7122_v23  ;;  %v598_v48 = vmul.f32 %v7124_v24, %v7124_v24  ;;  %v599_v49 = vmul.f32 %v7130_v25, %v7130_v25 }
  0x29   : > { %6309 = vmatprep.mubr.msk.f32.mxu0 %vm618_vm0, %v7061_v11  ;;  %6541 = vmatpush3.msra.mxu0 %v2318_v10  ;;  %v7146_v29 = vld [vmem:[%s538_s25 + $0x48] sm:$0xff]  ;;  %v7148_v30 = vld [vmem:[%s538_s25 + $0x50] sm:$0xff]  ;;  %v7154_v31 = vld [vmem:[%s538_s25 + $0x58] sm:$0xff]  ;;  %v600_v50 = vmul.f32 %v7132_v26, %v7132_v26  ;;  %v601_v51 = vmul.f32 %v7138_v27, %v7138_v27  ;;  %v602_v52 = vmul.f32 %v7140_v28, %v7140_v28  ;;  %s572_s25 = sld [smem:[#allocation2]] }
  0x2a   : > { %6542 = vmatprep.subr.mxu0 %v2317_v12  ;;  %v603_v53 = vmul.f32 %v7146_v29, %v7146_v29  ;;  %v604_v54 = vmul.f32 %v7148_v30, %v7148_v30  ;;  %v605_v55 = vmul.f32 %v7154_v31, %v7154_v31  ;;  %v607_v57 = vmul.f32 %v7114_v21, %v7040_v6 }
  0x2b   : > { %6543 = vmatpush3.msra.mxu0 %v2317_v12  ;;  %v608_v58 = vmul.f32 %v7116_v22, %v7043_v7  ;;  %v609_v59 = vmul.f32 %v7122_v23, %v7055_v9  ;;  %v610_v60 = vmul.f32 %v7124_v24, %v7061_v11  ;;  %v611_v61 = vmul.f32 %v7130_v25, %v7071_v13 }
  0x2c   : > { %6310 = vmatmul.mubr.msk.f32.gmra.mxu0 %vm618_vm0, %v7071_v13  ;;  %v612_v62 = vmul.f32 %v7132_v26, %v7074_v14  ;;  %v613_v63 = vmul.f32 %v7138_v27, %v7081_v15  ;;  %v614_v0 = vmul.f32 %v7140_v28, %v7084_v16  ;;  %v615_v1 = vmul.f32 %v7146_v29, %v7091_v17 }
  0x2d   : > { %6312 = vmatprep.mubr.msk.f32.mxu0 %vm618_vm0, %v7074_v14  ;;  %v616_v2 = vmul.f32 %v7148_v30, %v7094_v18  ;;  %v617_v3 = vmul.f32 %v7154_v31, %v7106_v19 }
  0x30   : > { %6313 = vmatmul.mubr.msk.f32.gmra.mxu0 %vm618_vm0, %v7081_v15 }
  0x31   : > { %6315 = vmatprep.mubr.msk.f32.mxu0 %vm618_vm0, %v7084_v16 }
  0x34   : > { %6316 = vmatmul.mubr.msk.f32.gmra.mxu0 %vm618_vm0, %v7091_v17 }
  0x35   : > { %6318 = vmatprep.mubr.msk.f32.mxu0 %vm618_vm0, %v7094_v18 }
  0x38   : > { %6319 = vmatmul.mubr.msk.f32.gmra.mxu0 %vm618_vm0, %v7106_v19 }
  0x39   : > { %6321 = vmatprep.mubr.msk.f32.mxu0 %vm618_vm0, %v7108_v20 }
  0x3c   : > { %6322 = vmatmul.mubr.msk.f32.gmra.mxu0 %vm618_vm0, %v7114_v21 }
  0x3d   : > { %6324 = vmatprep.mubr.msk.f32.mxu0 %vm618_vm0, %v7116_v22 }
  0x40   : > { %6325 = vmatmul.mubr.msk.f32.gmra.mxu0 %vm618_vm0, %v7122_v23 }
  0x41   : > { %6327 = vmatprep.mubr.msk.f32.mxu0 %vm618_vm0, %v7124_v24 }
  0x44   : > { %6328 = vmatmul.mubr.msk.f32.gmra.mxu0 %vm618_vm0, %v7130_v25 }
  0x45   : > { %6330 = vmatprep.mubr.msk.f32.mxu0 %vm618_vm0, %v7132_v26 }
  0x48   : > { %6331 = vmatmul.mubr.msk.f32.gmra.mxu0 %vm618_vm0, %v7138_v27 }
  0x49   : > { %6333 = vmatprep.mubr.msk.f32.mxu0 %vm618_vm0, %v7140_v28 }
  0x4c   : > { %6334 = vmatmul.mubr.msk.f32.gmra.mxu0 %vm618_vm0, %v7146_v29 }
  0x4d   : > { %6336 = vmatprep.mubr.msk.f32.mxu0 %vm618_vm0, %v7148_v30 }
  0x50   : > { %6337 = vmatmul.mubr.msk.f32.gmra.mxu0 %vm618_vm0, %v7154_v31 }
  0x51   : > { %6339 = vmatprep.mubr.msk.f32.mxu0 %vm618_vm0, %v582_v32 }
  0x54   : > { %6340 = vmatmul.mubr.msk.f32.gmra.mxu0 %vm618_vm0, %v583_v33 }
  0x55   : > { %6342 = vmatprep.mubr.msk.f32.mxu0 %vm618_vm0, %v584_v34 }
  0x58   : > { %6343 = vmatmul.mubr.msk.f32.gmra.mxu0 %vm618_vm0, %v585_v35 }
  0x59   : > { %6345 = vmatprep.mubr.msk.f32.mxu0 %vm618_vm0, %v586_v36 }
  0x5c   : > { %6346 = vmatmul.mubr.msk.f32.gmra.mxu0 %vm618_vm0, %v587_v37 }
  0x5d   : > { %6348 = vmatprep.mubr.msk.f32.mxu0 %vm618_vm0, %v588_v38 }
  0x60   : > { %6349 = vmatmul.mubr.msk.f32.gmra.mxu0 %vm618_vm0, %v589_v39 }
  0x61   : > { %6351 = vmatprep.mubr.msk.f32.mxu0 %vm618_vm0, %v590_v40 }
  0x64   : > { %6352 = vmatmul.mubr.msk.f32.gmra.mxu0 %vm618_vm0, %v591_v41 }
  0x65   : > { %6354 = vmatprep.mubr.msk.f32.mxu0 %vm618_vm0, %v592_v42 }
  0x68   : > { %6355 = vmatmul.mubr.msk.f32.gmra.mxu0 %vm618_vm0, %v593_v43 }
  0x69   : > { %6357 = vmatprep.mubr.msk.f32.mxu0 %vm618_vm0, %v594_v44 }
  0x6c   : > { %6358 = vmatmul.mubr.msk.f32.gmra.mxu0 %vm618_vm0, %v595_v45 }
  0x6d   : > { %6360 = vmatprep.mubr.msk.f32.mxu0 %vm618_vm0, %v596_v46 }
  0x70   : > { %6361 = vmatmul.mubr.msk.f32.gmra.mxu0 %vm618_vm0, %v597_v47 }
  0x71   : > { %6363 = vmatprep.mubr.msk.f32.mxu0 %vm618_vm0, %v598_v48  ;;  %v2324_v48 = vld [vmem:[%s8731_s4 + $0x18] sm:$0xff] }
  0x72   : > { %6580 = vmatprep.subr.mxu0 %v2324_v48 }
  0x74   : > { %6364 = vmatmul.mubr.msk.f32.gmra.mxu0 %vm618_vm0, %v599_v49 }
  0x75   : > { %6366 = vmatprep.mubr.msk.f32.mxu0 %vm618_vm0, %v600_v50 }
  0x78   : > { %6367 = vmatmul.mubr.msk.f32.gmra.mxu0 %vm618_vm0, %v601_v51 }
  0x79   : > { %6369 = vmatprep.mubr.msk.f32.mxu0 %vm618_vm0, %v602_v52 }
  0x7c   : > { %6370 = vmatmul.mubr.msk.f32.gmra.mxu0 %vm618_vm0, %v603_v53 }
  0x7d   : > { %6372 = vmatprep.mubr.msk.f32.mxu0 %vm618_vm0, %v604_v54 }
  0x80   : > { %6373 = vmatmul.mubr.msk.f32.gmra.mxu0 %vm618_vm0, %v605_v55  ;;  %v2323_v55 = vld [vmem:[%s8731_s4 + $0x10] sm:$0xff] }
  0x81   : > { %6375 = vmatprep.mubr.msk.f32.mxu0 %vm618_vm0, %v606_v56 }
  0x84   : > { %6376 = vmatmul.mubr.msk.f32.gmra.mxu0 %vm618_vm0, %v607_v57 }
  0x85   : > { %6378 = vmatprep.mubr.msk.f32.mxu0 %vm618_vm0, %v608_v58 }
  0x88   : > { %6379 = vmatmul.mubr.msk.f32.gmra.mxu0 %vm618_vm0, %v609_v59 }
  0x89   : > { %6381 = vmatprep.mubr.msk.f32.mxu0 %vm618_vm0, %v610_v60 }
  0x8c   : > { %6382 = vmatmul.mubr.msk.f32.gmra.mxu0 %vm618_vm0, %v611_v61 }
  0x8d   : > { %6384 = vmatprep.mubr.msk.f32.mxu0 %vm618_vm0, %v612_v62  ;;  %v2322_v62 = vld [vmem:[%s8731_s4 + $0x8] sm:$0xff] }
  0x90   : > { %6385 = vmatmul.mubr.msk.f32.gmra.mxu0 %vm618_vm0, %v613_v63 }
  0x91   : > { %6387 = vmatprep.mubr.msk.f32.mxu0 %vm618_vm0, %v614_v0 }
  0x94   : > { %6388 = vmatmul.mubr.msk.f32.gmra.mxu0 %vm618_vm0, %v615_v1 }
  0x95   : > { %6390 = vmatprep.mubr.msk.f32.mxu0 %vm618_vm0, %v616_v2 }
  0x98   : > { %6391 = vmatmul.mubr.msk.f32.gmra.mxu0 %vm618_vm0, %v617_v3 }
  0x99   : > { %6544 = vmatprep.mubr.msk.f32.mxu0 %vm618_vm0, %v7037_v5 }
  0x9c   : > { %6545 = vmatmul.mubr.msk.f32.vlgmr.msra.gmra.mxu0 %vm618_vm0, %v7040_v6 }
  0x9d   : > { %6547 = vmatprep.mubr.msk.f32.mxu0 %vm618_vm0, %v7043_v7  ;;  %6581 = vmatpush3.msra.mxu0 %v2324_v48 }
  0x9e   : > { %6582 = vmatprep.subr.mxu0 %v2323_v55 }
  0x9f   : > { %6583 = vmatpush3.msra.mxu0 %v2323_v55  ;;  %v2321_v55 = vld [vmem:[%s8731_s4] sm:$0xff] }
  0xa0   : > { %6548 = vmatmul.mubr.msk.f32.gmra.mxu0 %vm618_vm0, %v7055_v9  ;;  %6584 = vmatprep.subr.mxu0 %v2322_v62 }
  0xa1   : > { %6550 = vmatprep.mubr.msk.f32.mxu0 %vm618_vm0, %v7061_v11  ;;  %6585 = vmatpush3.msra.mxu0 %v2322_v62 }
  0xa2   : > { %6586 = vmatprep.subr.mxu0 %v2321_v55 }
  0xa3   : > { %6587 = vmatpush3.msra.mxu0 %v2321_v55 }
  0xa4   : > { %6551 = vmatmul.mubr.msk.f32.gmra.mxu0 %vm618_vm0, %v7071_v13 }
  0xa5   : > { %6553 = vmatprep.mubr.msk.f32.mxu0 %vm618_vm0, %v7074_v14 }
  0xa8   : > { %6554 = vmatmul.mubr.msk.f32.gmra.mxu0 %vm618_vm0, %v7081_v15 }
  0xa9   : > { %6556 = vmatprep.mubr.msk.f32.mxu0 %vm618_vm0, %v7084_v16 }
  0xac   : > { %6557 = vmatmul.mubr.msk.f32.gmra.mxu0 %vm618_vm0, %v7091_v17 }
  0xad   : > { %6559 = vmatprep.mubr.msk.f32.mxu0 %vm618_vm0, %v7094_v18 }
  0xb0   : > { %6560 = vmatmul.mubr.msk.f32.gmra.mxu0 %vm618_vm0, %v7106_v19 }
  0xb1   : > { %6562 = vmatprep.mubr.msk.f32.mxu0 %vm618_vm0, %v7108_v20 }
  0xb4   : > { %6563 = vmatmul.mubr.msk.f32.gmra.mxu0 %vm618_vm0, %v7114_v21 }
  0xb5   : > { %6565 = vmatprep.mubr.msk.f32.mxu0 %vm618_vm0, %v7116_v22 }
  0xb8   : > { %6566 = vmatmul.mubr.msk.f32.gmra.mxu0 %vm618_vm0, %v7122_v23 }
  0xb9   : > { %6568 = vmatprep.mubr.msk.f32.mxu0 %vm618_vm0, %v7124_v24 }
  0xbc   : > { %6569 = vmatmul.mubr.msk.f32.gmra.mxu0 %vm618_vm0, %v7130_v25 }
  0xbd   : > { %6571 = vmatprep.mubr.msk.f32.mxu0 %vm618_vm0, %v7132_v26 }
  0xc0   : > { %6572 = vmatmul.mubr.msk.f32.gmra.mxu0 %vm618_vm0, %v7138_v27 }
  0xc1   : > { %6574 = vmatprep.mubr.msk.f32.mxu0 %vm618_vm0, %v7140_v28 }
  0xc4   : > { %6575 = vmatmul.mubr.msk.f32.gmra.mxu0 %vm618_vm0, %v7146_v29 }
  0xc5   : > { %6577 = vmatprep.mubr.msk.f32.mxu0 %vm618_vm0, %v7148_v30 }
  0xc8   : > { %6578 = vmatmul.mubr.msk.f32.gmra.mxu0 %vm618_vm0, %v7154_v31 }
  0xe4   : > { %v7314_v4 = vpop.f32.mrf.mxu0 }
  0xe6   : > { %v7316_v5 = vpop.f32.mrf.mxu0 }
  0xe8   : > { %v7318_v6 = vpop.f32.mrf.mxu0 }
  0xea   : > { %v7320_v7 = vpop.f32.mrf.mxu0 }
  0xec   : > { %v7322_v8 = vpop.f32.mrf.mxu0 }
  0xee   : > { %v7324_v9 = vpop.f32.mrf.mxu0 }
  0xf0   : > { %v7326_v10 = vpop.f32.mrf.mxu0 }
  0xf2   : > { %v7328_v11 = vpop.f32.mrf.mxu0 }
  0xf4   : > { %v7330_v12 = vpop.f32.mrf.mxu0 }
  0xf6   : > { %v7332_v13 = vpop.f32.mrf.mxu0 }
  0xf8   : > { %v7334_v14 = vpop.f32.mrf.mxu0 }
  0xfa   : > { %v7336_v15 = vpop.f32.mrf.mxu0 }
  0xfc   : > { %v7338_v16 = vpop.f32.mrf.mxu0 }
  0xfe   : > { %v7340_v17 = vpop.f32.mrf.mxu0 }
 0x100   : > { %v7342_v18 = vpop.f32.mrf.mxu0 }
 0x102   : > { %v7344_v19 = vpop.f32.mrf.mxu0 }
 0x104   : > { %v7346_v20 = vpop.f32.mrf.mxu0 }
 0x106   : > { %v7348_v21 = vpop.f32.mrf.mxu0 }
 0x108   : > { %v7350_v22 = vpop.f32.mrf.mxu0 }
 0x10a   : > { %v7352_v23 = vpop.f32.mrf.mxu0 }
 0x10c   : > { %v7354_v24 = vpop.f32.mrf.mxu0 }
 0x10e   : > { %v7356_v25 = vpop.f32.mrf.mxu0 }
 0x110   : > { %v7358_v26 = vpop.f32.mrf.mxu0 }
 0x112   : > { %v7360_v27 = vpop.f32.mrf.mxu0 }
 0x114   : > { %v7362_v28 = vpop.f32.mrf.mxu0 }
 0x116   : > { %v7364_v29 = vpop.f32.mrf.mxu0 }
 0x118   : > { %v7366_v30 = vpop.f32.mrf.mxu0 }
 0x11a   : > { %v7368_v31 = vpop.f32.mrf.mxu0 }
 0x11c   : > { %v7370_v32 = vpop.f32.mrf.mxu0 }
 0x11e   : > { %v7372_v33 = vpop.f32.mrf.mxu0 }
 0x120   : > { %v7374_v34 = vpop.f32.mrf.mxu0 }
 0x122   : > { %v7376_v35 = vpop.f32.mrf.mxu0 }
 0x124   : > { %v7378_v36 = vpop.f32.mrf.mxu0 }
 0x126   : > { %v7380_v37 = vpop.f32.mrf.mxu0 }
 0x128   : > { %v7382_v38 = vpop.f32.mrf.mxu0 }
 0x12a   : > { %v7384_v39 = vpop.f32.mrf.mxu0 }
 0x12c   : > { %v7386_v40 = vpop.f32.mrf.mxu0 }
 0x12e   : > { %v7388_v41 = vpop.f32.mrf.mxu0 }
 0x130   : > { %v7390_v42 = vpop.f32.mrf.mxu0 }
 0x132   : > { %v7392_v43 = vpop.f32.mrf.mxu0 }
 0x134   : > { %v7394_v44 = vpop.f32.mrf.mxu0 }
 0x136   : > { %v7396_v45 = vpop.f32.mrf.mxu0 }
 0x138   : > { %v7398_v46 = vpop.f32.mrf.mxu0 }
 0x13a   : > { %v7400_v47 = vpop.f32.mrf.mxu0 }
 0x13c   : > { %v7405_v49 = vpop.f32.mrf.mxu0 }
 0x13e   : > { %v7407_v50 = vpop.f32.mrf.mxu0 }
 0x140   : > { %v7409_v51 = vpop.f32.mrf.mxu0 }
 0x142   : > { %v7411_v52 = vpop.f32.mrf.mxu0 }
 0x144   : > { %v7413_v53 = vpop.f32.mrf.mxu0 }
 0x146   : > { %v7415_v54 = vpop.f32.mrf.mxu0 }
 0x148   : > { %v7420_v56 = vpop.f32.mrf.mxu0 }
 0x149   : > { %8744 = vst [vmem:[#allocation5_spill] sm:$0xff] %v7420_v56 }
 0x14a   : > { %v7422_v57 = vpop.f32.mrf.mxu0 }
 0x14b   : > { %8745 = vst [vmem:[#allocation6_spill] sm:$0xff] %v7422_v57 }
 0x14c   : > { %v7424_v58 = vpop.f32.mrf.mxu0 }
 0x14d   : > { %8746 = vst [vmem:[#allocation7_spill] sm:$0xff] %v7424_v58 }
 0x14e   : > { %v7426_v59 = vpop.f32.mrf.mxu0 }
 0x14f   : > { %8747 = vst [vmem:[#allocation8_spill] sm:$0xff] %v7426_v59 }
 0x150   : > { %v7428_v60 = vpop.f32.mrf.mxu0 }
 0x151   : > { %8748 = vst [vmem:[#allocation9_spill] sm:$0xff] %v7428_v60 }
 0x152   : > { %v7430_v61 = vpop.f32.mrf.mxu0 }
 0x153   : > { %8749 = vst [vmem:[#allocation10_spill] sm:$0xff] %v7430_v61 }
 0x154   : > { %v7435_v63 = vpop.f32.mrf.mxu0 }
 0x155   : > { %8750 = vst [vmem:[#allocation11_spill] sm:$0xff] %v7435_v63 }
 0x156   : > { %v7437_v0 = vpop.f32.mrf.mxu0 }
 0x157   : > { %8751 = vst [vmem:[#allocation12_spill] sm:$0xff] %v7437_v0 }
 0x158   : > { %v7439_v1 = vpop.f32.mrf.mxu0 }
 0x159   : > { %8752 = vst [vmem:[#allocation13_spill] sm:$0xff] %v7439_v1 }
 0x15a   : > { %v7441_v2 = vpop.f32.mrf.mxu0 }
 0x15b   : > { %8753 = vst [vmem:[#allocation14_spill] sm:$0xff] %v7441_v2 }
 0x15c   : > { %v6546_v3 = vpop.f32.mrf.mxu0 }
 0x15e   : > { %v2391_v48 = vpop.f32.mrf.mxu0 }
 0x15f   : > { %2510 = vxpose.xlu0.b32.start [1/4] (short) (narrow) %v2391_v48, 16 }
 0x160   : > { %v6549_v60 = vpop.f32.mrf.mxu0 }
 0x162   : > { %v2401_v61 = vpop.f32.mrf.mxu0 }
 0x163   : > { %2511 = vxpose.xlu0.b32.cont [2/4] (short) (narrow) %v6546_v3, 16 }
 0x164   : > { %v6552_v63 = vpop.f32.mrf.mxu0 }
 0x166   : > { %v2411_v62 = vpop.f32.mrf.mxu0 }
 0x167   : > { %2512 = vxpose.xlu0.b32.cont [3/4] (short) (narrow) %v2401_v61, 16  ;;  %2542 = vxpose.xlu1.b32.start [1/4] (short) (narrow) %v2411_v62, 16 }
 0x168   : > { %v6555_v0 = vpop.f32.mrf.mxu0 }
 0x16a   : > { %v2421_v1 = vpop.f32.mrf.mxu0 }
 0x16b   : > { %2513 = vxpose.xlu0.b32.end [4/4] (short) (narrow) %v6549_v60, 16  ;;  %2543 = vxpose.xlu1.b32.cont [2/4] (short) (narrow) %v6552_v63, 16 }
 0x16c   : > { %v6558_v2 = vpop.f32.mrf.mxu0 }
 0x16e   : > { %v2431_v58 = vpop.f32.mrf.mxu0 }
 0x16f   : > { %2544 = vxpose.xlu1.b32.cont [3/4] (short) (narrow) %v2421_v1, 16  ;;  %2574 = vxpose.xlu0.b32.start [1/4] (short) (narrow) %v2431_v58, 16  ;;  %v6896_v1 = vmov 0.0  }
 0x170   : > { %v6561_v48 = vpop.f32.mrf.mxu0  ;;  %6393 = vmatprep.subr.mxu1 %v6896_v1  ;;  %6655 = vmatprep.subr.mxu0 %v6896_v1 }
 0x171   : > { %6401 = vmatprep.mubr.msk.f32.mxu1 %vm6897_vm1, %v6896_v1 }
 0x172   : > { %v2441_v56 = vpop.f32.mrf.mxu0 }
 0x173   : > { %2545 = vxpose.xlu1.b32.end [4/4] (short) (narrow) %v6555_v0, 16  ;;  %2575 = vxpose.xlu0.b32.cont [2/4] (short) (narrow) %v6558_v2, 16  ;;  %v579_v0 = vld [vmem:[%s8729_s2 + $0x8] sm:$0xff] }
 0x174   : > { %v6564_v59 = vpop.f32.mrf.mxu0 }
 0x176   : > { %v2451_v55 = vpop.f32.mrf.mxu0 }
 0x177   : > { %2576 = vxpose.xlu0.b32.cont [3/4] (short) (narrow) %v2441_v56, 16  ;;  %2606 = vxpose.xlu1.b32.start [1/4] (short) (narrow) %v2451_v55, 16  ;;  %v581_v56 = vld [vmem:[%s8729_s2 + $0x18] sm:$0xff] }
 0x178   : > { %v6567_v3 = vpop.f32.mrf.mxu0  ;;  %6394 = vmatpush3.msra.mxu1 %v581_v56 }
 0x179   : > { %6395 = vmatprep.subr.mxu1 %v6896_v1 }
 0x17a   : > { %v2461_v57 = vpop.f32.mrf.mxu0 }
 0x17b   : > { %2577 = vxpose.xlu0.b32.end [4/4] (short) (narrow) %v6561_v48, 16  ;;  %2607 = vxpose.xlu1.b32.cont [2/4] (short) (narrow) %v6564_v59, 16  ;;  %v578_v48 = vld [vmem:[%s8729_s2] sm:$0xff] }
 0x17c   : > { %v6570_v61 = vpop.f32.mrf.mxu0 }
 0x17e   : > { %v2471_v62 = vpop.f32.mrf.mxu0 }
 0x17f   : > { %2608 = vxpose.xlu1.b32.cont [3/4] (short) (narrow) %v2461_v57, 16  ;;  %2638 = vxpose.xlu0.b32.start [1/4] (short) (narrow) %v2471_v62, 16  ;;  %v580_v57 = vld [vmem:[%s8729_s2 + $0x10] sm:$0xff] }
 0x180   : > { %v6573_v60 = vpop.f32.mrf.mxu0  ;;  %6396 = vmatpush3.msra.mxu1 %v580_v57 }
 0x181   : > { %6397 = vmatprep.subr.mxu1 %v6896_v1 }
 0x182   : > { %v2481_v63 = vpop.f32.mrf.mxu0  ;;  %6398 = vmatpush3.msra.mxu1 %v579_v0 }
 0x183   : > { %2609 = vxpose.xlu1.b32.end [4/4] (short) (narrow) %v6567_v3, 16  ;;  %2639 = vxpose.xlu0.b32.cont [2/4] (short) (narrow) %v6570_v61, 16 }
 0x184   : > { %v6576_v58 = vpop.f32.mrf.mxu0  ;;  %6399 = vmatprep.subr.mxu1 %v6896_v1 }
 0x185   : > { %6400 = vmatpush3.msra.mxu1 %v578_v48 }
 0x186   : > { %v2491_v59 = vpop.f32.mrf.mxu0 }
 0x187   : > { %2640 = vxpose.xlu0.b32.cont [3/4] (short) (narrow) %v2481_v63, 16  ;;  %2670 = vxpose.xlu1.b32.start [1/4] (short) (narrow) %v2491_v59, 16 }
 0x188   : > { %v6579_v2 = vpop.f32.mrf.mxu0 }
 0x18a   : > { %v2501_v55 = vpop.f32.mrf.mxu0 }
 0x18b   : > { %2641 = vxpose.xlu0.b32.end [4/4] (short) (narrow) %v6573_v60, 16  ;;  %2671 = vxpose.xlu1.b32.cont [2/4] (short) (narrow) %v6576_v58, 16 }
 0x18f   : > { %1164 = vxpose.xlu0.b32.start [1/4] (short) (narrow) %v7316_v5, 24  ;;  %2672 = vxpose.xlu1.b32.cont [3/4] (short) (narrow) %v2501_v55, 16 }
 0x193   : > { %1165 = vxpose.xlu0.b32.cont [2/4] (short) (narrow) %v7314_v4, 24  ;;  %2673 = vxpose.xlu1.b32.end [4/4] (short) (narrow) %v6579_v2, 16 }
 0x197   : > { %1166 = vxpose.xlu0.b32.cont [3/4] (short) (narrow) %v7320_v7, 24  ;;  %1196 = vxpose.xlu1.b32.start [1/4] (short) (narrow) %v7324_v9, 24 }
 0x19b   : > { %1167 = vxpose.xlu0.b32.end [4/4] (short) (narrow) %v7318_v6, 24  ;;  %1197 = vxpose.xlu1.b32.cont [2/4] (short) (narrow) %v7322_v8, 24 }
 0x19f   : > { %1228 = vxpose.xlu0.b32.start [1/4] (short) (narrow) %v7332_v13, 24  ;;  %1198 = vxpose.xlu1.b32.cont [3/4] (short) (narrow) %v7328_v11, 24  ;;  %v8755_v13 = vld [vmem:[#allocation8_spill] sm:$0xff] }
 0x1a3   : > { %1229 = vxpose.xlu0.b32.cont [2/4] (short) (narrow) %v7330_v12, 24  ;;  %1199 = vxpose.xlu1.b32.end [4/4] (short) (narrow) %v7326_v10, 24  ;;  %v8754_v12 = vld [vmem:[#allocation6_spill] sm:$0xff] }
 0x1a7   : > { %1230 = vxpose.xlu0.b32.cont [3/4] (short) (narrow) %v7336_v15, 24  ;;  %1260 = vxpose.xlu1.b32.start [1/4] (short) (narrow) %v7340_v17, 24  ;;  %v8758_v17 = vld [vmem:[#allocation12_spill] sm:$0xff] }
 0x1ab   : > { %1231 = vxpose.xlu0.b32.end [4/4] (short) (narrow) %v7334_v14, 24  ;;  %1261 = vxpose.xlu1.b32.cont [2/4] (short) (narrow) %v7338_v16, 24  ;;  %v8756_v14 = vld [vmem:[#allocation5_spill] sm:$0xff]  ;;  %v8757_v16 = vld [vmem:[#allocation7_spill] sm:$0xff] }
 0x1af   : > { %1292 = vxpose.xlu0.b32.start [1/4] (short) (narrow) %v7348_v21, 24  ;;  %1262 = vxpose.xlu1.b32.cont [3/4] (short) (narrow) %v7344_v19, 24  ;;  %v8759_v19 = vld [vmem:[#allocation10_spill] sm:$0xff]  ;;  %v8760_v21 = vld [vmem:[#allocation11_spill] sm:$0xff] }
 0x1b3   : > { %1293 = vxpose.xlu0.b32.cont [2/4] (short) (narrow) %v7346_v20, 24  ;;  %1263 = vxpose.xlu1.b32.end [4/4] (short) (narrow) %v7342_v18, 24  ;;  %v3058_v20 = vld [vmem:[%s8732_s5 + $0x8] sm:$0xff] }
 0x1b4   : > { %6606 = vmatprep.subr.mxu1 %v3058_v20 }
 0x1b7   : > { %1294 = vxpose.xlu0.b32.cont [3/4] (short) (narrow) %v7352_v23, 24  ;;  %1324 = vxpose.xlu1.b32.start [1/4] (short) (narrow) %v7356_v25, 24 }
 0x1bb   : > { %1295 = vxpose.xlu0.b32.end [4/4] (short) (narrow) %v7350_v22, 24  ;;  %1325 = vxpose.xlu1.b32.cont [2/4] (short) (narrow) %v7354_v24, 24  ;;  %v8761_v22 = vld [vmem:[#allocation9_spill] sm:$0xff]  ;;  %v8762_v24 = vld [vmem:[#allocation14_spill] sm:$0xff] }
 0x1bf   : > { %1356 = vxpose.xlu0.b32.start [1/4] (short) (narrow) %v7364_v29, 24  ;;  %1326 = vxpose.xlu1.b32.cont [3/4] (short) (narrow) %v7360_v27, 24 }
 0x1c3   : > { %1357 = vxpose.xlu0.b32.cont [2/4] (short) (narrow) %v7362_v28, 24  ;;  %1327 = vxpose.xlu1.b32.end [4/4] (short) (narrow) %v7358_v26, 24  ;;  %v8763_v26 = vld [vmem:[#allocation13_spill] sm:$0xff] }
 0x1c7   : > { %1358 = vxpose.xlu0.b32.cont [3/4] (short) (narrow) %v7368_v31, 24  ;;  %1388 = vxpose.xlu1.b32.start [1/4] (short) (narrow) %v7372_v33, 24 }
 0x1cb   : > { %1359 = vxpose.xlu0.b32.end [4/4] (short) (narrow) %v7366_v30, 24  ;;  %1389 = vxpose.xlu1.b32.cont [2/4] (short) (narrow) %v7370_v32, 24 }
 0x1cf   : > { %1420 = vxpose.xlu0.b32.start [1/4] (short) (narrow) %v7380_v37, 24  ;;  %1390 = vxpose.xlu1.b32.cont [3/4] (short) (narrow) %v7376_v35, 24 }
 0x1d3   : > { %1421 = vxpose.xlu0.b32.cont [2/4] (short) (narrow) %v7378_v36, 24  ;;  %1391 = vxpose.xlu1.b32.end [4/4] (short) (narrow) %v7374_v34, 24 }
 0x1d7   : > { %1422 = vxpose.xlu0.b32.cont [3/4] (short) (narrow) %v7384_v39, 24  ;;  %1452 = vxpose.xlu1.b32.start [1/4] (short) (narrow) %v7388_v41, 24 }
 0x1db   : > { %1423 = vxpose.xlu0.b32.end [4/4] (short) (narrow) %v7382_v38, 24  ;;  %1453 = vxpose.xlu1.b32.cont [2/4] (short) (narrow) %v7386_v40, 24  ;;  %v2526_v4 = vpop.trf.xlu0 }
 0x1dc   : > { %6588 = vmatprep.mubr.msk.f32.mxu0 %vm618_vm0, %v2526_v4 }
 0x1df   : > { %1484 = vxpose.xlu0.b32.start [1/4] (short) (narrow) %v7396_v45, 24  ;;  %1454 = vxpose.xlu1.b32.cont [3/4] (short) (narrow) %v7392_v43, 24  ;;  %v2527_v5 = vpop.trf.xlu0 }
 0x1e0   : > { %6589 = vmatmul.mubr.msk.f32.vlgmr.msra.gmra.mxu0 %vm618_vm0, %v2527_v5 }
 0x1e3   : > { %1485 = vxpose.xlu0.b32.cont [2/4] (short) (narrow) %v7394_v44, 24  ;;  %1455 = vxpose.xlu1.b32.end [4/4] (short) (narrow) %v7390_v42, 24  ;;  %v2558_v6 = vpop.trf.xlu1 }
 0x1e4   : > { %6591 = vmatprep.mubr.msk.f32.mxu0 %vm618_vm0, %v2558_v6 }
 0x1e7   : > { %1486 = vxpose.xlu0.b32.cont [3/4] (short) (narrow) %v7400_v47, 24  ;;  %1516 = vxpose.xlu1.b32.start [1/4] (short) (narrow) %v7407_v50, 24  ;;  %v2559_v7 = vpop.trf.xlu1  ;;  %v3057_v50 = vld [vmem:[%s8732_s5] sm:$0xff] }
 0x1e8   : > { %6592 = vmatmul.mubr.msk.f32.gmra.mxu0 %vm618_vm0, %v2559_v7 }
 0x1eb   : > { %1487 = vxpose.xlu0.b32.end [4/4] (short) (narrow) %v7398_v46, 24  ;;  %1517 = vxpose.xlu1.b32.cont [2/4] (short) (narrow) %v7405_v49, 24  ;;  %v2590_v8 = vpop.trf.xlu0 }
 0x1ec   : > { %6594 = vmatprep.mubr.msk.f32.mxu0 %vm618_vm0, %v2590_v8 }
 0x1ef   : > { %1548 = vxpose.xlu0.b32.start [1/4] (short) (narrow) %v7415_v54, 24  ;;  %1518 = vxpose.xlu1.b32.cont [3/4] (short) (narrow) %v7411_v52, 24  ;;  %v2591_v9 = vpop.trf.xlu0 }
 0x1f0   : > { %6595 = vmatmul.mubr.msk.f32.gmra.mxu0 %vm618_vm0, %v2591_v9 }
 0x1f3   : > { %v2622_v10 = vpop.trf.xlu1  ;;  %1549 = vxpose.xlu0.b32.cont [2/4] (short) (narrow) %v7413_v53, 24  ;;  %1519 = vxpose.xlu1.b32.end [4/4] (short) (narrow) %v7409_v51, 24 }
 0x1f4   : > { %6597 = vmatprep.mubr.msk.f32.mxu0 %vm618_vm0, %v2622_v10 }
 0x1f7   : > { %v2623_v11 = vpop.trf.xlu1  ;;  %1550 = vxpose.xlu0.b32.cont [3/4] (short) (narrow) %v8754_v12, 24  ;;  %1580 = vxpose.xlu1.b32.start [1/4] (short) (narrow) %v8755_v13, 24 }
 0x1f8   : > { %6598 = vmatmul.mubr.msk.f32.gmra.mxu0 %vm618_vm0, %v2623_v11 }
 0x1fb   : > { %1551 = vxpose.xlu0.b32.end [4/4] (short) (narrow) %v8756_v14, 24  ;;  %v2654_v15 = vpop.trf.xlu0  ;;  %1581 = vxpose.xlu1.b32.cont [2/4] (short) (narrow) %v8757_v16, 24 }
 0x1fc   : > { %6600 = vmatprep.mubr.msk.f32.mxu0 %vm618_vm0, %v2654_v15  ;;  %v7677_v15 = vld [vmem:[%s8734_s7 + $0x8] sm:$0xff] }
 0x1ff   : > { %1612 = vxpose.xlu0.b32.start [1/4] (short) (narrow) %v8758_v17, 24  ;;  %v2655_v18 = vpop.trf.xlu0  ;;  %1582 = vxpose.xlu1.b32.cont [3/4] (short) (narrow) %v8759_v19, 24 }
 0x200   : > { %6601 = vmatmul.mubr.msk.f32.gmra.mxu0 %vm618_vm0, %v2655_v18 }
 0x203   : > { %1613 = vxpose.xlu0.b32.cont [2/4] (short) (narrow) %v8760_v21, 24  ;;  %1583 = vxpose.xlu1.b32.end [4/4] (short) (narrow) %v8761_v22, 24  ;;  %v2686_v23 = vpop.trf.xlu1 }
 0x204   : > { %6603 = vmatprep.mubr.msk.f32.mxu0 %vm618_vm0, %v2686_v23 }
 0x207   : > { %1614 = vxpose.xlu0.b32.cont [3/4] (short) (narrow) %v8762_v24, 24  ;;  %v2687_v25 = vpop.trf.xlu1 }
 0x208   : > { %6604 = vmatmul.mubr.msk.f32.gmra.mxu0 %vm618_vm0, %v2687_v25 }
 0x209   : > { %6659 = vmatprep.mubr.msk.f32.mxu0 %vm6897_vm1, %v6896_v1 }
 0x20b   : > { %1615 = vxpose.xlu0.b32.end [4/4] (short) (narrow) %v8763_v26, 24  ;;  %v1180_v27 = vpop.trf.xlu0 }
 0x20c   : > { %6402 = vmatmul.mubr.msk.f32.vlgmr.msra.gmra.mxu1 %vm618_vm0, %v1180_v27 }
 0x20d   : > { %6404 = vmatprep.mubr.msk.f32.mxu1 %vm6897_vm1, %v6896_v1  ;;  %6607 = vmatpush3.msra.mxu1 %v3058_v20 }
 0x20e   : > { %6608 = vmatprep.subr.mxu1 %v3057_v50 }
 0x20f   : > { %v1181_v28 = vpop.trf.xlu0  ;;  %6609 = vmatpush3.msra.mxu1 %v3057_v50 }
 0x210   : > { %6405 = vmatmul.mubr.msk.f32.gmra.mxu1 %vm618_vm0, %v1181_v28  ;;  %6704 = vmatprep.subr.mxu1 %v7677_v15 }
 0x211   : > { %6407 = vmatprep.mubr.msk.f32.mxu1 %vm6897_vm1, %v6896_v1 }
 0x213   : > { %v1182_v29 = vpop.trf.xlu0  ;;  %v1212_v30 = vpop.trf.xlu1 }
 0x214   : > { %6408 = vmatmul.mubr.msk.f32.gmra.mxu1 %vm618_vm0, %v1182_v29 }
 0x215   : > { %6410 = vmatprep.mubr.msk.f32.mxu1 %vm6897_vm1, %v6896_v1 }
 0x217   : > { %v1213_v31 = vpop.trf.xlu1 }
 0x218   : > { %6411 = vmatmul.mubr.msk.f32.gmra.mxu1 %vm618_vm0, %v1212_v30 }
 0x219   : > { %6413 = vmatprep.mubr.msk.f32.mxu1 %vm6897_vm1, %v6896_v1 }
 0x21b   : > { %v1214_v32 = vpop.trf.xlu1  ;;  %v1244_v33 = vpop.trf.xlu0 }
 0x21c   : > { %6414 = vmatmul.mubr.msk.f32.gmra.mxu1 %vm618_vm0, %v1213_v31 }
 0x21d   : > { %6416 = vmatprep.mubr.msk.f32.mxu1 %vm6897_vm1, %v6896_v1 }
 0x21f   : > { %v1245_v34 = vpop.trf.xlu0 }
 0x220   : > { %6417 = vmatmul.mubr.msk.f32.gmra.mxu1 %vm618_vm0, %v1214_v32 }
 0x221   : > { %6419 = vmatprep.mubr.msk.f32.mxu1 %vm6897_vm1, %v6896_v1 }
 0x223   : > { %v1246_v35 = vpop.trf.xlu0  ;;  %v1276_v36 = vpop.trf.xlu1 }
 0x224   : > { %6420 = vmatmul.mubr.msk.f32.gmra.mxu1 %vm618_vm0, %v1244_v33 }
 0x225   : > { %6422 = vmatprep.mubr.msk.f32.mxu1 %vm6897_vm1, %v6896_v1 }
 0x227   : > { %v1277_v37 = vpop.trf.xlu1 }
 0x228   : > { %6423 = vmatmul.mubr.msk.f32.gmra.mxu1 %vm618_vm0, %v1245_v34 }
 0x229   : > { %6425 = vmatprep.mubr.msk.f32.mxu1 %vm6897_vm1, %v6896_v1 }
 0x22b   : > { %v1278_v38 = vpop.trf.xlu1  ;;  %v1308_v39 = vpop.trf.xlu0 }
 0x22c   : > { %6426 = vmatmul.mubr.msk.f32.gmra.mxu1 %vm618_vm0, %v1246_v35 }
 0x22d   : > { %6428 = vmatprep.mubr.msk.f32.mxu1 %vm6897_vm1, %v6896_v1 }
 0x22f   : > { %v1309_v40 = vpop.trf.xlu0 }
 0x230   : > { %6429 = vmatmul.mubr.msk.f32.gmra.mxu1 %vm618_vm0, %v1276_v36 }
 0x231   : > { %6431 = vmatprep.mubr.msk.f32.mxu1 %vm6897_vm1, %v6896_v1 }
 0x233   : > { %v1310_v41 = vpop.trf.xlu0  ;;  %v1340_v42 = vpop.trf.xlu1 }
 0x234   : > { %6432 = vmatmul.mubr.msk.f32.gmra.mxu1 %vm618_vm0, %v1277_v37 }
 0x235   : > { %6434 = vmatprep.mubr.msk.f32.mxu1 %vm6897_vm1, %v6896_v1 }
 0x237   : > { %v1341_v43 = vpop.trf.xlu1 }
 0x238   : > { %6435 = vmatmul.mubr.msk.f32.gmra.mxu1 %vm618_vm0, %v1278_v38 }
 0x239   : > { %6437 = vmatprep.mubr.msk.f32.mxu1 %vm6897_vm1, %v6896_v1 }
 0x23b   : > { %v1342_v44 = vpop.trf.xlu1  ;;  %v1372_v45 = vpop.trf.xlu0 }
 0x23c   : > { %6438 = vmatmul.mubr.msk.f32.gmra.mxu1 %vm618_vm0, %v1308_v39 }
 0x23d   : > { %6440 = vmatprep.mubr.msk.f32.mxu1 %vm6897_vm1, %v6896_v1 }
 0x23f   : > { %v1373_v46 = vpop.trf.xlu0 }
 0x240   : > { %6441 = vmatmul.mubr.msk.f32.gmra.mxu1 %vm618_vm0, %v1309_v40 }
 0x241   : > { %6443 = vmatprep.mubr.msk.f32.mxu1 %vm6897_vm1, %v6896_v1 }
 0x243   : > { %v1374_v47 = vpop.trf.xlu0  ;;  %v1404_v49 = vpop.trf.xlu1 }
 0x244   : > { %6444 = vmatmul.mubr.msk.f32.gmra.mxu1 %vm618_vm0, %v1310_v41 }
 0x245   : > { %6446 = vmatprep.mubr.msk.f32.mxu1 %vm6897_vm1, %v6896_v1 }
 0x247   : > { %v1405_v51 = vpop.trf.xlu1 }
 0x248   : > { %6447 = vmatmul.mubr.msk.f32.gmra.mxu1 %vm618_vm0, %v1340_v42 }
 0x249   : > { %6449 = vmatprep.mubr.msk.f32.mxu1 %vm6897_vm1, %v6896_v1 }
 0x24b   : > { %v1406_v52 = vpop.trf.xlu1  ;;  %v1436_v53 = vpop.trf.xlu0 }
 0x24c   : > { %6450 = vmatmul.mubr.msk.f32.gmra.mxu1 %vm618_vm0, %v1341_v43 }
 0x24d   : > { %6452 = vmatprep.mubr.msk.f32.mxu1 %vm6897_vm1, %v6896_v1 }
 0x24f   : > { %v1437_v54 = vpop.trf.xlu0 }
 0x250   : > { %6453 = vmatmul.mubr.msk.f32.gmra.mxu1 %vm618_vm0, %v1342_v44 }
 0x251   : > { %6455 = vmatprep.mubr.msk.f32.mxu1 %vm6897_vm1, %v6896_v1 }
 0x253   : > { %v1438_v3 = vpop.trf.xlu0  ;;  %v1468_v61 = vpop.trf.xlu1 }
 0x254   : > { %6456 = vmatmul.mubr.msk.f32.gmra.mxu1 %vm618_vm0, %v1372_v45 }
 0x255   : > { %6458 = vmatprep.mubr.msk.f32.mxu1 %vm6897_vm1, %v6896_v1 }
 0x257   : > { %v1469_v62 = vpop.trf.xlu1 }
 0x258   : > { %6459 = vmatmul.mubr.msk.f32.gmra.mxu1 %vm618_vm0, %v1373_v46 }
 0x259   : > { %6461 = vmatprep.mubr.msk.f32.mxu1 %vm6897_vm1, %v6896_v1 }
 0x25b   : > { %v1470_v60 = vpop.trf.xlu1  ;;  %v1500_v63 = vpop.trf.xlu0 }
 0x25c   : > { %6462 = vmatmul.mubr.msk.f32.gmra.mxu1 %vm618_vm0, %v1374_v47 }
 0x25d   : > { %6464 = vmatprep.mubr.msk.f32.mxu1 %vm6897_vm1, %v6896_v1 }
 0x25f   : > { %v1501_v58 = vpop.trf.xlu0 }
 0x260   : > { %6465 = vmatmul.mubr.msk.f32.gmra.mxu1 %vm618_vm0, %v1404_v49 }
 0x261   : > { %6467 = vmatprep.mubr.msk.f32.mxu1 %vm6897_vm1, %v6896_v1 }
 0x263   : > { %v1502_v56 = vpop.trf.xlu0  ;;  %v1532_v57 = vpop.trf.xlu1 }
 0x264   : > { %6468 = vmatmul.mubr.msk.f32.gmra.mxu1 %vm618_vm0, %v1405_v51 }
 0x265   : > { %6470 = vmatprep.mubr.msk.f32.mxu1 %vm6897_vm1, %v6896_v1 }
 0x267   : > { %v1533_v59 = vpop.trf.xlu1 }
 0x268   : > { %6471 = vmatmul.mubr.msk.f32.gmra.mxu1 %vm618_vm0, %v1406_v52 }
 0x269   : > { %6473 = vmatprep.mubr.msk.f32.mxu1 %vm6897_vm1, %v6896_v1 }
 0x26b   : > { %v1534_v0 = vpop.trf.xlu1  ;;  %v1564_v2 = vpop.trf.xlu0 }
 0x26c   : > { %6474 = vmatmul.mubr.msk.f32.gmra.mxu1 %vm618_vm0, %v1436_v53 }
 0x26d   : > { %6476 = vmatprep.mubr.msk.f32.mxu1 %vm6897_vm1, %v6896_v1 }
 0x26f   : > { %v1565_v48 = vpop.trf.xlu0 }
 0x270   : > { %6477 = vmatmul.mubr.msk.f32.gmra.mxu1 %vm618_vm0, %v1437_v54 }
 0x271   : > { %6479 = vmatprep.mubr.msk.f32.mxu1 %vm6897_vm1, %v6896_v1 }
 0x273   : > { %v1566_v4 = vpop.trf.xlu0  ;;  %v1596_v5 = vpop.trf.xlu1 }
 0x274   : > { %6480 = vmatmul.mubr.msk.f32.gmra.mxu1 %vm618_vm0, %v1438_v3 }
 0x275   : > { %6482 = vmatprep.mubr.msk.f32.mxu1 %vm6897_vm1, %v6896_v1 }
 0x277   : > { %v1597_v7 = vpop.trf.xlu1 }
 0x278   : > { %6483 = vmatmul.mubr.msk.f32.gmra.mxu1 %vm618_vm0, %v1468_v61 }
 0x279   : > { %6485 = vmatprep.mubr.msk.f32.mxu1 %vm6897_vm1, %v6896_v1 }
 0x27b   : > { %v1598_v10 = vpop.trf.xlu1  ;;  %v1628_v11 = vpop.trf.xlu0 }
 0x27c   : > { %6486 = vmatmul.mubr.msk.f32.gmra.mxu1 %vm618_vm0, %v1469_v62 }
 0x27d   : > { %6488 = vmatprep.mubr.msk.f32.mxu1 %vm6897_vm1, %v6896_v1 }
 0x27f   : > { %v1629_v14 = vpop.trf.xlu0 }
 0x280   : > { %6489 = vmatmul.mubr.msk.f32.gmra.mxu1 %vm618_vm0, %v1470_v60 }
 0x281   : > { %6491 = vmatprep.mubr.msk.f32.mxu1 %vm6897_vm1, %v6896_v1 }
 0x283   : > { %v1630_v17 = vpop.trf.xlu0 }
 0x284   : > { %6492 = vmatmul.mubr.msk.f32.gmra.mxu1 %vm618_vm0, %v1500_v63 }
 0x285   : > { %6494 = vmatprep.mubr.msk.f32.mxu1 %vm6897_vm1, %v6896_v1 }
 0x288   : > { %6495 = vmatmul.mubr.msk.f32.gmra.mxu1 %vm618_vm0, %v1501_v58 }
 0x289   : > { %6497 = vmatprep.mubr.msk.f32.mxu1 %vm6897_vm1, %v6896_v1 }
 0x28c   : > { %6498 = vmatmul.mubr.msk.f32.gmra.mxu1 %vm618_vm0, %v1502_v56 }
 0x28d   : > { %6500 = vmatprep.mubr.msk.f32.mxu1 %vm6897_vm1, %v6896_v1 }
 0x290   : > { %6501 = vmatmul.mubr.msk.f32.gmra.mxu1 %vm618_vm0, %v1532_v57 }
 0x291   : > { %6503 = vmatprep.mubr.msk.f32.mxu1 %vm6897_vm1, %v6896_v1 }
 0x294   : > { %6504 = vmatmul.mubr.msk.f32.gmra.mxu1 %vm618_vm0, %v1533_v59 }
 0x295   : > { %6506 = vmatprep.mubr.msk.f32.mxu1 %vm6897_vm1, %v6896_v1 }
 0x298   : > { %6507 = vmatmul.mubr.msk.f32.gmra.mxu1 %vm618_vm0, %v1534_v0 }
 0x299   : > { %6509 = vmatprep.mubr.msk.f32.mxu1 %vm6897_vm1, %v6896_v1 }
 0x29c   : > { %6510 = vmatmul.mubr.msk.f32.gmra.mxu1 %vm618_vm0, %v1564_v2 }
 0x29d   : > { %6512 = vmatprep.mubr.msk.f32.mxu1 %vm6897_vm1, %v6896_v1 }
 0x2a0   : > { %6513 = vmatmul.mubr.msk.f32.gmra.mxu1 %vm618_vm0, %v1565_v48  ;;  %v6590_v55 = vpop.f32.mrf.mxu0 }
 0x2a1   : > { %6515 = vmatprep.mubr.msk.f32.mxu1 %vm6897_vm1, %v6896_v1 }
 0x2a2   : > { %v2804_v6 = vpop.f32.mrf.mxu0 }
 0x2a3   : > { %2863 = vxpose.xlu1.b32.start [1/2] (short) (narrow) %v2804_v6, 16 }
 0x2a4   : > { %6516 = vmatmul.mubr.msk.f32.gmra.mxu1 %vm618_vm0, %v1566_v4 }
 0x2a5   : > { %6518 = vmatprep.mubr.msk.f32.mxu1 %vm6897_vm1, %v6896_v1 }
 0x2a7   : > { %2864 = vxpose.xlu1.b32.end [2/2] (short) (narrow) %v6590_v55, 16 }
 0x2a8   : > { %6519 = vmatmul.mubr.msk.f32.gmra.mxu1 %vm618_vm0, %v1596_v5  ;;  %v6593_v8 = vpop.f32.mrf.mxu0 }
 0x2a9   : > { %6521 = vmatprep.mubr.msk.f32.mxu1 %vm6897_vm1, %v6896_v1 }
 0x2aa   : > { %v2814_v9 = vpop.f32.mrf.mxu0 }
 0x2ab   : > { %2895 = vxpose.xlu1.b32.start [1/2] (short) (narrow) %v2814_v9, 16 }
 0x2ac   : > { %6522 = vmatmul.mubr.msk.f32.gmra.mxu1 %vm618_vm0, %v1597_v7 }
 0x2ad   : > { %6524 = vmatprep.mubr.msk.f32.mxu1 %vm6897_vm1, %v6896_v1 }
 0x2af   : > { %2896 = vxpose.xlu1.b32.end [2/2] (short) (narrow) %v6593_v8, 16 }
 0x2b0   : > { %6525 = vmatmul.mubr.msk.f32.gmra.mxu1 %vm618_vm0, %v1598_v10  ;;  %v6596_v12 = vpop.f32.mrf.mxu0 }
 0x2b1   : > { %6527 = vmatprep.mubr.msk.f32.mxu1 %vm6897_vm1, %v6896_v1 }
 0x2b2   : > { %v2824_v13 = vpop.f32.mrf.mxu0 }
 0x2b3   : > { %2927 = vxpose.xlu0.b32.start [1/2] (short) (narrow) %v2824_v13, 16 }
 0x2b4   : > { %6528 = vmatmul.mubr.msk.f32.gmra.mxu1 %vm618_vm0, %v1628_v11 }
 0x2b5   : > { %6530 = vmatprep.mubr.msk.f32.mxu1 %vm6897_vm1, %v6896_v1 }
 0x2b7   : > { %2928 = vxpose.xlu0.b32.end [2/2] (short) (narrow) %v6596_v12, 16 }
 0x2b8   : > { %6531 = vmatmul.mubr.msk.f32.gmra.mxu1 %vm618_vm0, %v1629_v14  ;;  %v6599_v16 = vpop.f32.mrf.mxu0 }
 0x2b9   : > { %6533 = vmatprep.mubr.msk.f32.mxu1 %vm6897_vm1, %v6896_v1 }
 0x2ba   : > { %v2834_v18 = vpop.f32.mrf.mxu0 }
 0x2bb   : > { %2959 = vxpose.xlu1.b32.start [1/2] (short) (narrow) %v2834_v18, 16 }
 0x2bc   : > { %6534 = vmatmul.mubr.msk.f32.gmra.mxu1 %vm618_vm0, %v1630_v17 }
 0x2bf   : > { %2960 = vxpose.xlu1.b32.end [2/2] (short) (narrow) %v6599_v16, 16 }
 0x2c0   : > { %v6602_v19 = vpop.f32.mrf.mxu0 }
 0x2c2   : > { %v2844_v20 = vpop.f32.mrf.mxu0 }
 0x2c3   : > { %2991 = vxpose.xlu0.b32.start [1/2] (short) (narrow) %v2844_v20, 16 }
 0x2c7   : > { %2992 = vxpose.xlu0.b32.end [2/2] (short) (narrow) %v6602_v19, 16 }
 0x2c8   : > { %v6605_v21 = vpop.f32.mrf.mxu0 }
 0x2ca   : > { %v2854_v22 = vpop.f32.mrf.mxu0 }
 0x2cb   : > { %3023 = vxpose.xlu1.b32.start [1/2] (short) (narrow) %v2854_v22, 16 }
 0x2cc   : > { %v1845_v23 = vpop.f32.mrf.mxu1 }
 0x2cd   : > { %v7684_v41 = vmul.f32 %v1845_v23, %v1845_v23 }
 0x2ce   : > { %v6403_v24 = vpop.f32.mrf.mxu1 }
 0x2cf   : > { %3024 = vxpose.xlu1.b32.end [2/2] (short) (narrow) %v6605_v21, 16 }
 0x2d0   : > { %v1850_v25 = vpop.f32.mrf.mxu1 }
 0x2d1   : > { %v7690_v46 = vmul.f32 %v1850_v25, %v1850_v25 }
 0x2d2   : > { %v6406_v26 = vpop.f32.mrf.mxu1 }
 0x2d4   : > { %v1855_v27 = vpop.f32.mrf.mxu1 }
 0x2d5   : > { %v7700_v53 = vmul.f32 %v1855_v27, %v1855_v27 }
 0x2d6   : > { %v6409_v28 = vpop.f32.mrf.mxu1 }
 0x2d8   : > { %v1860_v29 = vpop.f32.mrf.mxu1 }
 0x2d9   : > { %v7710_v63 = vmul.f32 %v1860_v29, %v1860_v29 }
 0x2da   : > { %v6412_v30 = vpop.f32.mrf.mxu1 }
 0x2dc   : > { %v1865_v31 = vpop.f32.mrf.mxu1 }
 0x2dd   : > { %v7720_v2 = vmul.f32 %v1865_v31, %v1865_v31 }
 0x2de   : > { %v6415_v32 = vpop.f32.mrf.mxu1 }
 0x2e0   : > { %v1870_v33 = vpop.f32.mrf.mxu1 }
 0x2e1   : > { %v7730_v7 = vmul.f32 %v1870_v33, %v1870_v33 }
 0x2e2   : > { %v6418_v34 = vpop.f32.mrf.mxu1 }
 0x2e4   : > { %v1875_v35 = vpop.f32.mrf.mxu1 }
 0x2e5   : > { %v7740_v13 = vmul.f32 %v1875_v35, %v1875_v35 }
 0x2e6   : > { %v6421_v36 = vpop.f32.mrf.mxu1 }
 0x2e8   : > { %v1880_v37 = vpop.f32.mrf.mxu1 }
 0x2e9   : > { %v7750_v20 = vmul.f32 %v1880_v37, %v1880_v37 }
 0x2ea   : > { %v6424_v38 = vpop.f32.mrf.mxu1 }
 0x2ec   : > { %v1885_v39 = vpop.f32.mrf.mxu1 }
 0x2ed   : > { %v7760_v26 = vmul.f32 %v1885_v39, %v1885_v39 }
 0x2ee   : > { %v6427_v40 = vpop.f32.mrf.mxu1 }
 0x2f0   : > { %v1890_v42 = vpop.f32.mrf.mxu1 }
 0x2f1   : > { %v7686_v43 = vmul.f32 %v1890_v42, %v1890_v42  ;;  %v7688_v44 = vmul.f32 %v1890_v42, %v1845_v23 }
 0x2f2   : > { %v6430_v45 = vpop.f32.mrf.mxu1 }
 0x2f3   : > { %v7694_v47 = vadd.f32 %v7686_v43, %v7684_v41 }
 0x2f4   : > { %v1895_v49 = vpop.f32.mrf.mxu1 }
 0x2f5   : > { %v7696_v50 = vmul.f32 %v1895_v49, %v1895_v49  ;;  %v7698_v51 = vmul.f32 %v1895_v49, %v1850_v25 }
 0x2f6   : > { %v6433_v52 = vpop.f32.mrf.mxu1 }
 0x2f7   : > { %v7704_v54 = vadd.f32 %v7696_v50, %v7690_v46 }
 0x2f8   : > { %v1900_v3 = vpop.f32.mrf.mxu1 }
 0x2f9   : > { %v7706_v61 = vmul.f32 %v1900_v3, %v1900_v3  ;;  %v7708_v62 = vmul.f32 %v1900_v3, %v1855_v27 }
 0x2fa   : > { %v6436_v60 = vpop.f32.mrf.mxu1 }
 0x2fb   : > { %v7714_v58 = vadd.f32 %v7706_v61, %v7700_v53 }
 0x2fc   : > { %v1905_v56 = vpop.f32.mrf.mxu1 }
 0x2fd   : > { %v7716_v57 = vmul.f32 %v1905_v56, %v1905_v56  ;;  %v7718_v59 = vmul.f32 %v1905_v56, %v1860_v29 }
 0x2fe   : > { %v6439_v0 = vpop.f32.mrf.mxu1 }
 0x2ff   : > { %v7724_v48 = vadd.f32 %v7716_v57, %v7710_v63 }
 0x300   : > { %v1910_v55 = vpop.f32.mrf.mxu1 }
 0x301   : > { %v7726_v4 = vmul.f32 %v1910_v55, %v1910_v55  ;;  %v7728_v5 = vmul.f32 %v1910_v55, %v1865_v31 }
 0x302   : > { %v6442_v6 = vpop.f32.mrf.mxu1 }
 0x303   : > { %v7734_v8 = vadd.f32 %v7726_v4, %v7720_v2 }
 0x304   : > { %v1915_v9 = vpop.f32.mrf.mxu1 }
 0x305   : > { %v7736_v10 = vmul.f32 %v1915_v9, %v1915_v9  ;;  %v7738_v11 = vmul.f32 %v1915_v9, %v1870_v33 }
 0x306   : > { %v6445_v12 = vpop.f32.mrf.mxu1 }
 0x307   : > { %v7744_v14 = vadd.f32 %v7736_v10, %v7730_v7 }
 0x308   : > { %v1920_v16 = vpop.f32.mrf.mxu1 }
 0x309   : > { %v7746_v17 = vmul.f32 %v1920_v16, %v1920_v16  ;;  %v7748_v18 = vmul.f32 %v1920_v16, %v1875_v35 }
 0x30a   : > { %v6448_v19 = vpop.f32.mrf.mxu1 }
 0x30b   : > { %v7754_v21 = vadd.f32 %v7746_v17, %v7740_v13 }
 0x30c   : > { %v1925_v22 = vpop.f32.mrf.mxu1 }
 0x30d   : > { %v7756_v23 = vmul.f32 %v1925_v22, %v1925_v22  ;;  %v7758_v24 = vmul.f32 %v1925_v22, %v1880_v37 }
 0x30e   : > { %v6451_v25 = vpop.f32.mrf.mxu1 }
 0x30f   : > { %v7764_v27 = vadd.f32 %v7756_v23, %v7750_v20 }
 0x310   : > { %v1930_v28 = vpop.f32.mrf.mxu1 }
 0x311   : > { %v7766_v29 = vmul.f32 %v1930_v28, %v1930_v28  ;;  %v7768_v30 = vmul.f32 %v1930_v28, %v1885_v39 }
 0x312   : > { %v6454_v31 = vpop.f32.mrf.mxu1 }
 0x313   : > { %v7772_v32 = vadd.f32 %v7766_v29, %v7760_v26 }
 0x314   : > { %v1935_v33 = vpop.f32.mrf.mxu1 }
 0x315   : > { %v2096_v34 = vsub.f32 %v1935_v33, %v7684_v41 }
 0x316   : > { %v6457_v35 = vpop.f32.mrf.mxu1 }
 0x318   : > { %v1940_v36 = vpop.f32.mrf.mxu1 }
 0x319   : > { %v2097_v37 = vsub.f32 %v1940_v36, %v7690_v46  ;;  %v4144_v46 = vld [vmem:[%s8734_s7] sm:$0xff] }
 0x31a   : > { %v6460_v38 = vpop.f32.mrf.mxu1 }
 0x31c   : > { %v1945_v40 = vpop.f32.mrf.mxu1 }
 0x31d   : > { %v2098_v42 = vsub.f32 %v1945_v40, %v7700_v53 }
 0x31e   : > { %v6463_v45 = vpop.f32.mrf.mxu1 }
 0x31f   : > { %v7777_v39 = vpop.trf.xlu1 }
 0x320   : > { %v1950_v49 = vpop.f32.mrf.mxu1  ;;  %6610 = vmatprep.mubr.msk.f32.mxu1 %vm3079_vm2, %v7777_v39 }
 0x321   : > { %v2099_v52 = vsub.f32 %v1950_v49, %v7710_v63 }
 0x322   : > { %v6466_v3 = vpop.f32.mrf.mxu1 }
 0x323   : > { %v7782_v41 = vpop.trf.xlu1 }
 0x324   : > { %v1955_v60 = vpop.f32.mrf.mxu1  ;;  %6611 = vmatmul.mubr.msk.f32.vlgmr.msra.gmra.mxu1 %vm3079_vm2, %v7782_v41 }
 0x325   : > { %v2100_v53 = vsub.f32 %v1955_v60, %v7720_v2  ;;  %6705 = vmatpush3.msra.mxu1 %v7677_v15 }
 0x326   : > { %v6469_v56 = vpop.f32.mrf.mxu1  ;;  %6706 = vmatprep.subr.mxu1 %v4144_v46 }
 0x327   : > { %v7791_v0 = vpop.trf.xlu1  ;;  %6707 = vmatpush3.msra.mxu1 %v4144_v46 }
 0x328   : > { %v1960_v63 = vpop.f32.mrf.mxu1  ;;  %6613 = vmatprep.mubr.msk.f32.mxu1 %vm3079_vm2, %v7791_v0 }
 0x329   : > { %v2101_v55 = vsub.f32 %v1960_v63, %v7730_v7 }
 0x32a   : > { %v6472_v6 = vpop.f32.mrf.mxu1 }
 0x32b   : > { %v7796_v9 = vpop.trf.xlu1 }
 0x32c   : > { %v7798_v12 = vpop.f32.mrf.mxu1  ;;  %6614 = vmatmul.mubr.msk.f32.gmra.mxu1 %vm3079_vm2, %v7796_v9 }
 0x32d   : > { %v2102_v15 = vsub.f32 %v7798_v12, %v7740_v13 }
 0x32e   : > { %v6475_v2 = vpop.f32.mrf.mxu1 }
 0x32f   : > { %v7804_v16 = vpop.trf.xlu0 }
 0x330   : > { %v7806_v19 = vpop.f32.mrf.mxu1  ;;  %6616 = vmatprep.mubr.msk.f32.mxu1 %vm3079_vm2, %v7804_v16 }
 0x331   : > { %v2103_v7 = vsub.f32 %v7806_v19, %v7750_v20 }
 0x332   : > { %v6478_v22 = vpop.f32.mrf.mxu1 }
 0x333   : > { %v7812_v25 = vpop.trf.xlu0 }
 0x334   : > { %v7814_v28 = vpop.f32.mrf.mxu1  ;;  %6617 = vmatmul.mubr.msk.f32.gmra.mxu1 %vm3079_vm2, %v7812_v25  ;;  %v3066_v13 = vmul.f32 %v7812_v25, %v7812_v25 }
 0x335   : > { %v2104_v31 = vsub.f32 %v7814_v28, %v7760_v26 }
 0x336   : > { %v6481_v33 = vpop.f32.mrf.mxu1 }
 0x337   : > { %v7820_v35 = vpop.trf.xlu1 }
 0x338   : > { %v1980_v36 = vpop.f32.mrf.mxu1  ;;  %6619 = vmatprep.mubr.msk.f32.mxu1 %vm3079_vm2, %v7820_v35 }
 0x339   : > { %v2105_v38 = vsub.f32 %v1980_v36, %v7686_v43 }
 0x33a   : > { %v6484_v40 = vpop.f32.mrf.mxu1 }
 0x33b   : > { %v2142_v45 = vadd.f32 %v2105_v38, %v2096_v34  ;;  %v7825_v49 = vpop.trf.xlu1 }
 0x33c   : > { %v1985_v3 = vpop.f32.mrf.mxu1  ;;  %6620 = vmatmul.mubr.msk.f32.gmra.mxu1 %vm3079_vm2, %v7825_v49  ;;  %v3068_v19 = vmul.f32 %v7825_v49, %v7825_v49 }
 0x33d   : > { %v2106_v46 = vsub.f32 %v1985_v3, %v7696_v50 }
 0x33e   : > { %v6487_v60 = vpop.f32.mrf.mxu1 }
 0x33f   : > { %v2143_v56 = vadd.f32 %v2106_v46, %v2097_v37  ;;  %v7830_v63 = vpop.trf.xlu0 }
 0x340   : > { %v1990_v6 = vpop.f32.mrf.mxu1  ;;  %6622 = vmatprep.mubr.msk.f32.mxu1 %vm3079_vm2, %v7830_v63 }
 0x341   : > { %v2107_v43 = vsub.f32 %v1990_v6, %v7706_v61  ;;  %v7855_v6 = vstv %s5850_s24  ;;  %s6899_s24 = smov 7  }
 0x342   : > { %v6490_v2 = vpop.f32.mrf.mxu1 }
 0x343   : > { %v2144_v34 = vadd.f32 %v2107_v43, %v2098_v42  ;;  %v7835_v22 = vpop.trf.xlu0  ;;  %v3063_v2 = vmul.f32 %v7791_v0, %v7791_v0 }
 0x344   : > { %v1995_v33 = vpop.f32.mrf.mxu1  ;;  %6623 = vmatmul.mubr.msk.f32.gmra.mxu1 %vm3079_vm2, %v7835_v22 }
 0x345   : > { %v2108_v50 = vsub.f32 %v1995_v33, %v7716_v57  ;;  %v3061_v57 = vmul.f32 %v7777_v39, %v7777_v39 }
 0x346   : > { %v6493_v37 = vpop.f32.mrf.mxu1 }
 0x347   : > { %v2145_v36 = vadd.f32 %v2108_v50, %v2099_v52  ;;  %v7840_v38 = vpop.trf.xlu1  ;;  %v7864_v50 = vstv %s572_s25  ;;  %s8527_s25 = sld [smem:[#allocation2 + $0x9]] }
 0x348   : > { %v2000_v40 = vpop.f32.mrf.mxu1  ;;  %6625 = vmatprep.mubr.msk.f32.mxu1 %vm3079_vm2, %v7840_v38 }
 0x349   : > { %v2109_v61 = vsub.f32 %v2000_v40, %v7726_v4  ;;  %v3062_v4 = vmul.f32 %v7782_v41, %v7782_v41  ;;  %v2154_v26 = vadd.f32 %v2145_v36, %v7855_v6 }
 0x34a   : > { %v6496_v42 = vpop.f32.mrf.mxu1 }
 0x34b   : > { %v7845_v3 = vadd.f32 %v2109_v61, %v2100_v53  ;;  %v7847_v46 = vpop.trf.xlu1  ;;  %v3064_v61 = vmul.f32 %v7796_v9, %v7796_v9  ;;  %v3065_v42 = vmul.f32 %v7804_v16, %v7804_v16 }
 0x34c   : > { %v2005_v60 = vpop.f32.mrf.mxu1  ;;  %6626 = vmatmul.mubr.msk.f32.gmra.mxu1 %vm3079_vm2, %v7847_v46 }
 0x34d   : > { %v2110_v52 = vsub.f32 %v2005_v60, %v7736_v10  ;;  %6628 = vmatprep.mubr.msk.f32.mxu1 %vm3079_vm2, %v3061_v57  ;;  %v2151_v10 = vadd.f32 %v2142_v45, %v7855_v6  ;;  %v2237_v57 = vadd.f32 %v7694_v47, %v7864_v50  ;;  %v3067_v47 = vmul.f32 %v7820_v35, %v7820_v35 }
 0x34e   : > { %v6499_v43 = vpop.f32.mrf.mxu1 }
 0x34f   : > { %v7859_v53 = vadd.f32 %v2110_v52, %v2101_v55  ;;  %6784 = vrcp.f32 %v2151_v10  ;;  %v2153_v43 = vadd.f32 %v2144_v34, %v7855_v6 }
 0x350   : > { %v2010_v33 = vpop.f32.mrf.mxu1  ;;  %6629 = vmatmul.mubr.msk.f32.gmra.mxu1 %vm3079_vm2, %v3062_v4  ;;  %6786 = vrcp.f32 %v2237_v57 }
 0x351   : > { %v2111_v37 = vsub.f32 %v2010_v33, %v7746_v17  ;;  %6631 = vmatprep.mubr.msk.f32.mxu1 %vm3079_vm2, %v3063_v2  ;;  %v2152_v17 = vadd.f32 %v2143_v56, %v7855_v6  ;;  %v2200_v2 = vmul.f32 2.0, %v7688_v44  ;;  %v2239_v33 = vadd.f32 %v7714_v58, %v7864_v50 }
 0x352   : > { %v6502_v40 = vpop.f32.mrf.mxu1 }
 0x353   : > { %v7874_v55 = vadd.f32 %v2111_v37, %v2102_v15  ;;  %v2238_v15 = vadd.f32 %v7704_v54, %v7864_v50  ;;  %6788 = vrcp.f32 %v2152_v17  ;;  %v3069_v54 = vmul.f32 %v7830_v63, %v7830_v63 }
 0x354   : > { %v2015_v45 = vpop.f32.mrf.mxu1  ;;  %6632 = vmatmul.mubr.msk.f32.gmra.mxu1 %vm3079_vm2, %v3064_v61  ;;  %v2240_v37 = vadd.f32 %v7724_v48, %v7864_v50  ;;  %v3071_v61 = vmul.f32 %v7840_v38, %v7840_v38  ;;  %v2210_v58 = vadd.f32 %v7864_v50, %v2200_v2  ;;  %v2155_v48 = vadd.f32 %v7845_v3, %v7855_v6 }
 0x355   : > { %v2112_v60 = vsub.f32 %v2015_v45, %v7756_v23  ;;  %6634 = vmatprep.mubr.msk.f32.mxu1 %vm3079_vm2, %v3065_v42  ;;  %v2178_v23 = vlaneseq  ;;  %6790 = vrcp.f32 %v2238_v15  ;;  %v2201_v42 = vmul.f32 2.0, %v7698_v51 }
 0x356   : > { %v6505_v52 = vpop.f32.mrf.mxu1  ;;  %6792 = vrcp.f32 %v2153_v43  ;;  %v3074_v2 = vmul.f32 %v7825_v49, %v7782_v41 }
 0x357   : > { %v7889_v12 = vadd.f32 %v2112_v60, %v2103_v7  ;;  %6794 = vrcp.f32 %v2239_v33  ;;  %v2202_v52 = vmul.f32 2.0, %v7708_v62 }
 0x358   : > { %v2020_v56 = vpop.f32.mrf.mxu1  ;;  %6635 = vmatmul.mubr.msk.f32.gmra.mxu1 %vm3079_vm2, %v3066_v13  ;;  %6796 = vrcp.f32 %v2154_v26  ;;  %v3072_v13 = vmul.f32 %v7847_v46, %v7847_v46 }
 0x359   : > { %v2113_v4 = vsub.f32 %v2020_v56, %v7766_v29  ;;  %6637 = vmatprep.mubr.msk.f32.mxu1 %vm3079_vm2, %v3067_v47  ;;  %v7910_v29 = vshrl.u32 %v2178_v23, 7  ;;  %6798 = vrcp.f32 %v2240_v37  ;;  %v3073_v56 = vmul.f32 %v7820_v35, %v7777_v39 }
 0x35a   : > { %v6508_v20 = vpop.f32.mrf.mxu1  ;;  %v2157_v37 = vadd.f32 %v7874_v55, %v7855_v6  ;;  %v3076_v55 = vmul.f32 %v7835_v22, %v7796_v9 }
 0x35b   : > { %v7904_v7 = vadd.f32 %v2113_v4, %v2104_v31  ;;  %v3070_v31 = vmul.f32 %v7835_v22, %v7835_v22  ;;  %v7929_v36 = vadd.s32 16, %v7910_v29  ;;  %vm4087_vm5 = vcmp.lt.s32.totalorder %v7910_v29, 6 }
 0x35c   : > { %v2025_v34 = vpop.f32.mrf.mxu1  ;;  %6638 = vmatmul.mubr.msk.f32.gmra.mxu1 %vm3079_vm2, %v3068_v19  ;;  %v6785_v60 = vpop.eup %6784  ;;  %vm5702_vm10 = vcmp.eq.s32.totalorder %v7910_v29, 0  ;;  %vm5707_vm11 = vcmp.eq.s32.totalorder %v7910_v29, 1  ;;  %vm5712_vm12 = vcmp.eq.s32.totalorder %v7910_v29, 2  ;;  %vm5717_vm13 = vcmp.eq.s32.totalorder %v7910_v29, 3 }
 0x35d   : > { %v2114_v10 = vsub.f32 %v2025_v34, %v7688_v44  ;;  %6640 = vmatprep.mubr.msk.f32.mxu1 %vm3079_vm2, %v3069_v54  ;;  %v2241_v44 = vadd.f32 %v7734_v8, %v7864_v50  ;;  %v2242_v8 = vadd.f32 %v7744_v14, %v7864_v50  ;;  %vm2184_vm4 = vcmp.lt.s32.totalorder %v7929_v36, 22  ;;  %v6787_v14 = vpop.eup %6786  ;;  %v3059_v36 = vld [vmem:[%s8733_s6] sm:$0xff] }
 0x35e   : > { %v6511_v28 = vpop.f32.mrf.mxu1  ;;  %v2211_v54 = vadd.f32 %v7864_v50, %v2201_v42  ;;  %vm5722_vm14 = vcmp.eq.s32.totalorder %v7910_v29, 4 }
 0x35f   : > { %v2123_v40 = vmul.f32 2.0, %v2114_v10  ;;  %6800 = vrcp.f32 %v2241_v44  ;;  %v3075_v28 = vmul.f32 %v7830_v63, %v7791_v0 }
 0x360   : > { %v2030_v57 = vpop.f32.mrf.mxu1  ;;  %6641 = vmatmul.mubr.msk.f32.gmra.mxu1 %vm3079_vm2, %v3070_v31  ;;  %6802 = vrcp.f32 %v2155_v48  ;;  %v6789_v19 = vpop.eup %6788  ;;  %v2204_v31 = vmul.f32 2.0, %v7728_v5 }
 0x361   : > { %v2133_v45 = vadd.f32 %v7855_v6, %v2123_v40  ;;  %v2115_v17 = vsub.f32 %v2030_v57, %v7698_v51  ;;  %6643 = vmatprep.mubr.msk.f32.mxu1 %vm3079_vm2, %v3071_v61  ;;  %v2156_v51 = vadd.f32 %v7859_v53, %v7855_v6  ;;  %v2212_v53 = vadd.f32 %v7864_v50, %v2202_v52 }
 0x362   : > { %v6514_v47 = vpop.f32.mrf.mxu1  ;;  %6804 = vrcp.f32 %v2242_v8  ;;  %v6791_v61 = vpop.eup %6790  ;;  %v2244_v8 = vadd.f32 %v7764_v27, %v7864_v50 }
 0x363   : > { %v2169_v15 = vmul.f32 %v6785_v60, %v2133_v45  ;;  %v2124_v3 = vmul.f32 2.0, %v2115_v17  ;;  %6806 = vrcp.f32 %v2156_v51  ;;  %v6793_v48 = vpop.eup %6792  ;;  %v2243_v45 = vadd.f32 %v7754_v21, %v7864_v50 }
 0x364   : > { %v2035_v23 = vpop.f32.mrf.mxu1  ;;  %6644 = vmatmul.mubr.msk.f32.gmra.mxu1 %vm3079_vm2, %v3072_v13  ;;  %6808 = vrcp.f32 %v2157_v37  ;;  %v2158_v21 = vadd.f32 %v7889_v12, %v7855_v6 }
 0x365   : > { %v2219_v43 = vmul.f32 %v2210_v58, %v2169_v15  ;;  %v2134_v4 = vadd.f32 %v7855_v6, %v2124_v3  ;;  %v2116_v20 = vsub.f32 %v2035_v23, %v7708_v62  ;;  %6646 = vmatprep.mubr.msk.f32.mxu1 %vm3079_vm2, %v3073_v56  ;;  %v2203_v62 = vmul.f32 2.0, %v7718_v59 }
 0x366   : > { %v6517_v34 = vpop.f32.mrf.mxu1  ;;  %v2291_v58 = vsel %vm2264_vm3, %v2169_v15, 0.0  ;;  %v3077_v15 = vmul.f32 %v7840_v38, %v7804_v16  ;;  %v3078_v3 = vmul.f32 %v7847_v46, %v7812_v25  ;;  %6810 = vrcp.f32 %v2243_v45 }
 0x367   : > { %v2255_v33 = vmul.f32 %v6787_v14, %v2219_v43  ;;  %v2170_v10 = vmul.f32 %v6789_v19, %v2134_v4  ;;  %v2125_v26 = vmul.f32 2.0, %v2116_v20  ;;  %v6795_v43 = vpop.eup %6794  ;;  %v2213_v34 = vadd.f32 %v7864_v50, %v2203_v62 }
 0x368   : > { %v2040_v40 = vpop.f32.mrf.mxu1  ;;  %6647 = vmatmul.mubr.msk.f32.gmra.mxu1 %vm3079_vm2, %v3074_v2  ;;  %v6797_v2 = vpop.eup %6796  ;;  %6812 = vrcp.f32 %v2158_v21 }
 0x369   : > { %v2220_v42 = vmul.f32 %v2211_v54, %v2170_v10  ;;  %v2292_v44 = vsel %vm2264_vm3, %v2170_v10, 0.0  ;;  %v2135_v57 = vadd.f32 %v7855_v6, %v2125_v26  ;;  %6649 = vmatprep.mubr.msk.f32.mxu1 %vm3079_vm2, %v3075_v28  ;;  %v2117_v60 = vsub.f32 %v2040_v40, %v7718_v59  ;;  %v6799_v26 = vpop.eup %6798 }
 0x36a   : > { %v2293_v17 = vadd.f32 %v2292_v44, %v2291_v58  ;;  %v6520_v52 = vpop.f32.mrf.mxu1  ;;  %v2265_v59 = vsel %vm2264_vm3, %v2255_v33, 0.0  ;;  %6814 = vrcp.f32 %v2244_v8 }
 0x36b   : > { %v2256_v13 = vmul.f32 %v6791_v61, %v2220_v42  ;;  %v2171_v47 = vmul.f32 %v6793_v48, %v2135_v57  ;;  %v2126_v56 = vmul.f32 2.0, %v2117_v60  ;;  %v2214_v61 = vadd.f32 %v7864_v50, %v2204_v31 }
 0x36c   : > { %v2045_v51 = vpop.f32.mrf.mxu1  ;;  %6650 = vmatmul.mubr.msk.f32.gmra.mxu1 %vm3079_vm2, %v3076_v55  ;;  %v2205_v52 = vmul.f32 2.0, %v7738_v11 }
 0x36d   : > { %v2266_v27 = vsel %vm2264_vm3, %v2256_v13, 0.0  ;;  %v2193_v23 = vsel %vm2184_vm4, %v2171_v47, 0.0  ;;  %v2118_v14 = vsub.f32 %v2045_v51, %v7728_v5  ;;  %6652 = vmatprep.mubr.msk.f32.mxu1 %vm3079_vm2, %v3077_v15  ;;  %v2136_v19 = vadd.f32 %v7855_v6, %v2126_v56 }
 0x36e   : > { %v2267_v4 = vadd.f32 %v2266_v27, %v2265_v59  ;;  %v2221_v20 = vmul.f32 %v2212_v53, %v2193_v23  ;;  %v2294_v12 = vsel %vm2264_vm3, %v2193_v23, 0.0  ;;  %v6523_v54 = vpop.f32.mrf.mxu1  ;;  %v2159_v5 = vadd.f32 %v7904_v7, %v7855_v6  ;;  %v6801_v53 = vpop.eup %6800 }
 0x36f   : > { %v2295_v33 = vadd.f32 %v2294_v12, %v2293_v17  ;;  %v2127_v10 = vmul.f32 2.0, %v2118_v14  ;;  %v2172_v37 = vmul.f32 %v6797_v2, %v2136_v19  ;;  %v6803_v42 = vpop.eup %6802  ;;  %v2206_v56 = vmul.f32 2.0, %v7748_v18 }
 0x370   : > { %v2257_v28 = vmul.f32 %v6795_v43, %v2221_v20  ;;  %v2050_v40 = vpop.f32.mrf.mxu1  ;;  %6653 = vmatmul.mubr.msk.f32.gmra.mxu1 %vm3079_vm2, %v3078_v3  ;;  %v6805_v45 = vpop.eup %6804  ;;  %6816 = vrcp.f32 %v2159_v5  ;;  %v2207_v20 = vmul.f32 2.0, %v7758_v24 }
 0x371   : > { %v2137_v58 = vadd.f32 %v7855_v6, %v2127_v10  ;;  %v2119_v62 = vsub.f32 %v2050_v40, %v7738_v11  ;;  %6708 = vmatprep.mubr.msk.f32.mxu1 %vm3079_vm2, %v7777_v39  ;;  %v2222_v44 = vmul.f32 %v2213_v34, %v2172_v37  ;;  %v2296_v57 = vsel %vm2264_vm3, %v2172_v37, 0.0  ;;  %v6807_v39 = vpop.eup %6806 }
 0x372   : > { %v2268_v7 = vsel %vm2264_vm3, %v2257_v28, 0.0  ;;  %v6526_v48 = vpop.f32.mrf.mxu1  ;;  %v2297_v17 = vadd.f32 %v2296_v57, %v2295_v33  ;;  %v2245_v11 = vadd.f32 %v7772_v32, %v7864_v50 }
 0x373   : > { %v2269_v55 = vadd.f32 %v2268_v7, %v2267_v4  ;;  %v2173_v31 = vmul.f32 %v6803_v42, %v2137_v58  ;;  %v2128_v60 = vmul.f32 2.0, %v2119_v62  ;;  %v2258_v13 = vmul.f32 %v6799_v26, %v2222_v44 }
 0x374   : > { %v2055_v47 = vpop.f32.mrf.mxu1  ;;  %6709 = vmatmul.mubr.msk.f32.vlgmr.msra.gmra.mxu1 %vm3079_vm2, %v7782_v41  ;;  %v2215_v4 = vadd.f32 %v7864_v50, %v2205_v52  ;;  %6818 = vrcp.f32 %v2245_v11  ;;  %v2217_v42 = vadd.f32 %v7864_v50, %v2207_v20 }
 0x375   : > { %v2223_v8 = vmul.f32 %v2214_v61, %v2173_v31  ;;  %v2298_v15 = vsel %vm2264_vm3, %v2173_v31, 0.0  ;;  %v2138_v3 = vadd.f32 %v7855_v6, %v2128_v60  ;;  %v2120_v21 = vsub.f32 %v2055_v47, %v7748_v18  ;;  %6711 = vmatprep.mubr.msk.f32.mxu1 %vm3079_vm2, %v7791_v0  ;;  %v6809_v18 = vpop.eup %6808 }
 0x376   : > { %v2270_v51 = vsel %vm2264_vm3, %v2258_v13, 0.0  ;;  %v2299_v59 = vadd.f32 %v2298_v15, %v2297_v17  ;;  %v6529_v41 = vpop.f32.mrf.mxu1  ;;  %v2208_v31 = vmul.f32 2.0, %v7768_v30 }
 0x377   : > { %v2271_v27 = vadd.f32 %v2270_v51, %v2269_v55  ;;  %v2259_v23 = vmul.f32 %v6801_v53, %v2223_v8  ;;  %v2174_v14 = vmul.f32 %v6807_v39, %v2138_v3  ;;  %v2129_v43 = vmul.f32 2.0, %v2120_v21 }
 0x378   : > { %v2060_v12 = vpop.f32.mrf.mxu1  ;;  %6712 = vmatmul.mubr.msk.f32.gmra.mxu1 %vm3079_vm2, %v7796_v9  ;;  %v2216_v9 = vadd.f32 %v7864_v50, %v2206_v56 }
 0x379   : > { %v2272_v0 = vsel %vm2264_vm3, %v2259_v23, 0.0  ;;  %v2196_v32 = vsel %vm2184_vm4, %v2174_v14, 0.0  ;;  %v2139_v19 = vadd.f32 %v7855_v6, %v2129_v43  ;;  %v2121_v54 = vsub.f32 %v2060_v12, %v7758_v24  ;;  %6714 = vmatprep.mubr.msk.f32.mxu1 %vm3079_vm2, %v7804_v16  ;;  %v6811_v24 = vpop.eup %6810  ;;  %v8066_v43 = vld [vmem:[%s8735_s8 + $0x8] sm:$0xff] }
 0x37a   : > { %v2224_v2 = vmul.f32 %v2215_v4, %v2196_v32  ;;  %v2300_v34 = vsel %vm2264_vm3, %v2196_v32, 0.0  ;;  %v6532_v33 = vpop.f32.mrf.mxu1  ;;  %v2273_v10 = vadd.f32 %v2272_v0, %v2271_v27  ;;  %v6813_v62 = vpop.eup %6812 }
 0x37b   : > { %v2301_v26 = vadd.f32 %v2300_v34, %v2299_v59  ;;  %v2175_v5 = vmul.f32 %v6809_v18, %v2139_v19  ;;  %v2130_v28 = vmul.f32 2.0, %v2121_v54  ;;  %v6815_v48 = vpop.eup %6814 }
 0x37c   : > { %v2260_v37 = vmul.f32 %v6805_v45, %v2224_v2  ;;  %v2065_v40 = vpop.f32.mrf.mxu1  ;;  %6715 = vmatmul.mubr.msk.f32.gmra.mxu1 %vm3079_vm2, %v7812_v25 }
 0x37d   : > { %v2225_v53 = vmul.f32 %v2216_v9, %v2175_v5  ;;  %v2302_v16 = vsel %vm2264_vm3, %v2175_v5, 0.0  ;;  %v2140_v61 = vadd.f32 %v7855_v6, %v2130_v28  ;;  %v2122_v58 = vsub.f32 %v2065_v40, %v7768_v30  ;;  %6717 = vmatprep.mubr.msk.f32.mxu1 %vm3079_vm2, %v7820_v35  ;;  %v6817_v60 = vpop.eup %6816 }
 0x37e   : > { %v6535_v7 = vpop.f32.mrf.mxu1  ;;  %v2303_v44 = vadd.f32 %v2302_v16, %v2301_v26  ;;  %v2274_v57 = vsel %vm2264_vm3, %v2260_v37, 0.0  ;;  %v2218_v30 = vadd.f32 %v7864_v50, %v2208_v31 }
 0x37f   : > { %v2261_v25 = vmul.f32 %v6811_v24, %v2225_v53  ;;  %v2176_v45 = vmul.f32 %v6813_v62, %v2140_v61  ;;  %v2131_v55 = vmul.f32 2.0, %v2122_v58  ;;  %v2275_v17 = vadd.f32 %v2274_v57, %v2273_v10 }
 0x380   : > { %6718 = vmatmul.mubr.msk.f32.gmra.mxu1 %vm3079_vm2, %v7825_v49 }
 0x381   : > { %v2226_v52 = vmul.f32 %v2217_v42, %v2176_v45  ;;  %v2141_v35 = vadd.f32 %v7855_v6, %v2131_v55  ;;  %6720 = vmatprep.mubr.msk.f32.mxu1 %vm3079_vm2, %v7830_v63  ;;  %v2304_v13 = vsel %vm2264_vm3, %v2176_v45, 0.0  ;;  %v2276_v47 = vsel %vm2264_vm3, %v2261_v25, 0.0  ;;  %v6819_v11 = vpop.eup %6818 }
 0x382   : > { %v2305_v39 = vadd.f32 %v2304_v13, %v2303_v44  ;;  %v2277_v8 = vadd.f32 %v2276_v47, %v2275_v17  ;;  %v4146_v47 = vld [vmem:[%s8735_s8] sm:$0xff] }
 0x383   : > { %v2177_v15 = vmul.f32 %v6817_v60, %v2141_v35  ;;  %v2262_v3 = vmul.f32 %v6815_v48, %v2226_v52 }
 0x384   : > { %6721 = vmatmul.mubr.msk.f32.gmra.mxu1 %vm3079_vm2, %v7835_v22 }
 0x385   : > { %6723 = vmatprep.mubr.msk.f32.mxu1 %vm3079_vm2, %v7840_v38  ;;  %v2199_v49 = vsel %vm2184_vm4, %v2177_v15, 0.0  ;;  %v2278_v63 = vsel %vm2264_vm3, %v2262_v3, 0.0  ;;  %v3060_v38 = vld [vmem:[%s8733_s6 + $0x8] sm:$0xff] }
 0x386   : > { %v2227_v6 = vmul.f32 %v2218_v30, %v2199_v49  ;;  %v2306_v21 = vsel %vm2264_vm3, %v2199_v49, 0.0  ;;  %v2279_v56 = vadd.f32 %v2278_v63, %v2277_v8  ;;  %6656 = vmatpush3.msra.mxu0 %v3060_v38 }
 0x387   : > { %v8049_v51 = vadd.f32 %v2306_v21, %v2305_v39  ;;  %6657 = vmatprep.subr.mxu0 %v6896_v1 }
 0x388   : > { %6724 = vmatmul.mubr.msk.f32.gmra.mxu1 %vm3079_vm2, %v7847_v46  ;;  %v2263_v50 = vmul.f32 %v6819_v11, %v2227_v6  ;;  %6658 = vmatpush3.msra.mxu0 %v3059_v36 }
 0x389   : > { %6726 = vmatprep.subr.mxu0 %v8066_v43 }
 0x38a   : > { %v2280_v22 = vsel %vm2264_vm3, %v2263_v50, 0.0 }
 0x38b   : > { %v8054_v59 = vadd.f32 %v2280_v22, %v2279_v56 }
 0x3e4   : > { %v6612_v41 = vpop.f32.mrf.mxu1 }
 0x3e6   : > { %v3236_v27 = vpop.f32.mrf.mxu1 }
 0x3e7   : > { %3385 = vxpose.xlu0.b32.start [1/2] (short) (narrow) %v3236_v27, 8 }
 0x3eb   : > { %3386 = vxpose.xlu0.b32.end [2/2] (short) (narrow) %v6612_v41, 8 }
 0x3ec   : > { %v6615_v46 = vpop.f32.mrf.mxu1 }
 0x3ee   : > { %v3246_v23 = vpop.f32.mrf.mxu1 }
 0x3ef   : > { %3417 = vxpose.xlu1.b32.start [1/2] (short) (narrow) %v3246_v23, 8 }
 0x3f3   : > { %3418 = vxpose.xlu1.b32.end [2/2] (short) (narrow) %v6615_v46, 8 }
 0x3f4   : > { %v6618_v14 = vpop.f32.mrf.mxu1 }
 0x3f6   : > { %v3256_v4 = vpop.f32.mrf.mxu1 }
 0x3f7   : > { %3449 = vxpose.xlu0.b32.start [1/2] (short) (narrow) %v3256_v4, 8 }
 0x3fb   : > { %3450 = vxpose.xlu0.b32.end [2/2] (short) (narrow) %v6618_v14, 8 }
 0x3fc   : > { %v6621_v20 = vpop.f32.mrf.mxu1 }
 0x3fe   : > { %v3266_v12 = vpop.f32.mrf.mxu1 }
 0x3ff   : > { %3481 = vxpose.xlu1.b32.start [1/2] (short) (narrow) %v3266_v12, 8 }
 0x403   : > { %3482 = vxpose.xlu1.b32.end [2/2] (short) (narrow) %v6621_v20, 8 }
 0x404   : > { %v6624_v18 = vpop.f32.mrf.mxu1 }
 0x406   : > { %v3276_v0 = vpop.f32.mrf.mxu1 }
 0x407   : > { %3513 = vxpose.xlu0.b32.start [1/2] (short) (narrow) %v3276_v0, 8 }
 0x40b   : > { %3514 = vxpose.xlu0.b32.end [2/2] (short) (narrow) %v6624_v18, 8 }
 0x40c   : > { %v6627_v32 = vpop.f32.mrf.mxu1 }
 0x40e   : > { %v3286_v19 = vpop.f32.mrf.mxu1 }
 0x40f   : > { %3545 = vxpose.xlu1.b32.start [1/2] (short) (narrow) %v3286_v19, 8 }
 0x410   : > { %v6630_v54 = vpop.f32.mrf.mxu1 }
 0x412   : > { %v3296_v2 = vpop.f32.mrf.mxu1 }
 0x413   : > { %3546 = vxpose.xlu1.b32.end [2/2] (short) (narrow) %v6627_v32, 8  ;;  %3577 = vxpose.xlu0.b32.start [1/2] (short) (narrow) %v3296_v2, 8 }
 0x414   : > { %v6633_v34 = vpop.f32.mrf.mxu1 }
 0x416   : > { %v3306_v33 = vpop.f32.mrf.mxu1 }
 0x417   : > { %3578 = vxpose.xlu0.b32.end [2/2] (short) (narrow) %v6630_v54, 8  ;;  %3609 = vxpose.xlu1.b32.start [1/2] (short) (narrow) %v3306_v33, 8 }
 0x418   : > { %v6636_v10 = vpop.f32.mrf.mxu1 }
 0x41a   : > { %v3316_v9 = vpop.f32.mrf.mxu1 }
 0x41b   : > { %3610 = vxpose.xlu1.b32.end [2/2] (short) (narrow) %v6633_v34, 8  ;;  %3641 = vxpose.xlu0.b32.start [1/2] (short) (narrow) %v3316_v9, 8 }
 0x41c   : > { %v6639_v26 = vpop.f32.mrf.mxu1 }
 0x41e   : > { %v3326_v5 = vpop.f32.mrf.mxu1 }
 0x41f   : > { %3642 = vxpose.xlu0.b32.end [2/2] (short) (narrow) %v6636_v10, 8  ;;  %3673 = vxpose.xlu1.b32.start [1/2] (short) (narrow) %v3326_v5, 8 }
 0x420   : > { %v6642_v28 = vpop.f32.mrf.mxu1 }
 0x422   : > { %v3336_v37 = vpop.f32.mrf.mxu1 }
 0x423   : > { %3674 = vxpose.xlu1.b32.end [2/2] (short) (narrow) %v6639_v26, 8  ;;  %3705 = vxpose.xlu0.b32.start [1/2] (short) (narrow) %v3336_v37, 8 }
 0x424   : > { %v6645_v40 = vpop.f32.mrf.mxu1 }
 0x426   : > { %v3346_v24 = vpop.f32.mrf.mxu1 }
 0x427   : > { %3706 = vxpose.xlu0.b32.end [2/2] (short) (narrow) %v6642_v28, 8  ;;  %3737 = vxpose.xlu1.b32.start [1/2] (short) (narrow) %v3346_v24, 8 }
 0x428   : > { %v6648_v53 = vpop.f32.mrf.mxu1 }
 0x42a   : > { %v3356_v16 = vpop.f32.mrf.mxu1 }
 0x42b   : > { %3738 = vxpose.xlu1.b32.end [2/2] (short) (narrow) %v6645_v40, 8  ;;  %3769 = vxpose.xlu0.b32.start [1/2] (short) (narrow) %v3356_v16, 8 }
 0x42c   : > { %v6651_v61 = vpop.f32.mrf.mxu1 }
 0x42e   : > { %v3366_v58 = vpop.f32.mrf.mxu1 }
 0x42f   : > { %3770 = vxpose.xlu0.b32.end [2/2] (short) (narrow) %v6648_v53, 8  ;;  %3801 = vxpose.xlu1.b32.start [1/2] (short) (narrow) %v3366_v58, 8 }
 0x430   : > { %v6654_v62 = vpop.f32.mrf.mxu1 }
 0x432   : > { %v3376_v42 = vpop.f32.mrf.mxu1 }
 0x433   : > { %3802 = vxpose.xlu1.b32.end [2/2] (short) (narrow) %v6651_v61, 8  ;;  %3833 = vxpose.xlu0.b32.start [1/2] (short) (narrow) %v3376_v42, 8 }
 0x434   : > { %v6710_v7 = vpop.f32.mrf.mxu1 }
 0x436   : > { %v4214_v44 = vpop.f32.mrf.mxu1 }
 0x437   : > { %3834 = vxpose.xlu0.b32.end [2/2] (short) (narrow) %v6654_v62, 8  ;;  %4273 = vxpose.xlu1.b32.start [1/2] (short) (narrow) %v4214_v44, 8 }
 0x438   : > { %v6713_v57 = vpop.f32.mrf.mxu1 }
 0x43a   : > { %v4224_v48 = vpop.f32.mrf.mxu1 }
 0x43b   : > { %4274 = vxpose.xlu1.b32.end [2/2] (short) (narrow) %v6710_v7, 8  ;;  %4305 = vxpose.xlu0.b32.start [1/2] (short) (narrow) %v4224_v48, 8 }
 0x43c   : > { %v6716_v25 = vpop.f32.mrf.mxu1 }
 0x43e   : > { %v4234_v45 = vpop.f32.mrf.mxu1 }
 0x43f   : > { %4306 = vxpose.xlu0.b32.end [2/2] (short) (narrow) %v6713_v57, 8  ;;  %4337 = vxpose.xlu1.b32.start [1/2] (short) (narrow) %v4234_v45, 8 }
 0x440   : > { %v6719_v55 = vpop.f32.mrf.mxu1 }
 0x442   : > { %v4244_v17 = vpop.f32.mrf.mxu1 }
 0x443   : > { %4338 = vxpose.xlu1.b32.end [2/2] (short) (narrow) %v6716_v25, 8  ;;  %4369 = vxpose.xlu0.b32.start [1/2] (short) (narrow) %v4244_v17, 8 }
 0x444   : > { %v6722_v31 = vpop.f32.mrf.mxu1 }
 0x446   : > { %v4254_v60 = vpop.f32.mrf.mxu1 }
 0x447   : > { %4370 = vxpose.xlu0.b32.end [2/2] (short) (narrow) %v6719_v55, 8  ;;  %4401 = vxpose.xlu1.b32.start [1/2] (short) (narrow) %v4254_v60, 8 }
 0x448   : > { %v6725_v52 = vpop.f32.mrf.mxu1 }
 0x44a   : > { %v4264_v35 = vpop.f32.mrf.mxu1 }
 0x44b   : > { %4402 = vxpose.xlu1.b32.end [2/2] (short) (narrow) %v6722_v31, 8  ;;  %4433 = vxpose.xlu0.b32.start [1/2] (short) (narrow) %v4264_v35, 8  ;;  %v4071_v31 = vstv %s5993_s20  ;;  %s6057_s20 = sld [smem:[#allocation2 + $0x4]] }
 0x44f   : > { %4434 = vxpose.xlu0.b32.end [2/2] (short) (narrow) %v6725_v52, 8 }
 0x463   : > { %v3401_v13 = vpop.trf.xlu0 }
 0x464   : > { %6660 = vmatmul.mubr.msk.f32.vlgmr.msra.gmra.mxu0 %vm3079_vm2, %v3401_v13  ;;  %v4096_v13 = vstv %s5992_s21  ;;  %s6060_s21 = sld [smem:[#allocation2 + $0x7]] }
 0x465   : > { %6662 = vmatprep.mubr.msk.f32.mxu0 %vm6897_vm1, %v6896_v1  ;;  %6727 = vmatpush3.msra.mxu0 %v8066_v43 }
 0x466   : > { %6728 = vmatprep.subr.mxu0 %v4146_v47 }
 0x467   : > { %6729 = vmatpush3.msra.mxu0 %v4146_v47 }
 0x46b   : > { %v3433_v39 = vpop.trf.xlu1 }
 0x46c   : > { %6663 = vmatmul.mubr.msk.f32.gmra.mxu0 %vm3079_vm2, %v3433_v39 }
 0x46d   : > { %6665 = vmatprep.mubr.msk.f32.mxu0 %vm6897_vm1, %v6896_v1 }
 0x473   : > { %v3465_v8 = vpop.trf.xlu0 }
 0x474   : > { %6666 = vmatmul.mubr.msk.f32.gmra.mxu0 %vm3079_vm2, %v3465_v8 }
 0x475   : > { %6668 = vmatprep.mubr.msk.f32.mxu0 %vm6897_vm1, %v6896_v1 }
 0x47b   : > { %v3497_v15 = vpop.trf.xlu1 }
 0x47c   : > { %6669 = vmatmul.mubr.msk.f32.gmra.mxu0 %vm3079_vm2, %v3497_v15 }
 0x47d   : > { %6671 = vmatprep.mubr.msk.f32.mxu0 %vm6897_vm1, %v6896_v1 }
 0x483   : > { %v3529_v3 = vpop.trf.xlu0 }
 0x484   : > { %6672 = vmatmul.mubr.msk.f32.gmra.mxu0 %vm3079_vm2, %v3529_v3 }
 0x485   : > { %6674 = vmatprep.mubr.msk.f32.mxu0 %vm6897_vm1, %v6896_v1 }
 0x48b   : > { %v3561_v30 = vpop.trf.xlu1 }
 0x48c   : > { %6675 = vmatmul.mubr.msk.f32.gmra.mxu0 %vm3079_vm2, %v3561_v30 }
 0x48d   : > { %6677 = vmatprep.mubr.msk.f32.mxu0 %vm6897_vm1, %v6896_v1 }
 0x48f   : > { %v3593_v49 = vpop.trf.xlu0 }
 0x490   : > { %6678 = vmatmul.mubr.msk.f32.gmra.mxu0 %vm3079_vm2, %v3593_v49 }
 0x491   : > { %6680 = vmatprep.mubr.msk.f32.mxu0 %vm6897_vm1, %v6896_v1 }
 0x493   : > { %v3625_v63 = vpop.trf.xlu1 }
 0x494   : > { %6681 = vmatmul.mubr.msk.f32.gmra.mxu0 %vm3079_vm2, %v3625_v63 }
 0x495   : > { %6683 = vmatprep.mubr.msk.f32.mxu0 %vm6897_vm1, %v6896_v1 }
 0x497   : > { %v3657_v6 = vpop.trf.xlu0 }
 0x498   : > { %6684 = vmatmul.mubr.msk.f32.gmra.mxu0 %vm3079_vm2, %v3657_v6 }
 0x499   : > { %6686 = vmatprep.mubr.msk.f32.mxu0 %vm6897_vm1, %v6896_v1 }
 0x49b   : > { %v3689_v21 = vpop.trf.xlu1 }
 0x49c   : > { %6687 = vmatmul.mubr.msk.f32.gmra.mxu0 %vm3079_vm2, %v3689_v21 }
 0x49d   : > { %6689 = vmatprep.mubr.msk.f32.mxu0 %vm6897_vm1, %v6896_v1 }
 0x49f   : > { %v3721_v56 = vpop.trf.xlu0 }
 0x4a0   : > { %6690 = vmatmul.mubr.msk.f32.gmra.mxu0 %vm3079_vm2, %v3721_v56 }
 0x4a1   : > { %6692 = vmatprep.mubr.msk.f32.mxu0 %vm6897_vm1, %v6896_v1 }
 0x4a3   : > { %v3753_v11 = vpop.trf.xlu1 }
 0x4a4   : > { %6693 = vmatmul.mubr.msk.f32.gmra.mxu0 %vm3079_vm2, %v3753_v11 }
 0x4a5   : > { %6695 = vmatprep.mubr.msk.f32.mxu0 %vm6897_vm1, %v6896_v1 }
 0x4a7   : > { %v3785_v50 = vpop.trf.xlu0 }
 0x4a8   : > { %6696 = vmatmul.mubr.msk.f32.gmra.mxu0 %vm3079_vm2, %v3785_v50 }
 0x4a9   : > { %6698 = vmatprep.mubr.msk.f32.mxu0 %vm6897_vm1, %v6896_v1 }
 0x4ab   : > { %v3817_v22 = vpop.trf.xlu1 }
 0x4ac   : > { %6699 = vmatmul.mubr.msk.f32.gmra.mxu0 %vm3079_vm2, %v3817_v22 }
 0x4ad   : > { %6701 = vmatprep.mubr.msk.f32.mxu0 %vm6897_vm1, %v6896_v1 }
 0x4af   : > { %v3849_v38 = vpop.trf.xlu0 }
 0x4b0   : > { %6702 = vmatmul.mubr.msk.f32.gmra.mxu0 %vm3079_vm2, %v3849_v38 }
 0x4b3   : > { %v4289_v36 = vpop.trf.xlu1 }
 0x4b4   : > { %6730 = vmatprep.mubr.msk.f32.mxu0 %vm3079_vm2, %v4289_v36 }
 0x4b7   : > { %v4321_v41 = vpop.trf.xlu0 }
 0x4b8   : > { %6731 = vmatmul.mubr.msk.f32.vlgmr.msra.gmra.mxu0 %vm3079_vm2, %v4321_v41 }
 0x4bb   : > { %v4353_v27 = vpop.trf.xlu1 }
 0x4bc   : > { %6733 = vmatprep.mubr.msk.f32.mxu0 %vm3079_vm2, %v4353_v27 }
 0x4bf   : > { %v4385_v46 = vpop.trf.xlu0 }
 0x4c0   : > { %6734 = vmatmul.mubr.msk.f32.gmra.mxu0 %vm3079_vm2, %v4385_v46 }
 0x4c3   : > { %v4417_v23 = vpop.trf.xlu1 }
 0x4c4   : > { %6736 = vmatprep.mubr.msk.f32.mxu0 %vm3079_vm2, %v4417_v23 }
 0x4c7   : > { %v4449_v14 = vpop.trf.xlu0 }
 0x4c8   : > { %6737 = vmatmul.mubr.msk.f32.gmra.mxu0 %vm3079_vm2, %v4449_v14 }
 0x524   : > { %v3976_v1 = vpop.f32.mrf.mxu0 }
 0x525   : > { %v4050_v0 = vmul.f32 %v3976_v1, %v3976_v1 }
 0x526   : > { %v6661_v43 = vpop.f32.mrf.mxu0 }
 0x52c   : > { %v3981_v4 = vpop.f32.mrf.mxu0 }
 0x52d   : > { %v4051_v10 = vmul.f32 %v3981_v4, %v3981_v4 }
 0x52e   : > { %v6664_v20 = vpop.f32.mrf.mxu0 }
 0x534   : > { %v3986_v12 = vpop.f32.mrf.mxu0 }
 0x535   : > { %v4052_v40 = vmul.f32 %v3986_v12, %v3986_v12 }
 0x536   : > { %v6667_v18 = vpop.f32.mrf.mxu0 }
 0x53c   : > { %v3991_v32 = vpop.f32.mrf.mxu0 }
 0x53d   : > { %v4053_v19 = vmul.f32 %v3991_v32, %v3991_v32  ;;  %v4056_v54 = vmul.f32 %v3991_v32, %v3976_v1 }
 0x53e   : > { %v6670_v2 = vpop.f32.mrf.mxu0 }
 0x53f   : > { %v4103_v34 = vadd.f32 %v4053_v19, %v4050_v0  ;;  %v4093_v23 = vmul.f32 2.0, %v4056_v54 }
 0x541   : > { %v4106_v3 = vadd.f32 %v4103_v34, %v4096_v13 }
 0x544   : > { %v3996_v33 = vpop.f32.mrf.mxu0 }
 0x545   : > { %v4054_v9 = vmul.f32 %v3996_v33, %v3996_v33  ;;  %v4057_v26 = vmul.f32 %v3996_v33, %v3981_v4 }
 0x546   : > { %v6673_v5 = vpop.f32.mrf.mxu0 }
 0x547   : > { %v4104_v28 = vadd.f32 %v4054_v9, %v4051_v10  ;;  %v4094_v32 = vmul.f32 2.0, %v4057_v26 }
 0x549   : > { %v4107_v56 = vadd.f32 %v4104_v28, %v4096_v13  ;;  %v4098_v28 = vadd.f32 %v4096_v13, %v4094_v32 }
 0x54c   : > { %v4001_v37 = vpop.f32.mrf.mxu0 }
 0x54d   : > { %v4055_v24 = vmul.f32 %v4001_v37, %v4001_v37  ;;  %v8122_v53 = vmul.f32 %v4001_v37, %v3986_v12 }
 0x54e   : > { %v6676_v16 = vpop.f32.mrf.mxu0 }
 0x54f   : > { %v4105_v61 = vadd.f32 %v4055_v24, %v4052_v40  ;;  %v4095_v37 = vmul.f32 2.0, %v8122_v53 }
 0x550   : > { %v4006_v58 = vpop.f32.mrf.mxu0 }
 0x551   : > { %v4059_v62 = vsub.f32 %v4006_v58, %v4050_v0  ;;  %v4108_v41 = vadd.f32 %v4105_v61, %v4096_v13  ;;  %v4097_v0 = vadd.f32 %v4096_v13, %v4093_v23 }
 0x552   : > { %v6679_v42 = vpop.f32.mrf.mxu0 }
 0x554   : > { %v4011_v7 = vpop.f32.mrf.mxu0 }
 0x555   : > { %v4060_v44 = vsub.f32 %v4011_v7, %v4051_v10 }
 0x556   : > { %v6682_v57 = vpop.f32.mrf.mxu0 }
 0x558   : > { %v4016_v48 = vpop.f32.mrf.mxu0 }
 0x559   : > { %v4061_v25 = vsub.f32 %v4016_v48, %v4052_v40  ;;  %v4099_v48 = vadd.f32 %v4096_v13, %v4095_v37 }
 0x55a   : > { %v6685_v45 = vpop.f32.mrf.mxu0 }
 0x55c   : > { %v4021_v55 = vpop.f32.mrf.mxu0 }
 0x55d   : > { %v4062_v17 = vsub.f32 %v4021_v55, %v4053_v19 }
 0x55e   : > { %v6688_v60 = vpop.f32.mrf.mxu0 }
 0x55f   : > { %v4075_v52 = vadd.f32 %v4062_v17, %v4059_v62 }
 0x560   : > { %v4026_v35 = vpop.f32.mrf.mxu0 }
 0x561   : > { %v4078_v47 = vadd.f32 %v4075_v52, %v4071_v31  ;;  %v4063_v39 = vsub.f32 %v4026_v35, %v4054_v9 }
 0x562   : > { %v6691_v8 = vpop.f32.mrf.mxu0 }
 0x563   : > { %6820 = vrcp.f32 %v4078_v47  ;;  %v4076_v15 = vadd.f32 %v4063_v39, %v4060_v44 }
 0x564   : > { %v4031_v30 = vpop.f32.mrf.mxu0 }
 0x565   : > { %v4079_v49 = vadd.f32 %v4076_v15, %v4071_v31  ;;  %v4064_v63 = vsub.f32 %v4031_v30, %v4055_v24 }
 0x566   : > { %v6694_v6 = vpop.f32.mrf.mxu0 }
 0x567   : > { %6822 = vrcp.f32 %v4079_v49  ;;  %v4077_v21 = vadd.f32 %v4064_v63, %v4061_v25 }
 0x568   : > { %6824 = vrcp.f32 %v4106_v3  ;;  %v4036_v11 = vpop.f32.mrf.mxu0 }
 0x569   : > { %v4080_v50 = vadd.f32 %v4077_v21, %v4071_v31  ;;  %v4065_v22 = vsub.f32 %v4036_v11, %v4056_v54  ;;  %v8158_v21 = vld [vmem:[%s8736_s9] sm:$0xff] }
 0x56a   : > { %v6697_v38 = vpop.f32.mrf.mxu0 }
 0x56b   : > { %6826 = vrcp.f32 %v4080_v50  ;;  %v4068_v36 = vmul.f32 2.0, %v4065_v22 }
 0x56c   : > { %6828 = vrcp.f32 %v4107_v56  ;;  %v4041_v27 = vpop.f32.mrf.mxu0 }
 0x56d   : > { %v4066_v46 = vsub.f32 %v4041_v27, %v4057_v26  ;;  %v4072_v1 = vadd.f32 %v4071_v31, %v4068_v36  ;;  %6830 = vrcp.f32 %v4108_v41 }
 0x56e   : > { %v6700_v14 = vpop.f32.mrf.mxu0 }
 0x56f   : > { %v4069_v43 = vmul.f32 2.0, %v4066_v46 }
 0x570   : > { %v6821_v4 = vpop.eup %6820  ;;  %v4046_v20 = vpop.f32.mrf.mxu0 }
 0x571   : > { %v4084_v12 = vmul.f32 %v6821_v4, %v4072_v1  ;;  %v4067_v18 = vsub.f32 %v4046_v20, %v8122_v53  ;;  %v4073_v34 = vadd.f32 %v4071_v31, %v4069_v43 }
 0x572   : > { %v6703_v19 = vpop.f32.mrf.mxu0 }
 0x573   : > { %v4090_v2 = vsel %vm4087_vm5, %v4084_v12, 0.0  ;;  %v4070_v33 = vmul.f32 2.0, %v4067_v18 }
 0x574   : > { %v6823_v54 = vpop.eup %6822  ;;  %v4100_v10 = vmul.f32 %v4097_v0, %v4090_v2  ;;  %v4130_v62 = vsel %vm4115_vm6, %v4090_v2, 0.0 }
 0x575   : > { %v6825_v9 = vpop.eup %6824  ;;  %v4085_v5 = vmul.f32 %v6823_v54, %v4073_v34  ;;  %v4074_v16 = vadd.f32 %v4071_v31, %v4070_v33 }
 0x576   : > { %v4112_v40 = vmul.f32 %v6825_v9, %v4100_v10 }
 0x577   : > { %v4091_v24 = vsel %vm4087_vm5, %v4085_v5, 0.0 }
 0x578   : > { %v6827_v26 = vpop.eup %6826  ;;  %v4101_v61 = vmul.f32 %v4098_v28, %v4091_v24  ;;  %v6732_v58 = vpop.f32.mrf.mxu0  ;;  %v4131_v42 = vsel %vm4115_vm6, %v4091_v24, 0.0  ;;  %v4116_v31 = vsel %vm4115_vm6, %v4112_v40, 0.0  ;;  %v8221_v24 = vld [vmem:[%s8737_s10] sm:$0xff] }
 0x579   : > { %v6829_v7 = vpop.eup %6828  ;;  %v4086_v44 = vmul.f32 %v6827_v26, %v4074_v16  ;;  %4610 = vxpose.xlu1.b32.start.end [1/1] (short) (narrow) %v6732_v58, 8  ;;  %v4132_v57 = vadd.f32 %v4131_v42, %v4130_v62 }
 0x57a   : > { %v4113_v25 = vmul.f32 %v6829_v7, %v4101_v61  ;;  %v4549_v45 = vpop.f32.mrf.mxu0  ;;  %v6831_v52 = vpop.eup %6830 }
 0x57b   : > { %v4092_v53 = vsel %vm4087_vm5, %v4086_v44, 0.0 }
 0x57c   : > { %v4102_v55 = vmul.f32 %v4099_v48, %v4092_v53  ;;  %v4133_v17 = vsel %vm4115_vm6, %v4092_v53, 0.0  ;;  %v4117_v60 = vsel %vm4115_vm6, %v4113_v25, 0.0 }
 0x57d   : > { %4578 = vxpose.xlu1.b32.start.end [1/1] (short) (narrow) %v4549_v45, 8  ;;  %v8138_v35 = vadd.f32 %v4133_v17, %v4132_v57  ;;  %v4118_v47 = vadd.f32 %v4117_v60, %v4116_v31 }
 0x57e   : > { %v4114_v39 = vmul.f32 %v6831_v52, %v4102_v55 }
 0x580   : > { %v6735_v8 = vpop.f32.mrf.mxu0  ;;  %v4119_v13 = vsel %vm4115_vm6, %v4114_v39, 0.0 }
 0x581   : > { %4674 = vxpose.xlu0.b32.start.end [1/1] (short) (narrow) %v6735_v8, 8  ;;  %v8141_v15 = vadd.f32 %v4119_v13, %v4118_v47 }
 0x582   : > { %v4559_v3 = vpop.f32.mrf.mxu0 }
 0x585   : > { %4642 = vxpose.xlu0.b32.start.end [1/1] (short) (narrow) %v4559_v3, 8 }
 0x588   : > { %v6738_v30 = vpop.f32.mrf.mxu0 }
 0x589   : > { %4738 = vxpose.xlu1.b32.start.end [1/1] (short) (narrow) %v6738_v30, 8 }
 0x58a   : > { %v4569_v49 = vpop.f32.mrf.mxu0 }
 0x58d   : > { %4706 = vxpose.xlu1.b32.start.end [1/1] (short) (narrow) %v4569_v49, 8 }
 0x5f5   : > { %v8143_v63 = vpop.trf.xlu1 }
 0x5f6   : > { %5026 = vrot.lane.b32.xlu1 %v8143_v63, %s6898_s23  ;;  %v4774_v56 = vmul.f32 %v8158_v21, %v8143_v63 }
 0x5f8   : > { %v4780_v11 = vsel %vm4776_vm7, %v4774_v56, 0.0 }
 0x5f9   : > { %v8147_v6 = vpop.trf.xlu1 }
 0x5fa   : > { %5024 = vrot.lane.b32.xlu0 %v8147_v6, %s6898_s23  ;;  %5035 = vrot.lane.b32.xlu1 %v8143_v63, %s6899_s24  ;;  %v4773_v50 = vmul.f32 %v8158_v21, %v8147_v6 }
 0x5fc   : > { %v4777_v22 = vsel %vm4776_vm7, %v4773_v50, 0.0 }
 0x5fd   : > { %v8166_v38 = vpop.trf.xlu0 }
 0x5fe   : > { %5033 = vrot.lane.b32.xlu1 %v8147_v6, %s6899_s24  ;;  %v4804_v27 = vmul.f32 %v8158_v21, %v8166_v38 }
 0x600   : > { %v4807_v46 = vsel %vm4776_vm7, %v4804_v27, 0.0 }
 0x601   : > { %v8168_v36 = vpop.trf.xlu0 }
 0x602   : > { %v4775_v23 = vmul.f32 %v8158_v21, %v8168_v36 }
 0x604   : > { %v4783_v14 = vsel %vm4776_vm7, %v4775_v23, 0.0 }
 0x605   : > { %v8178_v41 = vpop.trf.xlu1 }
 0x606   : > { %v4806_v1 = vmul.f32 %v8158_v21, %v8178_v41 }
 0x608   : > { %v4813_v4 = vsel %vm4776_vm7, %v4806_v1, 0.0 }
 0x609   : > { %v8190_v43 = vpop.trf.xlu1 }
 0x60a   : > { %v4805_v20 = vmul.f32 %v8158_v21, %v8190_v43 }
 0x60c   : > { %v4810_v12 = vsel %vm4776_vm7, %v4805_v20, 0.0 }
 0x619   : > { %4781 = vadd.xlane.f32.xlu0 %v4780_v11 }
 0x622   : > { %4778 = vadd.xlane.f32.xlu1 %v4777_v22 }
 0x62f   : > { %5037 = vrot.lane.b32.xlu0 %v8168_v36, %s6899_s24 }
 0x633   : > { %5071 = vrot.lane.b32.xlu1 %v8166_v38, %s6898_s23 }
 0x637   : > { %5080 = vrot.lane.b32.xlu1 %v8166_v38, %s6899_s24 }
 0x63b   : > { %5028 = vrot.lane.b32.xlu1 %v8168_v36, %s6898_s23 }
 0x63f   : > { %5075 = vrot.lane.b32.xlu1 %v8178_v41, %s6898_s23 }
 0x64e   : > { %4808 = vadd.xlane.f32.xlu0 %v4807_v46 }
 0x652   : > { %4784 = vadd.xlane.f32.xlu0 %v4783_v14 }
 0x663   : > { %4814 = vadd.xlane.f32.xlu1 %v4813_v4 }
 0x667   : > { %4811 = vadd.xlane.f32.xlu1 %v4810_v12 }
 0x668   : > { %v5027_v18 = vpop.permute.xlu1 %5026  ;;  %5084 = vrot.lane.b32.xlu0 %v8178_v41, %s6899_s24 }
 0x66c   : > { %v5036_v0 = vpop.permute.xlu1 %5035  ;;  %5073 = vrot.lane.b32.xlu0 %v8190_v43, %s6898_s23  ;;  %v5025_v2 = vpop.permute.xlu0 %5024  ;;  %s6059_s23 = sld [smem:[#allocation2 + $0x6]] }
 0x66d   : > { %v5044_v32 = vsel %vm5042_vm8, %v5027_v18, %v5036_v0 }
 0x66e   : > { %v5047_v19 = vadd.f32 %v5044_v32, %v8143_v63 }
 0x670   : > { %v5053_v34 = vrot.slane %v5047_v19, 1  ;;  %v5034_v33 = vpop.permute.xlu1 %5033  ;;  %5082 = vrot.lane.b32.xlu0 %v8190_v43, %s6899_s24  ;;  %s8521_s24 = sld [smem:[#allocation2 + $0x8]] }
 0x671   : > { %v5043_v54 = vsel %vm5042_vm8, %v5025_v2, %v5034_v33 }
 0x672   : > { %v5063_v10 = vadd.f32 %v5053_v34, %v5047_v19  ;;  %v5046_v9 = vadd.f32 %v5043_v54, %v8147_v6 }
 0x674   : > { %v8206_v5 = vmul.f32 0.25, %v5063_v10  ;;  %v5052_v28 = vrot.slane %v5046_v9, 1 }
 0x676   : > { %v5062_v37 = vadd.f32 %v5052_v28, %v5046_v9  ;;  %5367 = vrot.lane.b32.xlu0 %v8206_v5, %s6900_s22  ;;  %v5117_v61 = vmul.f32 %v8221_v24, %v8206_v5 }
 0x678   : > { %v8210_v40 = vmul.f32 0.25, %v5062_v37  ;;  %v5122_v58 = vsel %vm4776_vm7, %v5117_v61, 0.0 }
 0x67a   : > { %5376 = vrot.lane.b32.xlu0 %v8206_v5, %s6901_s26  ;;  %5365 = vrot.lane.b32.xlu1 %v8210_v40, %s6900_s22  ;;  %v5116_v16 = vmul.f32 %v8221_v24, %v8210_v40 }
 0x67c   : > { %v5119_v26 = vsel %vm4776_vm7, %v5116_v16, 0.0 }
 0x67e   : > { %5374 = vrot.lane.b32.xlu1 %v8210_v40, %s6901_s26 }
 0x699   : > { %5120 = vadd.xlane.f32.xlu0 %v5119_v26 }
 0x6a2   : > { %5123 = vadd.xlane.f32.xlu1 %v5122_v58  ;;  %v4782_v7 = vpop.xlane.xlu0 %4781 }
 0x6a3   : > { %v4792_v33 = vrot.slane %v4782_v7, 4 }
 0x6a5   : > { %v4793_v58 = vadd.f32 %v4792_v33, %v4782_v7  ;;  %v4868_v33 = vmul.f32 %v8190_v43, %v8190_v43 }
 0x6a6   : > { %v5038_v25 = vpop.permute.xlu0 %5037 }
 0x6ab   : > { %v4779_v62 = vpop.xlane.xlu1 %4778 }
 0x6ac   : > { %v4786_v8 = vrot.slane %v4779_v62, 4 }
 0x6ae   : > { %v4787_v13 = vadd.f32 %v4786_v8, %v4779_v62 }
 0x6af   : > { %v5072_v42 = vpop.permute.xlu1 %5071 }
 0x6b0   : > { %v4788_v3 = vrot.slane %v4787_v13, 2 }
 0x6b2   : > { %v4789_v49 = vadd.f32 %v4788_v3, %v4787_v13 }
 0x6b3   : > { %v5081_v44 = vpop.permute.xlu1 %5080 }
 0x6b4   : > { %v5089_v57 = vsel %vm5042_vm8, %v5072_v42, %v5081_v44  ;;  %v4790_v27 = vrot.slane %v4789_v49, 1  ;;  %v4794_v44 = vrot.slane %v4793_v58, 2 }
 0x6b5   : > { %v5092_v48 = vadd.f32 %v5089_v57, %v8166_v38 }
 0x6b6   : > { %v4791_v20 = vadd.f32 %v4790_v27, %v4789_v49 }
 0x6b7   : > { %v5098_v53 = vrot.slane %v5092_v48, 1  ;;  %v5029_v45 = vpop.permute.xlu1 %5028 }
 0x6b8   : > { %v5045_v55 = vsel %vm5042_vm8, %v5029_v45, %v5038_v25  ;;  %v8250_v54 = vmul.f32 %v4791_v20, %v4791_v20 }
 0x6b9   : > { %v5107_v17 = vadd.f32 %v5098_v53, %v5092_v48  ;;  %v5048_v31 = vadd.f32 %v5045_v55, %v8168_v36  ;;  %v4795_v55 = vadd.f32 %v4794_v44, %v4793_v58  ;;  %v5177_v58 = vmul.f32 %v8206_v5, %v8206_v5 }
 0x6ba   : > { %v4869_v44 = vmul.f32 %v8178_v41, %v8178_v41 }
 0x6bb   : > { %v8233_v60 = vmul.f32 0.25, %v5107_v17  ;;  %v5054_v52 = vrot.slane %v5048_v31, 1  ;;  %v5076_v23 = vpop.permute.xlu1 %5075  ;;  %v4796_v3 = vrot.slane %v4795_v55, 1 }
 0x6bd   : > { %v5064_v47 = vadd.f32 %v5054_v52, %v5048_v31  ;;  %5411 = vrot.lane.b32.xlu1 %v8233_v60, %s6900_s22  ;;  %v5146_v22 = vmul.f32 %v8221_v24, %v8233_v60  ;;  %v4797_v27 = vadd.f32 %v4796_v3, %v4795_v55 }
 0x6bf   : > { %v8237_v39 = vmul.f32 0.25, %v5064_v47  ;;  %v5149_v4 = vsel %vm4776_vm7, %v5146_v22, 0.0 }
 0x6c1   : > { %5420 = vrot.lane.b32.xlu1 %v8233_v60, %s6901_s26  ;;  %5378 = vrot.lane.b32.xlu0 %v8237_v39, %s6901_s26 }
 0x6c5   : > { %5369 = vrot.lane.b32.xlu1 %v8237_v39, %s6900_s22 }
 0x6d7   : > { %v4809_v30 = vpop.xlane.xlu0 %4808 }
 0x6d8   : > { %v4816_v56 = vrot.slane %v4809_v30, 4 }
 0x6da   : > { %v4817_v11 = vadd.f32 %v4816_v56, %v4809_v30 }
 0x6db   : > { %v4785_v50 = vpop.xlane.xlu0 %4784 }
 0x6dc   : > { %v4818_v46 = vrot.slane %v4817_v11, 2  ;;  %v4798_v0 = vrot.slane %v4785_v50, 4 }
 0x6de   : > { %v4819_v14 = vadd.f32 %v4818_v46, %v4817_v11  ;;  %v4799_v28 = vadd.f32 %v4798_v0, %v4785_v50 }
 0x6df   : > { %v5085_v1 = vpop.permute.xlu0 %5084 }
 0x6e0   : > { %v4820_v12 = vrot.slane %v4819_v14, 1  ;;  %v5091_v18 = vsel %vm5042_vm8, %v5076_v23, %v5085_v1  ;;  %5150 = vadd.xlane.f32.xlu0 %v5149_v4  ;;  %v4800_v62 = vrot.slane %v4799_v28, 2 }
 0x6e1   : > { %v5094_v32 = vadd.f32 %v5091_v18, %v8178_v41  ;;  %v8282_v18 = vmul.f32 %v4797_v27, %v4797_v27 }
 0x6e2   : > { %v4821_v19 = vadd.f32 %v4820_v12, %v4819_v14  ;;  %v4801_v25 = vadd.f32 %v4800_v62, %v4799_v28 }
 0x6e3   : > { %v5100_v2 = vrot.slane %v5094_v32, 1  ;;  %v5074_v34 = vpop.permute.xlu0 %5073 }
 0x6e4   : > { %v8252_v10 = vmul.f32 %v4821_v19, %v4821_v19  ;;  %v8254_v9 = vmul.f32 %v4821_v19, %v4791_v20  ;;  %v4802_v52 = vrot.slane %v4801_v25, 1 }
 0x6e5   : > { %v5109_v37 = vadd.f32 %v5100_v2, %v5094_v32  ;;  %v4835_v2 = vmul.f32 %v8143_v63, %v8143_v63 }
 0x6e6   : > { %v8258_v16 = vadd.f32 %v8252_v10, %v8250_v54  ;;  %v4803_v49 = vadd.f32 %v4802_v52, %v4801_v25 }
 0x6e7   : > { %v8260_v26 = vmul.f32 0.25, %v5109_v37  ;;  %v5083_v61 = vpop.permute.xlu0 %5082 }
 0x6e8   : > { %v5090_v42 = vsel %vm5042_vm8, %v5074_v34, %v5083_v61  ;;  %v8270_v23 = vmul.f32 %v4803_v49, %v4803_v49  ;;  %v4838_v34 = vmul.f32 %v4835_v2, %v8158_v21  ;;  %v4871_v61 = vmul.f32 %v4868_v33, %v8158_v21 }
 0x6e9   : > { %5415 = vrot.lane.b32.xlu1 %v8260_v26, %s6900_s22  ;;  %v5093_v57 = vadd.f32 %v5090_v42, %v8190_v43  ;;  %v5180_v42 = vmul.f32 %v5177_v58, %v8221_v24 }
 0x6ea   : > { %v4843_v37 = vsel %vm4776_vm7, %v4838_v34, 0.0  ;;  %v4876_v62 = vsel %vm4776_vm7, %v4871_v61, 0.0 }
 0x6eb   : > { %v5099_v17 = vrot.slane %v5093_v57, 1  ;;  %v5368_v28 = vpop.permute.xlu0 %5367  ;;  %v5185_v25 = vsel %vm4776_vm7, %v5180_v42, 0.0 }
 0x6ec   : > { %v4815_v48 = vpop.xlane.xlu1 %4814 }
 0x6ed   : > { %v4828_v53 = vrot.slane %v4815_v48, 4  ;;  %v5108_v30 = vadd.f32 %v5099_v17, %v5093_v57  ;;  %v4867_v17 = vmul.f32 %v8166_v38, %v8166_v38 }
 0x6ef   : > { %v4829_v45 = vadd.f32 %v4828_v53, %v4815_v48  ;;  %v8268_v46 = vmul.f32 0.25, %v5108_v30  ;;  %v5377_v57 = vpop.permute.xlu0 %5376  ;;  %v4834_v48 = vmul.f32 %v8147_v6, %v8147_v6  ;;  %v4872_v53 = vmul.f32 %v4869_v44, %v8158_v21  ;;  %v8347_v44 = vld [vmem:[%s8738_s11] sm:$0xff] }
 0x6f0   : > { %v4812_v31 = vpop.xlane.xlu1 %4811 }
 0x6f1   : > { %v4830_v47 = vrot.slane %v4829_v45, 2  ;;  %v4822_v8 = vrot.slane %v4812_v31, 4  ;;  %v4837_v55 = vmul.f32 %v4834_v48, %v8158_v21  ;;  %v4879_v52 = vsel %vm4776_vm7, %v4872_v53, 0.0 }
 0x6f2   : > { %v5210_v2 = vmul.f32 %v8268_v46, %v8268_v46 }
 0x6f3   : > { %v4831_v7 = vadd.f32 %v4830_v47, %v4829_v45  ;;  %v4823_v13 = vadd.f32 %v4822_v8, %v4812_v31  ;;  %v5384_v45 = vsel %vm4115_vm6, %v5368_v28, %v5377_v57  ;;  %v5148_v47 = vmul.f32 %v8221_v24, %v8260_v26 }
 0x6f4   : > { %v5387_v31 = vadd.f32 %v5384_v45, %v8206_v5  ;;  %v4840_v8 = vsel %vm4776_vm7, %v4837_v55, 0.0  ;;  %v5366_v3 = vpop.permute.xlu1 %5365  ;;  %v5209_v28 = vmul.f32 %v8233_v60, %v8233_v60 }
 0x6f5   : > { %v4832_v56 = vrot.slane %v4831_v7, 1  ;;  %v4824_v11 = vrot.slane %v4823_v13, 2  ;;  %v5155_v30 = vsel %vm4776_vm7, %v5148_v47, 0.0 }
 0x6f6   : > { %5424 = vrot.lane.b32.xlu0 %v8260_v26, %s6901_s26  ;;  %v5212_v48 = vmul.f32 %v5209_v28, %v8221_v24 }
 0x6f7   : > { %v4833_v50 = vadd.f32 %v4832_v56, %v4831_v7  ;;  %v4825_v22 = vadd.f32 %v4824_v11, %v4823_v13  ;;  %v4870_v7 = vmul.f32 %v4867_v17, %v8158_v21  ;;  %v5393_v13 = vrot.slane %v5387_v31, 2 }
 0x6f8   : > { %v5211_v56 = vmul.f32 %v8260_v26, %v8260_v26  ;;  %v5375_v34 = vpop.permute.xlu1 %5374 }
 0x6f9   : > { %v8272_v14 = vmul.f32 %v4833_v50, %v4833_v50  ;;  %v8274_v1 = vmul.f32 %v4833_v50, %v4803_v49  ;;  %v4826_v4 = vrot.slane %v4825_v22, 1  ;;  %v5147_v49 = vmul.f32 %v8221_v24, %v8268_v46 }
 0x6fa   : > { %5413 = vrot.lane.b32.xlu0 %v8268_v46, %s6900_s22  ;;  %v4873_v11 = vsel %vm4776_vm7, %v4870_v7, 0.0  ;;  %v5118_v50 = vmul.f32 %v8221_v24, %v8237_v39  ;;  %v5383_v42 = vsel %vm4115_vm6, %v5366_v3, %v5375_v34  ;;  %v5178_v3 = vmul.f32 %v8237_v39, %v8237_v39 }
 0x6fb   : > { %v8280_v20 = vadd.f32 %v8272_v14, %v8270_v23  ;;  %v4827_v12 = vadd.f32 %v4826_v4, %v4825_v22  ;;  %v5176_v22 = vmul.f32 %v8210_v40, %v8210_v40  ;;  %v5152_v4 = vsel %vm4776_vm7, %v5147_v49, 0.0 }
 0x6fc   : > { %v5125_v61 = vsel %vm4776_vm7, %v5118_v50, 0.0  ;;  %v5386_v53 = vadd.f32 %v5383_v42, %v8210_v40  ;;  %v4900_v49 = vmul.f32 %v8166_v38, %v8147_v6 }
 0x6fd   : > { %v8284_v0 = vmul.f32 %v4827_v12, %v4827_v12  ;;  %v8286_v32 = vmul.f32 %v4827_v12, %v4797_v27  ;;  %v5403_v27 = vadd.f32 %v5393_v13, %v5387_v31  ;;  %v5214_v12 = vmul.f32 %v5211_v56, %v8221_v24 }
 0x6fe   : > { %5422 = vrot.lane.b32.xlu0 %v8268_v46, %s6901_s26  ;;  %v5179_v33 = vmul.f32 %v5176_v22, %v8221_v24  ;;  %v5181_v22 = vmul.f32 %v5178_v3, %v8221_v24 }
 0x6ff   : > { %v8292_v19 = vadd.f32 %v8284_v0, %v8282_v18  ;;  %v5221_v58 = vsel %vm4776_vm7, %v5214_v12, 0.0 }
 0x700   : > { %v5182_v57 = vsel %vm4776_vm7, %v5179_v33, 0.0  ;;  %v5188_v34 = vsel %vm4776_vm7, %v5181_v22, 0.0  ;;  %v4903_v33 = vmul.f32 %v4900_v49, %v8158_v21 }
 0x70d   : > { %4844 = vadd.xlane.f32.xlu1 %v4843_v37  ;;  %v8338_v37 = vmul.f32 0.25, %v5403_v27 }
 0x70f   : > { %v5457_v55 = vmul.f32 %v8347_v44, %v8338_v37  ;;  %v5517_v17 = vmul.f32 %v8338_v37, %v8338_v37 }
 0x711   : > { %4877 = vadd.xlane.f32.xlu1 %v4876_v62  ;;  %v5213_v62 = vmul.f32 %v5210_v2, %v8221_v24  ;;  %v5462_v7 = vsel %vm4776_vm7, %v5457_v55, 0.0  ;;  %v5520_v13 = vmul.f32 %v5517_v17, %v8347_v44 }
 0x713   : > { %v5218_v45 = vsel %vm4776_vm7, %v5213_v62, 0.0  ;;  %v5525_v50 = vsel %vm4776_vm7, %v5520_v13, 0.0  ;;  %v4906_v62 = vsel %vm4776_vm7, %v4903_v33, 0.0  ;;  %v4902_v33 = vmul.f32 %v8178_v41, %v8168_v36 }
 0x715   : > { %5186 = vadd.xlane.f32.xlu1 %v5185_v25  ;;  %v4836_v25 = vmul.f32 %v8168_v36, %v8168_v36 }
 0x717   : > { %v4839_v47 = vmul.f32 %v4836_v25, %v8158_v21 }
 0x719   : > { %4880 = vadd.xlane.f32.xlu1 %v4879_v52  ;;  %v5215_v52 = vsel %vm4776_vm7, %v5212_v48, 0.0 }
 0x71d   : > { %4841 = vadd.xlane.f32.xlu0 %v4840_v8  ;;  %5156 = vadd.xlane.f32.xlu1 %v5155_v30  ;;  %v5392_v8 = vrot.slane %v5386_v53, 2 }
 0x71f   : > { %v5402_v56 = vadd.f32 %v5392_v8, %v5386_v53 }
 0x721   : > { %4874 = vadd.xlane.f32.xlu0 %v4873_v11  ;;  %5153 = vadd.xlane.f32.xlu1 %v5152_v4  ;;  %v4846_v11 = vsel %vm4776_vm7, %v4839_v47, 0.0  ;;  %v5405_v12 = vmul.f32 0.25, %v5402_v56 }
 0x722   : > { %v5121_v27 = vpop.xlane.xlu0 %5120 }
 0x723   : > { %v5456_v42 = vmul.f32 %v8347_v44, %v5405_v12 }
 0x725   : > { %5126 = vadd.xlane.f32.xlu0 %v5125_v61  ;;  %5222 = vadd.xlane.f32.xlu1 %v5221_v58  ;;  %v5459_v55 = vsel %vm4776_vm7, %v5456_v42, 0.0 }
 0x729   : > { %5183 = vadd.xlane.f32.xlu0 %v5182_v57  ;;  %5219 = vadd.xlane.f32.xlu1 %v5218_v45  ;;  %v5516_v57 = vmul.f32 %v5405_v12, %v5405_v12 }
 0x72b   : > { %v8359_v31 = vpop.xlane.xlu1 %5123  ;;  %v5519_v17 = vmul.f32 %v5516_v57, %v8347_v44 }
 0x72d   : > { %5216 = vadd.xlane.f32.xlu0 %v5215_v52  ;;  %5463 = vadd.xlane.f32.xlu1 %v5462_v7  ;;  %v5522_v7 = vsel %vm4776_vm7, %v5519_v17, 0.0 }
 0x72f   : > { %v5412_v30 = vpop.permute.xlu1 %5411 }
 0x731   : > { %4847 = vadd.xlane.f32.xlu0 %v4846_v11  ;;  %5526 = vadd.xlane.f32.xlu1 %v5525_v50 }
 0x733   : > { %v5421_v4 = vpop.permute.xlu1 %5420  ;;  %v5379_v38 = vpop.permute.xlu0 %5378 }
 0x734   : > { %v5429_v2 = vsel %vm4115_vm6, %v5412_v30, %v5421_v4 }
 0x735   : > { %v5432_v6 = vadd.f32 %v5429_v2, %v8233_v60  ;;  %5189 = vadd.xlane.f32.xlu0 %v5188_v34 }
 0x737   : > { %v5438_v28 = vrot.slane %v5432_v6, 2  ;;  %v5370_v61 = vpop.permute.xlu1 %5369 }
 0x738   : > { %v5385_v58 = vsel %vm4115_vm6, %v5370_v61, %v5379_v38  ;;  %v4905_v38 = vmul.f32 %v4902_v33, %v8158_v21  ;;  %v5128_v61 = vrot.slane %v5121_v27, 4 }
 0x739   : > { %v5447_v48 = vadd.f32 %v5438_v28, %v5432_v6  ;;  %v5388_v25 = vadd.f32 %v5385_v58, %v8237_v39  ;;  %4907 = vadd.xlane.f32.xlu0 %v4906_v62 }
 0x73a   : > { %v4912_v28 = vsel %vm4776_vm7, %v4905_v38, 0.0  ;;  %v5129_v58 = vadd.f32 %v5128_v61, %v5121_v27 }
 0x73b   : > { %v5450_v53 = vmul.f32 0.25, %v5447_v48  ;;  %v5394_v45 = vrot.slane %v5388_v25, 2 }
 0x73d   : > { %v5404_v52 = vadd.f32 %v5394_v45, %v5388_v25  ;;  %5460 = vadd.xlane.f32.xlu0 %v5459_v55  ;;  %v8382_v47 = vmul.f32 %v5450_v53, %v5405_v12  ;;  %v5486_v13 = vmul.f32 %v8347_v44, %v5450_v53  ;;  %v5549_v49 = vmul.f32 %v5450_v53, %v5450_v53 }
 0x73e   : > { %v5242_v12 = vmul.f32 %v8233_v60, %v8210_v40  ;;  %v5130_v40 = vrot.slane %v5129_v58, 2 }
 0x73f   : > { %v5407_v8 = vmul.f32 0.25, %v5404_v52  ;;  %v5489_v3 = vsel %vm4776_vm7, %v5486_v13, 0.0  ;;  %v5552_v11 = vmul.f32 %v5549_v49, %v8347_v44 }
 0x740   : > { %v5245_v34 = vmul.f32 %v5242_v12, %v8221_v24  ;;  %v5131_v62 = vadd.f32 %v5130_v40, %v5129_v58 }
 0x741   : > { %5523 = vadd.xlane.f32.xlu0 %v5522_v7  ;;  %v5458_v30 = vmul.f32 %v8347_v44, %v5407_v8  ;;  %v5518_v50 = vmul.f32 %v5407_v8, %v5407_v8  ;;  %v5555_v22 = vsel %vm4776_vm7, %v5552_v11, 0.0 }
 0x742   : > { %v5248_v6 = vsel %vm4776_vm7, %v5245_v34, 0.0  ;;  %v5132_v53 = vrot.slane %v5131_v62, 1 }
 0x743   : > { %v5465_v56 = vsel %vm4776_vm7, %v5458_v30, 0.0  ;;  %v5521_v4 = vmul.f32 %v5518_v50, %v8347_v44 }
 0x744   : > { %v5133_v7 = vadd.f32 %v5132_v53, %v5131_v62 }
 0x745   : > { %5490 = vadd.xlane.f32.xlu0 %v5489_v3  ;;  %v5528_v2 = vsel %vm4776_vm7, %v5521_v4, 0.0 }
 0x749   : > { %5466 = vadd.xlane.f32.xlu0 %v5465_v56  ;;  %v8403_v56 = vmul.f32 %v5133_v7, %v5133_v7 }
 0x74d   : > { %5556 = vadd.xlane.f32.xlu0 %v5555_v22 }
 0x751   : > { %5529 = vadd.xlane.f32.xlu0 %v5528_v2 }
 0x755   : > { %5249 = vadd.xlane.f32.xlu0 %v5248_v6 }
 0x759   : > { %4913 = vadd.xlane.f32.xlu0 %v4912_v28 }
 0x75b   : > { %v5416_v48 = vpop.permute.xlu1 %5415 }
 0x769   : > { %v5151_v60 = vpop.xlane.xlu0 %5150 }
 0x76a   : > { %v5158_v42 = vrot.slane %v5151_v60, 4 }
 0x76c   : > { %v5159_v57 = vadd.f32 %v5158_v42, %v5151_v60 }
 0x76d   : > { %v5425_v25 = vpop.permute.xlu0 %5424 }
 0x76e   : > { %v5160_v36 = vrot.slane %v5159_v57, 2  ;;  %v5431_v41 = vsel %vm4115_vm6, %v5416_v48, %v5425_v25 }
 0x76f   : > { %v5434_v45 = vadd.f32 %v5431_v41, %v8260_v26 }
 0x770   : > { %v5161_v55 = vadd.f32 %v5160_v36, %v5159_v57 }
 0x771   : > { %v5440_v17 = vrot.slane %v5434_v45, 2  ;;  %v5414_v52 = vpop.permute.xlu0 %5413 }
 0x772   : > { %v5162_v13 = vrot.slane %v5161_v55, 1 }
 0x773   : > { %v5449_v3 = vadd.f32 %v5440_v17, %v5434_v45 }
 0x774   : > { %v5163_v27 = vadd.f32 %v5162_v13, %v5161_v55  ;;  %v5243_v55 = vmul.f32 %v8268_v46, %v8206_v5 }
 0x775   : > { %v5452_v30 = vmul.f32 0.25, %v5449_v3  ;;  %v5423_v49 = vpop.permute.xlu0 %5422 }
 0x776   : > { %v8405_v11 = vmul.f32 %v5163_v27, %v5163_v27  ;;  %v8407_v50 = vmul.f32 %v5163_v27, %v5133_v7  ;;  %v5430_v22 = vsel %vm4115_vm6, %v5414_v52, %v5423_v49  ;;  %v5246_v52 = vmul.f32 %v5243_v55, %v8221_v24 }
 0x777   : > { %v5433_v4 = vadd.f32 %v5430_v22, %v8268_v46  ;;  %v5488_v12 = vmul.f32 %v8347_v44, %v5452_v30  ;;  %v5551_v28 = vmul.f32 %v5452_v30, %v5452_v30  ;;  %v5584_v40 = vmul.f32 %v5452_v30, %v5407_v8 }
 0x778   : > { %v8414_v2 = vadd.f32 %v8405_v11, %v8403_v56 }
 0x779   : > { %v5439_v34 = vrot.slane %v5433_v4, 2  ;;  %v5495_v33 = vsel %vm4776_vm7, %v5488_v12, 0.0  ;;  %v5554_v42 = vmul.f32 %v5551_v28, %v8347_v44  ;;  %v5587_v25 = vmul.f32 %v5584_v40, %v8347_v44 }
 0x77a   : > { %5496 = vadd.xlane.f32.xlu1 %v5495_v33 }
 0x77b   : > { %v5448_v6 = vadd.f32 %v5439_v34, %v5433_v4  ;;  %v5561_v53 = vsel %vm4776_vm7, %v5554_v42, 0.0  ;;  %v5594_v8 = vsel %vm4776_vm7, %v5587_v25, 0.0 }
 0x77d   : > { %v5451_v38 = vmul.f32 0.25, %v5448_v6 }
 0x77f   : > { %v5487_v61 = vmul.f32 %v8347_v44, %v5451_v38  ;;  %v5583_v58 = vmul.f32 %v5451_v38, %v8338_v37  ;;  %v5550_v57 = vmul.f32 %v5451_v38, %v5451_v38  ;;  %v4901_v37 = vmul.f32 %v8190_v43, %v8143_v63 }
 0x780   : > { %v5251_v63 = vsel %vm4776_vm7, %v5246_v52, 0.0  ;;  %v5585_v43 = vmul.f32 %v8382_v47, %v8347_v44 }
 0x781   : > { %v5492_v60 = vsel %vm4776_vm7, %v5487_v61, 0.0  ;;  %v5586_v62 = vmul.f32 %v5583_v58, %v8347_v44  ;;  %v5553_v36 = vmul.f32 %v5550_v57, %v8347_v44  ;;  %v4904_v45 = vmul.f32 %v4901_v37, %v8158_v21 }
 0x782   : > { %5493 = vadd.xlane.f32.xlu1 %v5492_v60  ;;  %v5244_v21 = vmul.f32 %v8260_v26, %v8237_v39  ;;  %v5588_v5 = vsel %vm4776_vm7, %v5585_v43, 0.0 }
 0x783   : > { %v5591_v48 = vsel %vm4776_vm7, %v5586_v62, 0.0  ;;  %v5558_v41 = vsel %vm4776_vm7, %v5553_v36, 0.0  ;;  %v4909_v17 = vsel %vm4776_vm7, %v4904_v45, 0.0 }
 0x784   : > { %5592 = vadd.xlane.f32.xlu0 %v5591_v48 }
 0x786   : > { %5562 = vadd.xlane.f32.xlu1 %v5561_v53 }
 0x788   : > { %5595 = vadd.xlane.f32.xlu0 %v5594_v8 }
 0x78a   : > { %5559 = vadd.xlane.f32.xlu1 %v5558_v41 }
 0x78c   : > { %2308 = vadd.xlane.f32.xlu0 %v8049_v51  ;;  %v5247_v51 = vmul.f32 %v5244_v21, %v8221_v24 }
 0x78e   : > { %4910 = vadd.xlane.f32.xlu1 %v4909_v17  ;;  %v5254_v3 = vsel %vm4776_vm7, %v5247_v51, 0.0 }
 0x790   : > { %4135 = vadd.xlane.f32.xlu0 %v8138_v35 }
 0x792   : > { %5252 = vadd.xlane.f32.xlu1 %v5251_v63 }
 0x796   : > { %5589 = vadd.xlane.f32.xlu1 %v5588_v5  ;;  %v4845_v46 = vpop.xlane.xlu1 %4844 }
 0x797   : > { %v4855_v7 = vrot.slane %v4845_v46, 4 }
 0x799   : > { %v4856_v13 = vadd.f32 %v4855_v7, %v4845_v46 }
 0x79a   : > { %5255 = vadd.xlane.f32.xlu1 %v5254_v3  ;;  %v4878_v35 = vpop.xlane.xlu1 %4877 }
 0x79b   : > { %v4857_v27 = vrot.slane %v4856_v13, 2  ;;  %v4888_v30 = vrot.slane %v4878_v35, 4 }
 0x79d   : > { %v4858_v49 = vadd.f32 %v4857_v27, %v4856_v13  ;;  %v4889_v44 = vadd.f32 %v4888_v30, %v4878_v35 }
 0x79e   : > { %2282 = vadd.xlane.f32.xlu1 %v8054_v59  ;;  %v8451_v28 = vpop.xlane.xlu1 %5186 }
 0x79f   : > { %v4859_v39 = vrot.slane %v4858_v49, 1  ;;  %v4890_v26 = vrot.slane %v4889_v44, 2 }
 0x7a1   : > { %v4891_v47 = vadd.f32 %v4890_v26, %v4889_v44  ;;  %v4860_v24 = vadd.f32 %v4859_v39, %v4858_v49 }
 0x7a2   : > { %4121 = vadd.xlane.f32.xlu1 %v8141_v15  ;;  %v4881_v42 = vpop.xlane.xlu1 %4880 }
 0x7a3   : > { %v4892_v22 = vrot.slane %v4891_v47, 1  ;;  %v4943_v34 = vsub.f32 %v4860_v24, %v8282_v18  ;;  %v4894_v25 = vrot.slane %v4881_v42, 4 }
 0x7a5   : > { %v4893_v4 = vadd.f32 %v4892_v22, %v4891_v47  ;;  %v4895_v41 = vadd.f32 %v4894_v25, %v4881_v42 }
 0x7a6   : > { %v4842_v12 = vpop.xlane.xlu0 %4841 }
 0x7a7   : > { %v4946_v33 = vsub.f32 %v4893_v4, %v8284_v0  ;;  %v4849_v6 = vrot.slane %v4842_v12, 4  ;;  %v4896_v51 = vrot.slane %v4895_v41, 2 }
 0x7a9   : > { %v8449_v38 = vadd.f32 %v4946_v33, %v4943_v34  ;;  %v4850_v61 = vadd.f32 %v4849_v6, %v4842_v12  ;;  %v4897_v35 = vadd.f32 %v4896_v51, %v4895_v41  ;;  %v8462_v34 = vstv %s6057_s20  ;;  %s5848_s20 = sshll.u32 %s8767_s19, 3 }
 0x7aa   : > { %v4875_v59 = vpop.xlane.xlu0 %4874  ;;  %v5134_v51 = vrot.slane %v8359_v31, 4 }
 0x7ab   : > { %v4851_v58 = vrot.slane %v4850_v61, 2  ;;  %v4882_v40 = vrot.slane %v4875_v59, 4 }
 0x7ad   : > { %v4852_v60 = vadd.f32 %v4851_v58, %v4850_v61  ;;  %v4883_v62 = vadd.f32 %v4882_v40, %v4875_v59 }
 0x7ae   : > { %v8453_v15 = vpop.xlane.xlu0 %5126 }
 0x7af   : > { %v4853_v57 = vrot.slane %v4852_v60, 1  ;;  %v4884_v48 = vrot.slane %v4883_v62, 2 }
 0x7b1   : > { %v4885_v18 = vadd.f32 %v4884_v48, %v4883_v62  ;;  %v4854_v36 = vadd.f32 %v4853_v57, %v4852_v60  ;;  %v4983_v62 = vadd.f32 %v8258_v16, %v8462_v34  ;;  %v4970_v16 = vmul.f32 2.0, %v8254_v9 }
 0x7b2   : > { %v5184_v53 = vpop.xlane.xlu0 %5183 }
 0x7b3   : > { %v5191_v0 = vrot.slane %v5184_v53, 4  ;;  %v4886_v37 = vrot.slane %v4885_v18, 1  ;;  %v4942_v63 = vsub.f32 %v4854_v36, %v8250_v54  ;;  %v8459_v54 = vstv %s6058_s17 }
 0x7b5   : > { %v5192_v8 = vadd.f32 %v5191_v0, %v5184_v53  ;;  %v4887_v45 = vadd.f32 %v4886_v37, %v4885_v18 }
 0x7b6   : > { %v5217_v55 = vpop.xlane.xlu0 %5216 }
 0x7b7   : > { %v5193_v17 = vrot.slane %v5192_v8, 2  ;;  %v5224_v52 = vrot.slane %v5217_v55, 4  ;;  %v4945_v43 = vsub.f32 %v4887_v45, %v8252_v10  ;;  %v4898_v10 = vrot.slane %v4897_v35, 1 }
 0x7b9   : > { %v5194_v21 = vadd.f32 %v5193_v17, %v5192_v8  ;;  %v5225_v5 = vadd.f32 %v5224_v52, %v5217_v55  ;;  %v4958_v46 = vadd.f32 %v4945_v43, %v4942_v63  ;;  %v4899_v58 = vadd.f32 %v4898_v10, %v4897_v35  ;;  %v5157_v63 = vpop.xlane.xlu1 %5156 }
 0x7ba   : > { %v4848_v7 = vpop.xlane.xlu0 %4847 }
 0x7bb   : > { %v5195_v13 = vrot.slane %v5194_v21, 1  ;;  %v5226_v3 = vrot.slane %v5225_v5, 2  ;;  %v4861_v27 = vrot.slane %v4848_v7, 4  ;;  %v4961_v22 = vadd.f32 %v4958_v46, %v8459_v54 }
 0x7bc   : > { %v4947_v18 = vsub.f32 %v4899_v58, %v8272_v14 }
 0x7bd   : > { %v5227_v49 = vadd.f32 %v5226_v3, %v5225_v5  ;;  %v4862_v44 = vadd.f32 %v4861_v27, %v4848_v7  ;;  %v5196_v39 = vadd.f32 %v5195_v13, %v5194_v21  ;;  %6832 = vrcp.f32 %v4961_v22  ;;  %v5154_v46 = vpop.xlane.xlu1 %5153 }
 0x7be   : > { %v8457_v30 = vpop.xlane.xlu0 %5189  ;;  %6834 = vrcp.f32 %v4983_v62  ;;  %v8492_v13 = vstv %s6060_s21  ;;  %v5135_v27 = vadd.f32 %v5134_v51, %v8359_v31  ;;  %v4985_v31 = vadd.f32 %v8280_v20, %v8462_v34 }
 0x7bf   : > { %v5228_v26 = vrot.slane %v5227_v49, 1  ;;  %v4863_v47 = vrot.slane %v4862_v44, 2  ;;  %v5284_v6 = vsub.f32 %v5196_v39, %v8403_v56  ;;  %v5140_v62 = vrot.slane %v8453_v15, 4 }
 0x7c1   : > { %v5229_v4 = vadd.f32 %v5228_v26, %v5227_v49  ;;  %v4864_v33 = vadd.f32 %v4863_v47, %v4862_v44  ;;  %v8496_v49 = vstv %s6059_s23  ;;  %v5197_v26 = vrot.slane %v8451_v28, 4  ;;  %v5223_v10 = vpop.xlane.xlu1 %5222  ;;  %s543_s23 = scalar_lea.vmem %s8741_s14, %s5848_s20 }
 0x7c2   : > { %v4908_v24 = vpop.xlane.xlu0 %4907  ;;  %v5325_v22 = vadd.f32 %v8414_v2, %v8496_v49 }
 0x7c3   : > { %v4915_v12 = vrot.slane %v4908_v24, 4  ;;  %v5287_v61 = vsub.f32 %v5229_v4, %v8405_v11  ;;  %v4865_v40 = vrot.slane %v4864_v33, 1 }
 0x7c5   : > { %v4916_v59 = vadd.f32 %v4915_v12, %v4908_v24  ;;  %v5300_v42 = vadd.f32 %v5287_v61, %v5284_v6  ;;  %v4866_v48 = vadd.f32 %v4865_v40, %v4864_v33  ;;  %v5136_v12 = vrot.slane %v5135_v27, 2  ;;  %v5220_v2 = vpop.xlane.xlu1 %5219 }
 0x7c6   : > { %v8466_v60 = vpop.xlane.xlu0 %5460  ;;  %v5164_v6 = vrot.slane %v5154_v46, 4  ;;  %v5170_v40 = vrot.slane %v5157_v63, 4 }
 0x7c7   : > { %v4917_v57 = vrot.slane %v4916_v59, 2  ;;  %v4944_v53 = vsub.f32 %v4866_v48, %v8270_v23  ;;  %v4974_v23 = vadd.f32 %v8462_v34, %v4970_v16  ;;  %v5303_v3 = vadd.f32 %v5300_v42, %v8492_v13 }
 0x7c8   : > { %v5171_v20 = vadd.f32 %v5170_v40, %v5157_v63  ;;  %v4971_v16 = vmul.f32 2.0, %v8286_v32  ;;  %v5203_v63 = vrot.slane %v8457_v30, 4 }
 0x7c9   : > { %v4918_v25 = vadd.f32 %v4917_v57, %v4916_v59  ;;  %v4960_v0 = vadd.f32 %v4947_v18, %v4944_v53  ;;  %6836 = vrcp.f32 %v5303_v3  ;;  %v5198_v59 = vadd.f32 %v5197_v26, %v8451_v28 }
 0x7ca   : > { %v8472_v56 = vpop.xlane.xlu0 %5523  ;;  %v6833_v14 = vpop.eup %6832  ;;  %v5137_v57 = vadd.f32 %v5136_v12, %v5135_v27  ;;  %v4972_v53 = vmul.f32 2.0, %v8274_v1  ;;  %v5141_v28 = vadd.f32 %v5140_v62, %v8453_v15  ;;  %v5172_v3 = vrot.slane %v5171_v20, 2 }
 0x7cb   : > { %v4919_v11 = vrot.slane %v4918_v25, 1  ;;  %v6835_v21 = vpop.eup %6834  ;;  %v4963_v47 = vadd.f32 %v4960_v0, %v8459_v54  ;;  %v8518_v26 = vadd.f32 %v8462_v34, %v4971_v16 }
 0x7cd   : > { %v4920_v36 = vadd.f32 %v4919_v11, %v4918_v25  ;;  %6838 = vrcp.f32 %v4963_v47  ;;  %v5165_v25 = vadd.f32 %v5164_v6, %v5154_v46  ;;  %v5199_v11 = vrot.slane %v5198_v59, 2 }
 0x7ce   : > { %v8474_v37 = vpop.xlane.xlu0 %5490  ;;  %6840 = vrcp.f32 %v5325_v22 }
 0x7cf   : > { %v4948_v8 = vsub.f32 %v4920_v36, %v8254_v9  ;;  %6842 = vrcp.f32 %v4985_v31  ;;  %v5230_v36 = vrot.slane %v5220_v2, 4  ;;  %v5200_v46 = vadd.f32 %v5199_v11, %v5198_v59 }
 0x7d0   : > { %v5498_v6 = vrot.slane %v8474_v37, 4  ;;  %v5173_v31 = vadd.f32 %v5172_v3, %v5171_v20 }
 0x7d1   : > { %v4951_v41 = vmul.f32 2.0, %v4948_v8  ;;  %v5231_v27 = vadd.f32 %v5230_v36, %v5220_v2  ;;  %v5201_v12 = vrot.slane %v5200_v46, 1 }
 0x7d2   : > { %v8478_v45 = vpop.xlane.xlu0 %5466  ;;  %v5499_v20 = vadd.f32 %v5498_v6, %v8474_v37  ;;  %v5174_v16 = vrot.slane %v5173_v31, 1 }
 0x7d3   : > { %v4955_v55 = vadd.f32 %v8459_v54, %v4951_v41  ;;  %v4984_v41 = vadd.f32 %v8292_v19, %v8462_v34 }
 0x7d5   : > { %v8482_v17 = vmul.f32 %v6833_v14, %v4955_v55  ;;  %v5138_v55 = vrot.slane %v5137_v57, 1  ;;  %6844 = vrcp.f32 %v4984_v41 }
 0x7d6   : > { %v8484_v52 = vpop.xlane.xlu0 %5556 }
 0x7d7   : > { %v4977_v43 = vmul.f32 %v4974_v23, %v8482_v17  ;;  %v5312_v23 = vmul.f32 2.0, %v8407_v50 }
 0x7d9   : > { %v8487_v5 = vmul.f32 %v6835_v21, %v4977_v43  ;;  %v5166_v43 = vrot.slane %v5165_v25, 2  ;;  %v5236_v21 = vrot.slane %v5223_v10, 4 }
 0x7da   : > { %v8489_v9 = vpop.xlane.xlu0 %5529 }
 0x7db   : > { %v5167_v22 = vadd.f32 %v5166_v43, %v5165_v25 }
 0x7de   : > { %v5250_v7 = vpop.xlane.xlu0 %5249 }
 0x7df   : > { %v5257_v35 = vrot.slane %v5250_v7, 4 }
 0x7e1   : > { %v5258_v44 = vadd.f32 %v5257_v35, %v5250_v7  ;;  %v4976_v7 = vadd.f32 %v8462_v34, %v4972_v53  ;;  %v5142_v35 = vrot.slane %v5141_v28, 2 }
 0x7e2   : > { %v4914_v39 = vpop.xlane.xlu0 %4913 }
 0x7e3   : > { %v4927_v24 = vrot.slane %v4914_v39, 4  ;;  %v5259_v4 = vrot.slane %v5258_v44, 2  ;;  %v5143_v59 = vadd.f32 %v5142_v35, %v5141_v28  ;;  %v8553_v35 = vstv %s8527_s25 }
 0x7e5   : > { %v4928_v33 = vadd.f32 %v4927_v24, %v4914_v39  ;;  %v5260_v61 = vadd.f32 %v5259_v4, %v5258_v44  ;;  %v5464_v44 = vpop.xlane.xlu1 %5463  ;;  %v6837_v39 = vpop.eup %6836  ;;  %v5316_v24 = vadd.f32 %v8496_v49, %v5312_v23  ;;  %v5237_v4 = vadd.f32 %v5236_v21, %v5223_v10 }
 0x7e6   : > { %v5144_v41 = vrot.slane %v5143_v59, 1 }
 0x7e7   : > { %v4929_v58 = vrot.slane %v4928_v33, 2  ;;  %v5261_v42 = vrot.slane %v5260_v61, 1 }
 0x7e9   : > { %v4930_v48 = vadd.f32 %v4929_v58, %v4928_v33  ;;  %v5262_v18 = vadd.f32 %v5261_v42, %v5260_v61  ;;  %v5204_v33 = vadd.f32 %v5203_v63, %v8457_v30  ;;  %v6839_v61 = vpop.eup %6838  ;;  %v5232_v58 = vrot.slane %v5231_v27, 2  ;;  %v5527_v25 = vpop.xlane.xlu1 %5526 }
 0x7ea   : > { %v6841_v10 = vpop.eup %6840  ;;  %v5474_v42 = vrot.slane %v5464_v44, 4  ;;  %v5168_v30 = vrot.slane %v5167_v22, 1  ;;  %v5537_v23 = vrot.slane %v5527_v25, 4 }
 0x7eb   : > { %v4931_v0 = vrot.slane %v4930_v48, 1  ;;  %v5290_v8 = vsub.f32 %v5262_v18, %v8407_v50  ;;  %v5139_v50 = vadd.f32 %v5138_v55, %v5137_v57  ;;  %v5468_v57 = vrot.slane %v8466_v60, 4  ;;  %v6843_v36 = vpop.eup %6842 }
 0x7ec   : > { %v5564_v18 = vrot.slane %v8484_v52, 4  ;;  %v5205_v11 = vrot.slane %v5204_v33, 2  ;;  %v5233_v55 = vadd.f32 %v5232_v58, %v5231_v27  ;;  %v4962_v27 = vadd.f32 %v8449_v38, %v8459_v54 }
 0x7ed   : > { %v4932_v14 = vadd.f32 %v4931_v0, %v4930_v48  ;;  %v5293_v51 = vmul.f32 2.0, %v5290_v8  ;;  %v8531_v62 = vmul.f32 %v5139_v50, %v5139_v50  ;;  %v5238_v48 = vrot.slane %v5237_v4, 2 }
 0x7ee   : > { %v5531_v0 = vrot.slane %v8472_v56, 4  ;;  %v8542_v8 = vadd.f32 %v5201_v12, %v5200_v46  ;;  %v5469_v43 = vadd.f32 %v5468_v57, %v8466_v60  ;;  %v5565_v37 = vadd.f32 %v5564_v18, %v8484_v52 }
 0x7ef   : > { %v4950_v15 = vsub.f32 %v4932_v14, %v8274_v1  ;;  %v5297_v19 = vadd.f32 %v8492_v13, %v5293_v51  ;;  %v5475_v14 = vadd.f32 %v5474_v42, %v5464_v44  ;;  %v5169_v51 = vadd.f32 %v5168_v30, %v5167_v22 }
 0x7f0   : > { %v5239_v63 = vadd.f32 %v5238_v48, %v5237_v4  ;;  %v5532_v3 = vadd.f32 %v5531_v0, %v8472_v56  ;;  %v5500_v46 = vrot.slane %v5499_v20, 2  ;;  %v5285_v60 = vsub.f32 %v8542_v8, %v8531_v62  ;;  %v8559_v4 = vpop.eup %6844 }
 0x7f1   : > { %v4953_v47 = vmul.f32 2.0, %v4950_v15  ;;  %v8523_v1 = vmul.f32 %v6837_v39, %v5297_v19  ;;  %v8548_v15 = vstv %s8521_s24  ;;  %v5175_v44 = vadd.f32 %v5174_v16, %v5173_v31 }
 0x7f2   : > { %v5145_v19 = vadd.f32 %v5144_v41, %v5143_v59  ;;  %v5234_v39 = vrot.slane %v5233_v55, 1  ;;  %v5470_v22 = vrot.slane %v5469_v43, 2  ;;  %v8561_v52 = vmul.f32 %v5169_v51, %v5139_v50 }
 0x7f3   : > { %v4957_v34 = vadd.f32 %v8459_v54, %v4953_v47  ;;  %v5319_v40 = vmul.f32 %v5316_v24, %v8523_v1  ;;  %v5476_v47 = vrot.slane %v5475_v14, 2  ;;  %v5538_v24 = vadd.f32 %v5537_v23, %v5527_v25 }
 0x7f4   : > { %v5240_v56 = vrot.slane %v5239_v63, 1  ;;  %v5480_v12 = vrot.slane %v8478_v45, 4  ;;  %v5279_v6 = vmul.f32 %v5169_v51, %v5169_v51  ;;  %v5533_v38 = vrot.slane %v5532_v3, 2 }
 0x7f5   : > { %v8534_v2 = vmul.f32 %v6839_v61, %v4957_v34  ;;  %v8537_v53 = vmul.f32 %v6841_v10, %v5319_v40  ;;  %v5501_v61 = vadd.f32 %v5500_v46, %v5499_v20  ;;  %6846 = vrcp.f32 %v4962_v27 }
 0x7f6   : > { %v5280_v58 = vmul.f32 %v5175_v44, %v5175_v44  ;;  %v5277_v31 = vmul.f32 %v5145_v19, %v5145_v19  ;;  %v5543_v59 = vrot.slane %v8489_v9, 4  ;;  %v5235_v40 = vadd.f32 %v5234_v39, %v5233_v55 }
 0x7f7   : > { %v4979_v28 = vmul.f32 %v4976_v7, %v8534_v2  ;;  %v5206_v7 = vadd.f32 %v5205_v11, %v5204_v33  ;;  %v5566_v33 = vrot.slane %v5565_v37, 2  ;;  %v5477_v10 = vadd.f32 %v5476_v47, %v5475_v14 }
 0x7f8   : > { %v5539_v42 = vrot.slane %v5538_v24, 2  ;;  %v5471_v57 = vadd.f32 %v5470_v22, %v5469_v43  ;;  %v5313_v50 = vmul.f32 2.0, %v8561_v52  ;;  %v5241_v30 = vadd.f32 %v5240_v56, %v5239_v63 }
 0x7f9   : > { %v8545_v21 = vmul.f32 %v6843_v36, %v4979_v28  ;;  %v5207_v34 = vrot.slane %v5206_v7, 1  ;;  %v5481_v48 = vadd.f32 %v5480_v12, %v8478_v45  ;;  %v5567_v25 = vadd.f32 %v5566_v33, %v5565_v37 }
 0x7fa   : > { %v5323_v18 = vadd.f32 %v5279_v6, %v8531_v62  ;;  %v5534_v0 = vadd.f32 %v5533_v38, %v5532_v3  ;;  %v5502_v20 = vrot.slane %v5501_v61, 1  ;;  %v8568_v36 = vmul.f32 %v5175_v44, %v5145_v19 }
 0x7fb   : > { %v5208_v11 = vadd.f32 %v5207_v34, %v5206_v7  ;;  %v5324_v8 = vadd.f32 %v5280_v58, %v5277_v31  ;;  %v5544_v16 = vadd.f32 %v5543_v59, %v8489_v9  ;;  %v5288_v55 = vsub.f32 %v5235_v40, %v5279_v6 }
 0x7fc   : > { %v5478_v14 = vrot.slane %v5477_v10, 1  ;;  %v5540_v23 = vadd.f32 %v5539_v42, %v5538_v24  ;;  %v5472_v43 = vrot.slane %v5471_v57, 1  ;;  %v5289_v51 = vsub.f32 %v5241_v30, %v5280_v58 }
 0x7fd   : > { %v5482_v63 = vrot.slane %v5481_v48, 2  ;;  %v5568_v45 = vrot.slane %v5567_v25, 1  ;;  %v5326_v62 = vadd.f32 %v5323_v18, %v8496_v49  ;;  %v5286_v7 = vsub.f32 %v5208_v11, %v5277_v31 }
 0x7fe   : > { %v5535_v3 = vrot.slane %v5534_v0, 1  ;;  %v5503_v46 = vadd.f32 %v5502_v20, %v5501_v61  ;;  %v8573_v27 = vadd.f32 %v8496_v49, %v5313_v50  ;;  %v5327_v44 = vadd.f32 %v5324_v8, %v8496_v49 }
 0x7ff   : > { %v5545_v9 = vrot.slane %v5544_v16, 2  ;;  %v5301_v39 = vadd.f32 %v5288_v55, %v5285_v60  ;;  %v8576_v47 = vadd.f32 %v5478_v14, %v5477_v10  ;;  %v5541_v24 = vrot.slane %v5540_v23, 1 }
 0x800   : > { %v5473_v22 = vadd.f32 %v5472_v43, %v5471_v57  ;;  %v5314_v56 = vmul.f32 2.0, %v8568_v36  ;;  %v5483_v12 = vadd.f32 %v5482_v63, %v5481_v48  ;;  %v5569_v33 = vadd.f32 %v5568_v45, %v5567_v25 }
 0x801   : > { %6848 = vrcp.f32 %v5326_v62  ;;  %v5302_v34 = vadd.f32 %v5289_v51, %v5286_v7  ;;  %v5536_v38 = vadd.f32 %v5535_v3, %v5534_v0  ;;  %v5618_v61 = vmul.f32 %v5503_v46, %v5503_v46 }
 0x802   : > { %6850 = vrcp.f32 %v5327_v44  ;;  %v5546_v31 = vadd.f32 %v5545_v9, %v5544_v16  ;;  %v8579_v60 = vpop.eup %6846  ;;  %v5304_v10 = vadd.f32 %v5301_v39, %v8492_v13  ;;  %v8584_v42 = vmul.f32 %v8576_v47, %v8576_v47 }
 0x803   : > { %v5497_v28 = vpop.xlane.xlu1 %5496  ;;  %v8586_v57 = vadd.f32 %v5541_v24, %v5540_v23  ;;  %v5615_v50 = vmul.f32 %v5473_v22, %v5473_v22  ;;  %v5484_v48 = vrot.slane %v5483_v12, 1  ;;  %v5627_v25 = vsub.f32 %v5569_v33, %v5618_v61 }
 0x804   : > { %v5510_v41 = vrot.slane %v5497_v28, 4  ;;  %v5305_v0 = vadd.f32 %v5302_v34, %v8492_v13  ;;  %6852 = vrcp.f32 %v5304_v10  ;;  %v8594_v45 = vadd.f32 %v8496_v49, %v5314_v56 }
 0x805   : > { %v5624_v20 = vsub.f32 %v5536_v38, %v5615_v50  ;;  %v5662_v8 = vadd.f32 %v5618_v61, %v5615_v50  ;;  %v5625_v23 = vsub.f32 %v8586_v57, %v8584_v42  ;;  %v8600_v49 = vsel %vm4992_vm9, %v8482_v17, 0.0 }
 0x806   : > { %v5511_v37 = vadd.f32 %v5510_v41, %v5497_v28  ;;  %v8589_v28 = vmul.f32 %v5503_v46, %v5473_v22  ;;  %v5547_v41 = vrot.slane %v5546_v31, 1  ;;  %6854 = vrcp.f32 %v5305_v0 }
 0x807   : > { %v5640_v62 = vadd.f32 %v5627_v25, %v5624_v20  ;;  %v5665_v39 = vadd.f32 %v5662_v8, %v8548_v15  ;;  %v8608_v50 = vsel %vm4992_vm9, %v8487_v5, 0.0  ;;  %v8618_v5 = vsel %vm4992_vm9, %v8523_v1, 0.0 }
 0x808   : > { %v5512_v19 = vrot.slane %v5511_v37, 2  ;;  %v5652_v46 = vmul.f32 2.0, %v8589_v28  ;;  %v5548_v24 = vadd.f32 %v5547_v41, %v5546_v31 }
 0x809   : > { %6856 = vrcp.f32 %v5665_v39 }
 0x80a   : > { %v5513_v6 = vadd.f32 %v5512_v19, %v5511_v37  ;;  %v5485_v37 = vadd.f32 %v5484_v48, %v5483_v12  ;;  %v5643_v12 = vadd.f32 %v5640_v62, %v8553_v35 }
 0x80b   : > { %v5494_v58 = vpop.xlane.xlu1 %5493 }
 0x80c   : > { %v5514_v59 = vrot.slane %v5513_v6, 1  ;;  %v5504_v40 = vrot.slane %v5494_v58, 4  ;;  %v5617_v56 = vmul.f32 %v5485_v37, %v5485_v37  ;;  %6858 = vrcp.f32 %v5643_v12 }
 0x80d   : > { %v5593_v30 = vpop.xlane.xlu0 %5592 }
 0x80e   : > { %v5505_v18 = vadd.f32 %v5504_v40, %v5494_v58  ;;  %v5603_v11 = vrot.slane %v5593_v30, 4  ;;  %v5515_v55 = vadd.f32 %v5514_v59, %v5513_v6  ;;  %v8604_v59 = vadd.f32 %v8548_v15, %v5652_v46 }
 0x80f   : > { %v5563_v16 = vpop.xlane.xlu1 %5562  ;;  %v5626_v17 = vsub.f32 %v5548_v24, %v5617_v56 }
 0x810   : > { %v5506_v14 = vrot.slane %v5505_v18, 2  ;;  %v5604_v43 = vadd.f32 %v5603_v11, %v5593_v30  ;;  %v5576_v51 = vrot.slane %v5563_v16, 4  ;;  %v5620_v22 = vmul.f32 %v5515_v55, %v5515_v55  ;;  %v8610_v30 = vpop.eup %6848 }
 0x811   : > { %v5596_v63 = vpop.xlane.xlu0 %5595  ;;  %v8612_v11 = vpop.eup %6850  ;;  %v8614_v0 = vmul.f32 %v5515_v55, %v5485_v37  ;;  %v8623_v55 = vsel %vm4992_vm9, %v8534_v2, 0.0  ;;  %v8627_v37 = vsel %vm4992_vm9, %v8545_v21, 0.0 }
 0x812   : > { %v5507_v7 = vadd.f32 %v5506_v14, %v5505_v18  ;;  %v5605_v3 = vrot.slane %v5604_v43, 2  ;;  %v5577_v44 = vadd.f32 %v5576_v51, %v5563_v16  ;;  %v5609_v9 = vrot.slane %v5596_v63, 4  ;;  %v8632_v39 = vpop.eup %6852 }
 0x813   : > { %v5560_v19 = vpop.xlane.xlu1 %5559  ;;  %v5664_v48 = vadd.f32 %v5620_v22, %v5617_v56 }
 0x814   : > { %v5570_v33 = vrot.slane %v5560_v19, 4  ;;  %v5508_v6 = vrot.slane %v5507_v7, 1  ;;  %v5578_v34 = vrot.slane %v5577_v44, 2  ;;  %v5610_v38 = vadd.f32 %v5609_v9, %v5596_v63 }
 0x815   : > { %v5606_v61 = vadd.f32 %v5605_v3, %v5604_v43  ;;  %v2309_v18 = vpop.xlane.xlu0 %2308  ;;  %v5667_v46 = vadd.f32 %v5664_v48, %v8548_v15 }
 0x816   : > { %v5571_v58 = vadd.f32 %v5570_v33, %v5560_v19  ;;  %v5579_v40 = vadd.f32 %v5578_v34, %v5577_v44  ;;  %v5611_v10 = vrot.slane %v5610_v38, 2  ;;  %v5509_v20 = vadd.f32 %v5508_v6, %v5507_v7 }
 0x817   : > { %v4911_v31 = vpop.xlane.xlu1 %4910  ;;  %v5607_v41 = vrot.slane %v5606_v61, 1  ;;  %v2310_v63 = vrot.slane %v2309_v18, 4  ;;  %v8630_v7 = vmul.f32 2.0, %v8614_v0  ;;  %6860 = vrcp.f32 %v5667_v46 }
 0x818   : > { %v5572_v25 = vrot.slane %v5571_v58, 2  ;;  %v5580_v8 = vrot.slane %v5579_v40, 1  ;;  %v4921_v16 = vrot.slane %v4911_v31, 4  ;;  %v5612_v51 = vadd.f32 %v5611_v10, %v5610_v38 }
 0x819   : > { %v5619_v1 = vmul.f32 %v5509_v20, %v5509_v20  ;;  %v5622_v24 = vmul.f32 %v5509_v20, %v8576_v47  ;;  %v5608_v33 = vadd.f32 %v5607_v41, %v5606_v61  ;;  %v4136_v34 = vpop.xlane.xlu0 %4135  ;;  %v2311_v12 = vadd.f32 %v2310_v63, %v2309_v18 }
 0x81a   : > { %v5573_v14 = vadd.f32 %v5572_v25, %v5571_v58  ;;  %v5581_v43 = vadd.f32 %v5580_v8, %v5579_v40  ;;  %v4922_v62 = vadd.f32 %v4921_v16, %v4911_v31  ;;  %v5613_v56 = vrot.slane %v5612_v51, 1  ;;  %v8635_v40 = vpop.eup %6854 }
 0x81b   : > { %v5253_v3 = vpop.xlane.xlu1 %5252  ;;  %v5663_v48 = vadd.f32 %v5619_v1, %v8584_v42  ;;  %v4137_v61 = vrot.slane %v4136_v34, 4  ;;  %v5631_v20 = vsub.f32 %v5608_v33, %v5622_v24  ;;  %v2312_v41 = vrot.slane %v2311_v12, 2 }
 0x81c   : > { %v5574_v44 = vrot.slane %v5573_v14, 1  ;;  %v5629_v9 = vsub.f32 %v5581_v43, %v5620_v22  ;;  %v4923_v19 = vrot.slane %v4922_v62, 2  ;;  %v5263_v38 = vrot.slane %v5253_v3, 4 }
 0x81d   : > { %v5614_v16 = vadd.f32 %v5613_v56, %v5612_v51  ;;  %v4138_v57 = vadd.f32 %v4137_v61, %v4136_v34 }
 0x81e   : > { %v5575_v6 = vadd.f32 %v5574_v44, %v5573_v14  ;;  %v5642_v2 = vadd.f32 %v5629_v9, %v5626_v17  ;;  %v4924_v58 = vadd.f32 %v4923_v19, %v4922_v62  ;;  %v5264_v31 = vadd.f32 %v5263_v38, %v5253_v3  ;;  %v8643_v44 = vpop.eup %6856 }
 0x81f   : > { %v5590_v21 = vpop.xlane.xlu1 %5589  ;;  %v5666_v9 = vadd.f32 %v5663_v48, %v8548_v15  ;;  %v6859_v33 = vpop.eup %6858  ;;  %v5632_v38 = vsub.f32 %v5614_v16, %v8614_v0  ;;  %v4139_v34 = vrot.slane %v4138_v57, 2 }
 0x820   : > { %v5628_v10 = vsub.f32 %v5575_v6, %v5619_v1  ;;  %v5597_v22 = vrot.slane %v5590_v21, 4  ;;  %v5645_v25 = vadd.f32 %v5642_v2, %v8553_v35  ;;  %v4925_v47 = vrot.slane %v4924_v58, 1 }
 0x821   : > { %v5265_v18 = vrot.slane %v5264_v31, 2  ;;  %v5653_v1 = vmul.f32 2.0, %v5622_v24  ;;  %v5634_v6 = vmul.f32 2.0, %v5631_v20  ;;  %v5635_v20 = vmul.f32 2.0, %v5632_v38 }
 0x822   : > { %v5641_v17 = vadd.f32 %v5628_v10, %v5625_v23  ;;  %v5598_v8 = vadd.f32 %v5597_v22, %v5590_v21  ;;  %6862 = vrcp.f32 %v5645_v25  ;;  %v4926_v14 = vadd.f32 %v4925_v47, %v4924_v58 }
 0x823   : > { %v5256_v43 = vpop.xlane.xlu1 %5255  ;;  %v5266_v62 = vadd.f32 %v5265_v18, %v5264_v31  ;;  %v2313_v58 = vadd.f32 %v2312_v41, %v2311_v12  ;;  %v8649_v22 = vadd.f32 %v8548_v15, %v5653_v1  ;;  %v5638_v0 = vadd.f32 %v8553_v35, %v5634_v6 }
 0x824   : > { %v5644_v63 = vadd.f32 %v5641_v17, %v8553_v35  ;;  %v5599_v3 = vrot.slane %v5598_v8, 2  ;;  %v5269_v46 = vrot.slane %v5256_v43, 4  ;;  %v4949_v42 = vsub.f32 %v4926_v14, %v8286_v32 }
 0x825   : > { %v5267_v23 = vrot.slane %v5266_v62, 1  ;;  %v2314_v18 = vrot.slane %v2313_v58, 1 }
 0x826   : > { %6864 = vrcp.f32 %v5644_v63  ;;  %v5600_v19 = vadd.f32 %v5599_v3, %v5598_v8  ;;  %v5270_v51 = vadd.f32 %v5269_v46, %v5256_v43  ;;  %v4952_v2 = vmul.f32 2.0, %v4949_v42  ;;  %v8656_v43 = vpop.eup %6860 }
 0x827   : > { %v2283_v56 = vpop.xlane.xlu1 %2282  ;;  %v5268_v21 = vadd.f32 %v5267_v23, %v5266_v62  ;;  %6866 = vrcp.f32 %v5666_v9  ;;  %v4140_v62 = vadd.f32 %v4139_v34, %v4138_v57  ;;  %v5639_v23 = vadd.f32 %v8553_v35, %v5635_v20 }
 0x828   : > { %v5601_v10 = vrot.slane %v5600_v19, 1  ;;  %v5271_v31 = vrot.slane %v5270_v51, 2  ;;  %v2284_v24 = vrot.slane %v2283_v56, 4  ;;  %v4956_v32 = vadd.f32 %v8459_v54, %v4952_v2 }
 0x829   : > { %v5291_v48 = vsub.f32 %v5268_v21, %v8561_v52  ;;  %v2315_v34 = vadd.f32 %v2314_v18, %v2313_v58 }
 0x82a   : > { %v5602_v25 = vadd.f32 %v5601_v10, %v5600_v19  ;;  %v5272_v47 = vadd.f32 %v5271_v31, %v5270_v51  ;;  %v2285_v61 = vadd.f32 %v2284_v24, %v2283_v56  ;;  %v4968_v17 = vmul.f32 %v8579_v60, %v4956_v32 }
 0x82b   : > { %v4122_v12 = vpop.xlane.xlu1 %4121  ;;  %v5294_v8 = vmul.f32 2.0, %v5291_v48 }
 0x82c   : > { %v5630_v16 = vsub.f32 %v5602_v25, %v8589_v28  ;;  %v5273_v41 = vrot.slane %v5272_v47, 1  ;;  %v2286_v14 = vrot.slane %v2285_v61, 2  ;;  %v4123_v54 = vrot.slane %v4122_v12, 4 }
 0x82d   : > { %v5008_v52 = vsel %vm4992_vm9, %v4968_v17, 0.0  ;;  %v4978_v63 = vmul.f32 %v8518_v26, %v4968_v17  ;;  %v5298_v3 = vadd.f32 %v8492_v13, %v5294_v8 }
 0x82e   : > { %v5633_v46 = vmul.f32 2.0, %v5630_v16  ;;  %v5274_v1 = vadd.f32 %v5273_v41, %v5272_v47  ;;  %v5009_v60 = vadd.f32 %v5008_v52, %v8600_v49  ;;  %v4124_v9 = vadd.f32 %v4123_v54, %v4122_v12 }
 0x82f   : > { %v2287_v42 = vadd.f32 %v2286_v14, %v2285_v61  ;;  %v4990_v28 = vmul.f32 %v8559_v4, %v4978_v63  ;;  %v6863_v19 = vpop.eup %6862  ;;  %v5310_v57 = vmul.f32 %v8632_v39, %v5298_v3  ;;  %v4141_v49 = vrot.slane %v4140_v62, 1 }
 0x830   : > { %v5637_v51 = vadd.f32 %v8553_v35, %v5633_v46  ;;  %v5292_v6 = vsub.f32 %v5274_v1, %v8568_v36  ;;  %v5011_v26 = vadd.f32 %v8623_v55, %v5009_v60  ;;  %v4125_v38 = vrot.slane %v4124_v9, 2 }
 0x831   : > { %v2288_v2 = vrot.slane %v2287_v42, 1  ;;  %v4994_v56 = vsel %vm4992_vm9, %v4990_v28, 0.0  ;;  %v5349_v10 = vsel %vm4992_vm9, %v5310_v57, 0.0  ;;  %v5651_v55 = vmul.f32 %v6863_v19, %v5639_v23 }
 0x832   : > { %v5295_v21 = vmul.f32 2.0, %v5292_v6  ;;  %5012 = vadd.xlane.f32.xlu0 %v5011_v26  ;;  %v4995_v4 = vadd.f32 %v4994_v56, %v8608_v50  ;;  %v5649_v31 = vmul.f32 %v6859_v33, %v5637_v51  ;;  %v4126_v32 = vadd.f32 %v4125_v38, %v4124_v9 }
 0x833   : > { %v6865_v24 = vpop.eup %6864  ;;  %v2289_v35 = vadd.f32 %v2288_v2, %v2287_v42  ;;  %v5350_v36 = vadd.f32 %v5349_v10, %v8618_v5  ;;  %v5320_v61 = vmul.f32 %v8573_v27, %v5310_v57  ;;  %v5658_v50 = vadd.f32 %v8548_v15, %v8630_v7 }
 0x834   : > { %v4997_v39 = vadd.f32 %v8627_v37, %v4995_v4  ;;  %v5299_v48 = vadd.f32 %v8492_v13, %v5295_v21  ;;  %v5650_v25 = vmul.f32 %v6865_v24, %v5638_v0  ;;  %v4127_v47 = vrot.slane %v4126_v32, 1  ;;  %v6867_v20 = vpop.eup %6866 }
 0x835   : > { %6739 = vpush %v2289_v35  ;;  %v5659_v33 = vmul.f32 %v8604_v59, %v5649_v31  ;;  %v4142_v5 = vadd.f32 %v4141_v49, %v4140_v62  ;;  %v5688_v12 = vsel %vm4992_vm9, %v5649_v31, 0.0  ;;  %v5332_v27 = vmul.f32 %v8610_v30, %v5320_v61 }
 0x836   : > { %6741 = vpush %v2315_v34  ;;  %4998 = vadd.xlane.f32.xlu1 %v4997_v39  ;;  %v5311_v58 = vmul.f32 %v8635_v40, %v5299_v48  ;;  %v5689_v37 = vsel %vm4992_vm9, %v5650_v25, 0.0  ;;  %v5660_v13 = vmul.f32 %v8649_v22, %v5650_v25  ;;  %v4128_v0 = vadd.f32 %v4127_v47, %v4126_v32 }
 0x837   : > { %v5661_v17 = vmul.f32 %v5658_v50, %v5651_v55  ;;  %v5671_v7 = vmul.f32 %v8643_v44, %v5659_v33  ;;  %v5690_v40 = vadd.f32 %v5689_v37, %v5688_v12  ;;  %v5334_v16 = vsel %vm4992_vm9, %v8537_v53, 0.0 }
 0x838   : > { %v5351_v15 = vsel %vm4992_vm9, %v5311_v58, 0.0  ;;  %v5321_v59 = vmul.f32 %v8594_v45, %v5311_v58  ;;  %v5672_v18 = vmul.f32 %v6867_v20, %v5660_v13  ;;  %6743 = vpush %v4128_v0  ;;  %v5335_v22 = vsel %vm4992_vm9, %v5332_v27, 0.0 }
 0x839   : > { %v5352_v8 = vadd.f32 %v5351_v15, %v5350_v36  ;;  %6745 = vpush %v4142_v5  ;;  %v5336_v30 = vadd.f32 %v5335_v22, %v5334_v16  ;;  %v5691_v45 = vsel %vm4992_vm9, %v5651_v55, 0.0  ;;  %v5673_v54 = vmul.f32 %v8656_v43, %v5661_v17 }
 0x83a   : > { %v5333_v41 = vmul.f32 %v8612_v11, %v5321_v59  ;;  %v5675_v14 = vsel %vm4992_vm9, %v5672_v18, 0.0  ;;  %v5674_v52 = vsel %vm4992_vm9, %v5671_v7, 0.0  ;;  %v5692_v63 = vadd.f32 %v5691_v45, %v5690_v40 }
 0x83b   : > { %5353 = vadd.xlane.f32.xlu0 %v5352_v8  ;;  %v5676_v53 = vadd.f32 %v5675_v14, %v5674_v52  ;;  %v5677_v3 = vsel %vm4992_vm9, %v5673_v54, 0.0 }
 0x83c   : > { %v5337_v44 = vsel %vm4992_vm9, %v5333_v41, 0.0 }
 0x83d   : > { %v5338_v62 = vadd.f32 %v5337_v44, %v5336_v30  ;;  %v5678_v11 = vadd.f32 %v5677_v3, %v5676_v53 }
 0x83f   : > { %5693 = vadd.xlane.f32.xlu0 %v5692_v63  ;;  %5339 = vadd.xlane.f32.xlu1 %v5338_v62 }
 0x843   : > { %5679 = vadd.xlane.f32.xlu1 %v5678_v11 }
 0x866   : > { %s6740_s30 = spop %6739 }
 0x867   : > { %s6742_s22 = spop %6741  ;;  %v5703_v17 = vstv %s6740_s30 }
 0x868   : > { %v5705_v15 = vstv %s6742_s22  ;;  %v5704_v8 = vsel %vm5702_vm10, %v5703_v17, 0.0  ;;  %s547_s22 = scalar_lea.vmem %s8742_s15, %s5848_s20 }
 0x869   : > { %s6744_s26 = spop %6743  ;;  %v5706_v22 = vsel %vm5702_vm10, %v5705_v15, 0.0 }
 0x86a   : > { %s6746_s27 = spop %6745  ;;  %v5708_v59 = vstv %s6744_s26 }
 0x86b   : > { %v5710_v7 = vstv %s6746_s27  ;;  %v5709_v41 = vsel %vm5707_vm11, %v5708_v59, %v5704_v8 }
 0x86c   : > { %v5711_v14 = vsel %vm5707_vm11, %v5710_v7, %v5706_v22 }
 0x8bb   : > { %v5013_v46 = vpop.xlane.xlu0 %5012 }
 0x8bc   : > { %v5014_v1 = vrot.slane %v5013_v46, 4 }
 0x8be   : > { %v5015_v60 = vadd.f32 %v5014_v1, %v5013_v46 }
 0x8bf   : > { %v4999_v9 = vpop.xlane.xlu1 %4998 }
 0x8c0   : > { %v5016_v42 = vrot.slane %v5015_v60, 2  ;;  %v5000_v28 = vrot.slane %v4999_v9, 4 }
 0x8c2   : > { %v5001_v23 = vadd.f32 %v5000_v28, %v4999_v9  ;;  %v5017_v19 = vadd.f32 %v5016_v42, %v5015_v60 }
 0x8c4   : > { %v5002_v43 = vrot.slane %v5001_v23, 2  ;;  %v5354_v51 = vpop.xlane.xlu0 %5353  ;;  %v5018_v38 = vrot.slane %v5017_v19, 1 }
 0x8c5   : > { %v5355_v6 = vrot.slane %v5354_v51, 4 }
 0x8c6   : > { %v5003_v26 = vadd.f32 %v5002_v43, %v5001_v23  ;;  %v5019_v32 = vadd.f32 %v5018_v38, %v5017_v19 }
 0x8c7   : > { %v5356_v57 = vadd.f32 %v5355_v6, %v5354_v51 }
 0x8c8   : > { %v5694_v2 = vpop.xlane.xlu0 %5693  ;;  %v5340_v56 = vpop.xlane.xlu1 %5339  ;;  %v5004_v49 = vrot.slane %v5003_v26, 1 }
 0x8c9   : > { %v5357_v21 = vrot.slane %v5356_v57, 2  ;;  %v5695_v4 = vrot.slane %v5694_v2, 4  ;;  %v5341_v10 = vrot.slane %v5340_v56, 4 }
 0x8ca   : > { %v5005_v31 = vadd.f32 %v5004_v49, %v5003_v26 }
 0x8cb   : > { %v5696_v24 = vadd.f32 %v5695_v4, %v5694_v2  ;;  %v5342_v35 = vadd.f32 %v5341_v10, %v5340_v56  ;;  %v5358_v55 = vadd.f32 %v5357_v21, %v5356_v57 }
 0x8cc   : > { %6747 = vpush %v5005_v31  ;;  %v5680_v36 = vpop.xlane.xlu1 %5679 }
 0x8cd   : > { %v5697_v34 = vrot.slane %v5696_v24, 2  ;;  %v5343_v39 = vrot.slane %v5342_v35, 2  ;;  %6749 = vpush %v5019_v32  ;;  %v5681_v48 = vrot.slane %v5680_v36, 4  ;;  %v5359_v50 = vrot.slane %v5358_v55, 1 }
 0x8cf   : > { %v5682_v25 = vadd.f32 %v5681_v48, %v5680_v36  ;;  %v5344_v47 = vadd.f32 %v5343_v39, %v5342_v35  ;;  %v5698_v61 = vadd.f32 %v5697_v34, %v5696_v24  ;;  %v5360_v37 = vadd.f32 %v5359_v50, %v5358_v55 }
 0x8d1   : > { %v5683_v33 = vrot.slane %v5682_v25, 2  ;;  %v5345_v20 = vrot.slane %v5344_v47, 1  ;;  %v5699_v13 = vrot.slane %v5698_v61, 1 }
 0x8d3   : > { %v5684_v5 = vadd.f32 %v5683_v33, %v5682_v25  ;;  %v5346_v58 = vadd.f32 %v5345_v20, %v5344_v47  ;;  %v5700_v27 = vadd.f32 %v5699_v13, %v5698_v61 }
 0x8d5   : > { %6751 = vpush %v5346_v58  ;;  %v5685_v0 = vrot.slane %v5684_v5, 1 }
 0x8d6   : > { %6753 = vpush %v5360_v37 }
 0x8d7   : > { %v5686_v12 = vadd.f32 %v5685_v0, %v5684_v5 }
 0x8d9   : > { %6755 = vpush %v5686_v12 }
 0x8da   : > { %6757 = vpush %v5700_v27 }
 0x8fd   : > { %s6748_s28 = spop %6747 }
 0x8fe   : > { %s6750_s29 = spop %6749  ;;  %v5713_v18 = vstv %s6748_s28 }
 0x8ff   : > { %v5715_v40 = vstv %s6750_s29  ;;  %v5714_v45 = vsel %vm5712_vm12, %v5713_v18, %v5709_v41 }
 0x900   : > { %v5716_v44 = vsel %vm5712_vm12, %v5715_v40, %v5711_v14 }
 0x906   : > { %s6752_s16 = spop %6751 }
 0x907   : > { %s6754_s17 = spop %6753  ;;  %v5718_v16 = vstv %s6752_s16 }
 0x908   : > { %v5720_v30 = vstv %s6754_s17  ;;  %v5719_v54 = vsel %vm5717_vm13, %v5718_v16, %v5714_v45 }
 0x909   : > { %v5721_v63 = vsel %vm5717_vm13, %v5720_v30, %v5716_v44 }
 0x90a   : > { %s6756_s24 = spop %6755 }
 0x90b   : > { %v5723_v52 = vstv %s6756_s24  ;;  %s6758_s26 = spop %6757 }
 0x90c   : > { %v5724_v62 = vsel %vm5722_vm14, %v5723_v52, %v5719_v54  ;;  %v5725_v53 = vstv %s6758_s26 }
 0x90d   : > { %5727 = vst [vmem:[%s543_s23] sm:$0xff] %v5724_v62  ;;  %v5726_v3 = vsel %vm5722_vm14, %v5725_v53, %v5721_v63 }
 0x90e   : > { %5728 = vst [vmem:[%s547_s22] sm:$0xff] %v5726_v3 }
 0x90f PF: > { %s27_s18 = sadd.s32 1, %s6893_s18  }
 0x910   : > { %p24_p2 = scmp.ge.s32.totalorder %s27_s18, 4  }
 0x912   :  { %26 = sbr.rel (!%p24_p2) target bundleno = 1 (0x1), region = 126 }
 0x917   :  { %5762 = vsyncpa [#allocation3], 1 }
 0x918   :  { %5764 = vsyncpa [#allocation3 + $0x1], 1 }

</bundles_post_ra>
